<compile_context>
chip_gen: v7x
topology: tpu7x:2x2x1
jax: 0.10.0
libtpu: 0.0.40
codegen_flags: <defaults>
</compile_context>

<pallas_src>
import functools
import math

import numpy as np
import jax
import jax.numpy as jnp
from jax.experimental import pallas as pl
from jax.experimental.pallas import tpu as pltpu

LN_EPS = 1e-5          # torch.nn.LayerNorm default
_MIN_TS = 128          # minimum sequence tile (MXU M dimension)

# Capability check once at import (review: no broad try/except around every call).
_RESIDENT = pl.Buffered(1) if hasattr(pl, "Buffered") else None


# --------------------------------------------------------------------------- #
# Kernel
# --------------------------------------------------------------------------- #
def _fnet_kernel(xb_ref, xres_ref, cs_ref, ss_ref, ch_ref, nsh_ref,
                 g1_ref, be1_ref, w1_ref, b1_ref, w2_ref, b2_ref,
                 g2_ref, be2_ref, o_ref, *, dft_resident, seq_axis, ts):
    # --- sequence-DFT operand rows for this tile ---
    if dft_resident:
        row0 = pl.multiple_of(pl.program_id(seq_axis) * ts, ts)
        cs_t = cs_ref[pl.ds(row0, ts), :]                 # (ts, S_pad) bf16
        ss_t = ss_ref[pl.ds(row0, ts), :]
    else:
        cs_t = cs_ref[...]                                # streamed (ts, S_pad)
        ss_t = ss_ref[...]

    x_bf = xb_ref[0]                                      # (S_pad, H) bf16, pre-cast

    # --- Fourier mixing: Re(FFT_seq(FFT_hid(x)))[tile], 4 MXU dots, no copies ---
    u = jnp.dot(cs_t, x_bf, preferred_element_type=jnp.float32)       # (ts, H)
    v = jnp.dot(ss_t, x_bf, preferred_element_type=jnp.float32)       # (ts, H)
    fft_out = (jnp.dot(u.astype(jnp.bfloat16), ch_ref[...],
                       preferred_element_type=jnp.float32)
               + jnp.dot(v.astype(jnp.bfloat16), nsh_ref[...],
                         preferred_element_type=jnp.float32))          # (ts, H)

    # --- mixing_layer_norm(fft_out + x[tile]), single reduction pass ---
    y = fft_out + xres_ref[0]
    mu = jnp.mean(y, axis=-1, keepdims=True)
    var = jnp.mean(y * y, axis=-1, keepdims=True) - mu * mu
    y = (y - mu) * jax.lax.rsqrt(var + LN_EPS) * g1_ref[...] + be1_ref[...]

    # --- feed_forward + GELU (tanh approx -> EUP, overlaps MXU) ---
    h = jnp.dot(y.astype(jnp.bfloat16), w1_ref[...],
                preferred_element_type=jnp.float32) + b1_ref[...]      # (ts, He)
    h = jax.nn.gelu(h, approximate=True)

    # --- output_dense (+ dropout == identity at eval) ---
    out = jnp.dot(h.astype(jnp.bfloat16), w2_ref[...],
                  preferred_element_type=jnp.float32) + b2_ref[...]    # (ts, H)

    # --- output_layer_norm(out + y), single reduction pass ---
    z = out + y
    mu2 = jnp.mean(z, axis=-1, keepdims=True)
    var2 = jnp.mean(z * z, axis=-1, keepdims=True) - mu2 * mu2
    z = (z - mu2) * jax.lax.rsqrt(var2 + LN_EPS) * g2_ref[...] + be2_ref[...]

    o_ref[0] = z.astype(o_ref.dtype)


# --------------------------------------------------------------------------- #
# Planning helpers (generation-aware tiles / VMEM budget)
# --------------------------------------------------------------------------- #
def _vmem_capacity_bytes():
    try:
        cap = getattr(pltpu.get_tpu_info(), "vmem_capacity_bytes", None)
        if cap:
            return int(cap)
    except Exception:
        pass
    return 64 * 1024 * 1024          # conservative default: v7x per-TensorCore VMEM


def _plan(B, S, H, He, ts_override=None):
    have_res = _RESIDENT is not None
    budget = int(_vmem_capacity_bytes() * 0.85)
    S_pad = -(-S // _MIN_TS) * _MIN_TS          # pad sequence to a multiple of 128

    def usage(ts, dft_resident):
        mult = 1 if have_res else 2             # no Buffered(1) -> double-buffered consts
        r = 0
        if dft_resident:
            r += 2 * S_pad * S_pad * 2 * mult   # cs, ss residents (bf16)
        else:
            r += 2 * 2 * ts * S_pad * 2         # streamed cs/ss tiles, double-buffered
        r += 2 * H * H * 2 * mult               # ch, nsh (bf16)
        r += 2 * H * He * 2 * mult              # w1, w2 (bf16)
        r += (6 * H + 2 * He) * 4 * mult        # LN params + biases
        r += 2 * S_pad * H * 2                  # bf16 x slab (double-buffered, per-b)
        r += 2 * 2 * ts * H * 4                 # f32 residual tile + output tile
        r += ts * (8 * H + 3 * He) * 4          # live f32 intermediates (rough)
        return r + (2 << 20)

    if ts_override is not None:
        ts = int(ts_override)
        dft_resident = usage(ts, True) <= budget
    else:
        pick = None
        for dft_resident in (True, False):
            for cand in (512, 256, 128):        # big tiles when VMEM allows (v5e/v6e)
                if S_pad % cand == 0 and usage(cand, dft_resident) <= budget:
                    pick = (cand, dft_resident)
                    break
            if pick is not None:
                break
        if pick is None:
            pick = (_MIN_TS, False)
        ts, dft_resident = pick
        # v7x has 2 TensorCores: expose >= 2 parallel grid steps even when B == 1.
        if B == 1 and S_pad // ts < 2 and ts > _MIN_TS:
            ts //= 2

    n_s = S_pad // ts
    vmem_limit = max(32 << 20, min(budget, int(usage(ts, dft_resident) * 1.25) + (4 << 20)))
    return ts, S_pad, n_s, dft_resident, vmem_limit


@functools.lru_cache(maxsize=8)
def _dft_mats(S, S_pad, H):
    # True-S DFT angles; padded rows are discarded, padded columns hit zero x rows.
    n = np.arange(S_pad, dtype=np.float64)
    ang_s = 2.0 * np.pi * np.outer(n, n) / float(S)
    k = np.arange(H, dtype=np.float64)
    ang_h = 2.0 * np.pi * np.outer(k, k) / float(H)
    cs = jnp.asarray(np.cos(ang_s), jnp.bfloat16)
    ss = jnp.asarray(np.sin(ang_s), jnp.bfloat16)
    ch = jnp.asarray(np.cos(ang_h), jnp.bfloat16)
    nsh = jnp.asarray(-np.sin(ang_h), jnp.bfloat16)
    return cs, ss, ch, nsh


# --------------------------------------------------------------------------- #
# Wrapper
# --------------------------------------------------------------------------- #
def _fnet_pallas(x, params, *, ts=None, out_dtype=None):
    B, S, H = x.shape
    He = params["w1"].shape[1]
    out_dtype = x.dtype if out_dtype is None else out_dtype

    ts, S_pad, n_s, dft_resident, vmem_limit = _plan(B, S, H, He, ts_override=ts)
    assert S_pad % ts == 0 and ts % 8 == 0, "sequence tile must divide padded S"

    cs, ss, ch, nsh = _dft_mats(S, S_pad, H)

    pad = S_pad - S
    x_f32 = x.astype(jnp.float32)
    if pad:
        x_f32 = jnp.pad(x_f32, ((0, 0), (0, pad), (0, 0)))
    x_bf16 = x_f32.astype(jnp.bfloat16)        # cast ONCE, outside the grid loop

    def const_spec(shape):
        nd = len(shape)
        if _RESIDENT is not None:
            return pl.BlockSpec(shape, lambda i, j: (0,) * nd, pipeline_mode=_RESIDENT)
        return pl.BlockSpec(shape, lambda i, j: (0,) * nd)

    if dft_resident:
        grid = (B, n_s)
        seq_axis = 1
        xb_spec = pl.BlockSpec((1, S_pad, H), lambda b, s: (b, 0, 0))
        xr_spec = pl.BlockSpec((1, ts, H), lambda b, s: (b, s, 0))
        cs_spec = const_spec((S_pad, S_pad))
        ss_spec = const_spec((S_pad, S_pad))
        out_spec = pl.BlockSpec((1, ts, H), lambda b, s: (b, s, 0))
    else:
        # DFT matrices too large to keep resident: stream (ts, S_pad) row tiles and
        # iterate batch innermost so each tile is reused across the whole batch.
        grid = (n_s, B)
        seq_axis = 0
        xb_spec = pl.BlockSpec((1, S_pad, H), lambda s, b: (b, 0, 0))
        xr_spec = pl.BlockSpec((1, ts, H), lambda s, b: (b, s, 0))
        cs_spec = pl.BlockSpec((ts, S_pad), lambda s, b: (s, 0))
        ss_spec = pl.BlockSpec((ts, S_pad), lambda s, b: (s, 0))
        out_spec = pl.BlockSpec((1, ts, H), lambda s, b: (b, s, 0))

    in_specs = [
        xb_spec, xr_spec, cs_spec, ss_spec,
        const_spec((H, H)), const_spec((H, H)),            # C_H, -S_H
        const_spec((1, H)), const_spec((1, H)),            # mixing LN gamma/beta
        const_spec((H, He)), const_spec((1, He)),          # feed_forward W, b
        const_spec((He, H)), const_spec((1, H)),           # output_dense W, b
        const_spec((1, H)), const_spec((1, H)),            # output LN gamma/beta
    ]

    flops = 4 * B * S_pad * H * (S_pad + H + He)
    bytes_accessed = (B * S_pad * H * (4 + 2 + jnp.dtype(out_dtype).itemsize)
                      + 2 * S_pad * S_pad * 2 + 2 * H * H * 2 + 2 * H * He * 2
                      + (6 * H + 2 * He) * 4)
    cost = pl.CostEstimate(flops=int(flops), transcendentals=int(B * S_pad * He),
                           bytes_accessed=int(bytes_accessed))

    kernel = functools.partial(_fnet_kernel, dft_resident=dft_resident,
                               seq_axis=seq_axis, ts=ts)

    y = pl.pallas_call(
        kernel,
        out_shape=jax.ShapeDtypeStruct((B, S_pad, H), out_dtype),
        grid_spec=pltpu.PrefetchScalarGridSpec(
            num_scalar_prefetch=0,
            grid=grid,
            in_specs=in_specs,
            out_specs=out_spec,
        ),
        compiler_params=pltpu.CompilerParams(
            dimension_semantics=("parallel", "parallel"),
            vmem_limit_bytes=int(vmem_limit),
        ),
        cost_estimate=cost,
    )(x_bf16, x_f32, cs, ss, ch, nsh,
      params["ln1_g"], params["ln1_b"],
      params["w1"], params["b1"], params["w2"], params["b2"],
      params["ln2_g"], params["ln2_b"])

    return y[:, :S, :] if pad else y


def fnet_fairseq_layer(x, params, *, ts=None, out_dtype=None):
    """Forward pass of FNetFairseqLayer (eval mode). Returns (y, None)."""
    # TODO(synk): training-time dropout (stochastic masking) is not implemented.
    return _fnet_pallas(x, params, ts=ts, out_dtype=out_dtype), None


# --------------------------------------------------------------------------- #
# Parameters and references
# --------------------------------------------------------------------------- #
def make_params(key, hidden, expand_ratio=1):
    He = hidden * expand_ratio
    ks = jax.random.split(key, 8)
    return {
        "ln1_g": 1.0 + 0.1 * jax.random.normal(ks[0], (1, hidden), jnp.float32),
        "ln1_b": 0.1 * jax.random.normal(ks[1], (1, hidden), jnp.float32),
        "ln2_g": 1.0 + 0.1 * jax.random.normal(ks[2], (1, hidden), jnp.float32),
        "ln2_b": 0.1 * jax.random.normal(ks[3], (1, hidden), jnp.float32),
        "w1": (0.05 * jax.random.normal(ks[4], (hidden, He), jnp.float32)).astype(jnp.bfloat16),
        "b1": 0.05 * jax.random.normal(ks[5], (1, He), jnp.float32),
        "w2": (0.05 * jax.random.normal(ks[6], (He, hidden), jnp.float32)).astype(jnp.bfloat16),
        "b2": 0.05 * jax.random.normal(ks[7], (1, hidden), jnp.float32),
    }


def _ln_ref(v, g, b):
    mu = jnp.mean(v, axis=-1, keepdims=True)
    var = jnp.mean(v * v, axis=-1, keepdims=True) - mu * mu
    return (v - mu) * jax.lax.rsqrt(var + LN_EPS) * g + b


def _reference_module(x, p):
    """Exact f32 semantics of the PyTorch module (true FFT mixing, erf GELU, eval)."""
    w1 = p["w1"].astype(jnp.float32)
    w2 = p["w2"].astype(jnp.float32)
    fft_out = jnp.real(jnp.fft.fft(jnp.fft.fft(x, axis=-1), axis=-2))
    y = _ln_ref(fft_out + x, p["ln1_g"][0], p["ln1_b"][0])
    h = y @ w1 + p["b1"][0]
    h = 0.5 * h * (1.0 + jax.lax.erf(h / math.sqrt(2.0)))
    out = h @ w2 + p["b2"][0]
    return _ln_ref(out + y, p["ln2_g"][0], p["ln2_b"][0])


def _reference_matched(x, p):
    """Pure-JAX reference mimicking the kernel numerics (bf16 MXU operands, tanh GELU)."""
    B, S, H = x.shape
    S_pad = -(-S // _MIN_TS) * _MIN_TS
    cs, ss, ch, nsh = _dft_mats(S, S_pad, H)
    xp = x.astype(jnp.float32)
    if S_pad != S:
        xp = jnp.pad(xp, ((0, 0), (0, S_pad - S), (0, 0)))
    xb = xp.astype(jnp.bfloat16)
    f32 = jnp.float32
    u = jnp.einsum("mn,bnh->bmh", cs, xb, preferred_element_type=f32)
    v = jnp.einsum("mn,bnh->bmh", ss, xb, preferred_element_type=f32)
    fft_out = (jnp.einsum("bmh,hk->bmk", u.astype(jnp.bfloat16), ch, preferred_element_type=f32)
               + jnp.einsum("bmh,hk->bmk", v.astype(jnp.bfloat16), nsh, preferred_element_type=f32))
    y = _ln_ref(fft_out + xp, p["ln1_g"][0], p["ln1_b"][0])
    h = jnp.einsum("bmh,he->bme", y.astype(jnp.bfloat16), p["w1"],
                   preferred_element_type=f32) + p["b1"][0]
    h = jax.nn.gelu(h, approximate=True)
    out = jnp.einsum("bme,eh->bmh", h.astype(jnp.bfloat16), p["w2"],
                     preferred_element_type=f32) + p["b2"][0]
    z = _ln_ref(out + y, p["ln2_g"][0], p["ln2_b"][0])
    return z[:, :S, :]


# --------------------------------------------------------------------------- #
# Self-test
# --------------------------------------------------------------------------- #
if __name__ == "__main__":
    def _check(B, S, H, expand, seed):
        kx, kp = jax.random.split(jax.random.PRNGKey(seed))
        x = jax.random.normal(kx, (B, S, H), jnp.float32)
        p = make_params(kp, H, expand_ratio=expand)
        y, state = fnet_fairseq_layer(x, p)
        y = jax.block_until_ready(y)
        assert y.shape == (B, S, H) and state is None
        yn = np.asarray(y)
        # Tight check vs a reference with identical bf16-operand / f32-accumulate,
        # tanh-GELU numerics -> verifies kernel math, tiling and padding.
        ref_m = np.asarray(jax.block_until_ready(_reference_matched(x, p)))
        assert np.max(np.abs(yn - ref_m)) < 3e-2, "mismatch vs numerics-matched reference"
        # Loose check vs exact-f32 FFT / erf-GELU module semantics (bf16 DFT and
        # FFN weights introduce ~1e-2-scale error, expected).
        ref_f = np.asarray(jax.block_until_ready(_reference_module(x, p)))
        assert np.max(np.abs(yn - ref_f)) < 2e-1, "drift vs exact module semantics"

    # Case 1: lane-dense small shapes (seed 0), resident DFT matrices.
    _check(B=2, S=128, H=256, expand=2, seed=0)
    # Case 2: B=1 with sequence padding (S=96 -> S_pad=128), expand_ratio=1.
    _check(B=1, S=96, H=128, expand=1, seed=1)

    print("KERNEL_OK")
</pallas_src>

<mosaic_0001>
module attributes {stable_mosaic.version = 11 : i64} {
  func.func @_fnet_kernel(%arg0: i32, %arg1: i32, %arg2: memref<1x128x256xbf16, #tpu.memory_space<vmem>>, %arg3: memref<1x128x256xf32, #tpu.memory_space<vmem>>, %arg4: memref<128x128xbf16, #tpu.memory_space<vmem>>, %arg5: memref<128x128xbf16, #tpu.memory_space<vmem>>, %arg6: memref<256x256xbf16, #tpu.memory_space<vmem>>, %arg7: memref<256x256xbf16, #tpu.memory_space<vmem>>, %arg8: memref<1x256xf32, #tpu.memory_space<vmem>>, %arg9: memref<1x256xf32, #tpu.memory_space<vmem>>, %arg10: memref<256x512xbf16, #tpu.memory_space<vmem>>, %arg11: memref<1x512xf32, #tpu.memory_space<vmem>>, %arg12: memref<512x256xbf16, #tpu.memory_space<vmem>>, %arg13: memref<1x256xf32, #tpu.memory_space<vmem>>, %arg14: memref<1x256xf32, #tpu.memory_space<vmem>>, %arg15: memref<1x256xf32, #tpu.memory_space<vmem>>, %arg16: memref<1x128x256xf32, #tpu.memory_space<vmem>>) attributes {dimension_semantics = [#tpu.dimension_semantics<parallel>, #tpu.dimension_semantics<parallel>], iteration_bounds = array<i64: 2, 1>, scalar_prefetch = 0 : i64, scratch_operands = 0 : i64, tpu.core_type = #tpu.core_type<tc>, window_params = [{transform_indices = @transform_0, window_bounds = array<i64: 1, 128, 256>}, {transform_indices = @transform_1, window_bounds = array<i64: 1, 128, 256>}, {pipeline_mode = #tpu.pipeline_mode<synchronous>, transform_indices = @transform_2, window_bounds = array<i64: 128, 128>}, {pipeline_mode = #tpu.pipeline_mode<synchronous>, transform_indices = @transform_3, window_bounds = array<i64: 128, 128>}, {pipeline_mode = #tpu.pipeline_mode<synchronous>, transform_indices = @transform_4, window_bounds = array<i64: 256, 256>}, {pipeline_mode = #tpu.pipeline_mode<synchronous>, transform_indices = @transform_5, window_bounds = array<i64: 256, 256>}, {pipeline_mode = #tpu.pipeline_mode<synchronous>, transform_indices = @transform_6, window_bounds = array<i64: 1, 256>}, {pipeline_mode = #tpu.pipeline_mode<synchronous>, transform_indices = @transform_7, window_bounds = array<i64: 1, 256>}, {pipeline_mode = #tpu.pipeline_mode<synchronous>, transform_indices = @transform_8, window_bounds = array<i64: 256, 512>}, {pipeline_mode = #tpu.pipeline_mode<synchronous>, transform_indices = @transform_9, window_bounds = array<i64: 1, 512>}, {pipeline_mode = #tpu.pipeline_mode<synchronous>, transform_indices = @transform_10, window_bounds = array<i64: 512, 256>}, {pipeline_mode = #tpu.pipeline_mode<synchronous>, transform_indices = @transform_11, window_bounds = array<i64: 1, 256>}, {pipeline_mode = #tpu.pipeline_mode<synchronous>, transform_indices = @transform_12, window_bounds = array<i64: 1, 256>}, {pipeline_mode = #tpu.pipeline_mode<synchronous>, transform_indices = @transform_13, window_bounds = array<i64: 1, 256>}, {transform_indices = @transform_14, window_bounds = array<i64: 1, 128, 256>}]} {
    %c128_i32 = arith.constant 128 : i32
    %0 = arith.muli %arg1, %c128_i32 : i32
    %1 = tpu.assume_multiple %0, 128 : i32
    %2 = arith.index_cast %1 : i32 to index
    %c0 = arith.constant 0 : index
    %3 = vector.load %arg4[%2, %c0] : memref<128x128xbf16, #tpu.memory_space<vmem>>, vector<128x128xbf16>
    %4 = arith.index_cast %1 : i32 to index
    %c0_0 = arith.constant 0 : index
    %5 = vector.load %arg5[%4, %c0_0] : memref<128x128xbf16, #tpu.memory_space<vmem>>, vector<128x128xbf16>
    %c0_1 = arith.constant 0 : index
    %c0_2 = arith.constant 0 : index
    %c0_3 = arith.constant 0 : index
    %6 = vector.load %arg2[%c0_1, %c0_2, %c0_3] : memref<1x128x256xbf16, #tpu.memory_space<vmem>>, vector<1x128x256xbf16>
    %7 = vector.shape_cast %6 : vector<1x128x256xbf16> to vector<128x256xbf16>
    %cst = arith.constant dense<0.000000e+00> : vector<128x256xf32>
    %8 = tpu.matmul %3, %7, %cst {dimension_numbers = #tpu.dot_dimension_numbers<[1], [0], [0], [1], [0, 0, 1, 1], [], []>} : vector<128x128xbf16>, vector<128x256xbf16>, vector<128x256xf32> -> vector<128x256xf32>
    %cst_4 = arith.constant dense<0.000000e+00> : vector<128x256xf32>
    %9 = tpu.matmul %5, %7, %cst_4 {dimension_numbers = #tpu.dot_dimension_numbers<[1], [0], [0], [1], [0, 0, 1, 1], [], []>} : vector<128x128xbf16>, vector<128x256xbf16>, vector<128x256xf32> -> vector<128x256xf32>
    %10 = arith.truncf %8 : vector<128x256xf32> to vector<128x256xbf16>
    %c0_5 = arith.constant 0 : index
    %c0_6 = arith.constant 0 : index
    %11 = vector.load %arg6[%c0_5, %c0_6] : memref<256x256xbf16, #tpu.memory_space<vmem>>, vector<256x256xbf16>
    %cst_7 = arith.constant dense<0.000000e+00> : vector<128x256xf32>
    %12 = tpu.matmul %10, %11, %cst_7 {dimension_numbers = #tpu.dot_dimension_numbers<[1], [0], [0], [1], [0, 0, 1, 1], [], []>} : vector<128x256xbf16>, vector<256x256xbf16>, vector<128x256xf32> -> vector<128x256xf32>
    %13 = arith.truncf %9 : vector<128x256xf32> to vector<128x256xbf16>
    %c0_8 = arith.constant 0 : index
    %c0_9 = arith.constant 0 : index
    %14 = vector.load %arg7[%c0_8, %c0_9] : memref<256x256xbf16, #tpu.memory_space<vmem>>, vector<256x256xbf16>
    %cst_10 = arith.constant dense<0.000000e+00> : vector<128x256xf32>
    %15 = tpu.matmul %13, %14, %cst_10 {dimension_numbers = #tpu.dot_dimension_numbers<[1], [0], [0], [1], [0, 0, 1, 1], [], []>} : vector<128x256xbf16>, vector<256x256xbf16>, vector<128x256xf32> -> vector<128x256xf32>
    %16 = arith.addf %12, %15 : vector<128x256xf32>
    %c0_11 = arith.constant 0 : index
    %c0_12 = arith.constant 0 : index
    %c0_13 = arith.constant 0 : index
    %17 = vector.load %arg3[%c0_11, %c0_12, %c0_13] : memref<1x128x256xf32, #tpu.memory_space<vmem>>, vector<1x128x256xf32>
    %18 = vector.shape_cast %17 : vector<1x128x256xf32> to vector<128x256xf32>
    %19 = arith.addf %16, %18 : vector<128x256xf32>
    %cst_14 = arith.constant dense<0.000000e+00> : vector<128xf32>
    %20 = vector.multi_reduction <add>, %19, %cst_14 [1] : vector<128x256xf32> to vector<128xf32>
    %21 = vector.shape_cast %20 : vector<128xf32> to vector<128x1xf32>
    %cst_15 = arith.constant 2.560000e+02 : f32
    %22 = vector.broadcast %cst_15 : f32 to vector<128x1xf32>
    %23 = arith.divf %21, %22 : vector<128x1xf32>
    %24 = arith.mulf %19, %19 : vector<128x256xf32>
    %cst_16 = arith.constant dense<0.000000e+00> : vector<128xf32>
    %25 = vector.multi_reduction <add>, %24, %cst_16 [1] : vector<128x256xf32> to vector<128xf32>
    %26 = vector.shape_cast %25 : vector<128xf32> to vector<128x1xf32>
    %cst_17 = arith.constant 2.560000e+02 : f32
    %27 = vector.broadcast %cst_17 : f32 to vector<128x1xf32>
    %28 = arith.divf %26, %27 : vector<128x1xf32>
    %29 = arith.mulf %23, %23 : vector<128x1xf32>
    %30 = arith.subf %28, %29 : vector<128x1xf32>
    %31 = vector.broadcast %23 : vector<128x1xf32> to vector<128x256xf32>
    %32 = arith.subf %19, %31 : vector<128x256xf32>
    %cst_18 = arith.constant 9.99999974E-6 : f32
    %33 = vector.broadcast %cst_18 : f32 to vector<128x1xf32>
    %34 = arith.addf %30, %33 : vector<128x1xf32>
    %35 = math.rsqrt %34 : vector<128x1xf32>
    %36 = vector.broadcast %35 : vector<128x1xf32> to vector<128x256xf32>
    %37 = arith.mulf %32, %36 : vector<128x256xf32>
    %c0_19 = arith.constant 0 : index
    %c0_20 = arith.constant 0 : index
    %38 = vector.load %arg8[%c0_19, %c0_20] : memref<1x256xf32, #tpu.memory_space<vmem>>, vector<1x256xf32>
    %39 = vector.broadcast %38 : vector<1x256xf32> to vector<128x256xf32>
    %40 = arith.mulf %37, %39 : vector<128x256xf32>
    %c0_21 = arith.constant 0 : index
    %c0_22 = arith.constant 0 : index
    %41 = vector.load %arg9[%c0_21, %c0_22] : memref<1x256xf32, #tpu.memory_space<vmem>>, vector<1x256xf32>
    %42 = vector.broadcast %41 : vector<1x256xf32> to vector<128x256xf32>
    %43 = arith.addf %40, %42 : vector<128x256xf32>
    %44 = arith.truncf %43 : vector<128x256xf32> to vector<128x256xbf16>
    %c0_23 = arith.constant 0 : index
    %c0_24 = arith.constant 0 : index
    %45 = vector.load %arg10[%c0_23, %c0_24] : memref<256x512xbf16, #tpu.memory_space<vmem>>, vector<256x512xbf16>
    %cst_25 = arith.constant dense<0.000000e+00> : vector<128x512xf32>
    %46 = tpu.matmul %44, %45, %cst_25 {dimension_numbers = #tpu.dot_dimension_numbers<[1], [0], [0], [1], [0, 0, 1, 1], [], []>} : vector<128x256xbf16>, vector<256x512xbf16>, vector<128x512xf32> -> vector<128x512xf32>
    %c0_26 = arith.constant 0 : index
    %c0_27 = arith.constant 0 : index
    %47 = vector.load %arg11[%c0_26, %c0_27] : memref<1x512xf32, #tpu.memory_space<vmem>>, vector<1x512xf32>
    %48 = vector.broadcast %47 : vector<1x512xf32> to vector<128x512xf32>
    %49 = arith.addf %46, %48 : vector<128x512xf32>
    %50 = arith.mulf %49, %49 : vector<128x512xf32>
    %51 = arith.mulf %49, %50 : vector<128x512xf32>
    %cst_28 = arith.constant 4.471500e-02 : f32
    %52 = vector.broadcast %cst_28 : f32 to vector<128x512xf32>
    %53 = arith.mulf %52, %51 : vector<128x512xf32>
    %54 = arith.addf %49, %53 : vector<128x512xf32>
    %cst_29 = arith.constant 0.797884583 : f32
    %55 = vector.broadcast %cst_29 : f32 to vector<128x512xf32>
    %56 = arith.mulf %55, %54 : vector<128x512xf32>
    %57 = math.tanh %56 : vector<128x512xf32>
    %cst_30 = arith.constant 1.000000e+00 : f32
    %58 = vector.broadcast %cst_30 : f32 to vector<128x512xf32>
    %59 = arith.addf %58, %57 : vector<128x512xf32>
    %cst_31 = arith.constant 5.000000e-01 : f32
    %60 = vector.broadcast %cst_31 : f32 to vector<128x512xf32>
    %61 = arith.mulf %60, %59 : vector<128x512xf32>
    %62 = arith.mulf %49, %61 : vector<128x512xf32>
    %63 = arith.truncf %62 : vector<128x512xf32> to vector<128x512xbf16>
    %c0_32 = arith.constant 0 : index
    %c0_33 = arith.constant 0 : index
    %64 = vector.load %arg12[%c0_32, %c0_33] : memref<512x256xbf16, #tpu.memory_space<vmem>>, vector<512x256xbf16>
    %cst_34 = arith.constant dense<0.000000e+00> : vector<128x256xf32>
    %65 = tpu.matmul %63, %64, %cst_34 {dimension_numbers = #tpu.dot_dimension_numbers<[1], [0], [0], [1], [0, 0, 1, 1], [], []>} : vector<128x512xbf16>, vector<512x256xbf16>, vector<128x256xf32> -> vector<128x256xf32>
    %c0_35 = arith.constant 0 : index
    %c0_36 = arith.constant 0 : index
    %66 = vector.load %arg13[%c0_35, %c0_36] : memref<1x256xf32, #tpu.memory_space<vmem>>, vector<1x256xf32>
    %67 = vector.broadcast %66 : vector<1x256xf32> to vector<128x256xf32>
    %68 = arith.addf %65, %67 : vector<128x256xf32>
    %69 = arith.addf %68, %43 : vector<128x256xf32>
    %cst_37 = arith.constant dense<0.000000e+00> : vector<128xf32>
    %70 = vector.multi_reduction <add>, %69, %cst_37 [1] : vector<128x256xf32> to vector<128xf32>
    %71 = vector.shape_cast %70 : vector<128xf32> to vector<128x1xf32>
    %cst_38 = arith.constant 2.560000e+02 : f32
    %72 = vector.broadcast %cst_38 : f32 to vector<128x1xf32>
    %73 = arith.divf %71, %72 : vector<128x1xf32>
    %74 = arith.mulf %69, %69 : vector<128x256xf32>
    %cst_39 = arith.constant dense<0.000000e+00> : vector<128xf32>
    %75 = vector.multi_reduction <add>, %74, %cst_39 [1] : vector<128x256xf32> to vector<128xf32>
    %76 = vector.shape_cast %75 : vector<128xf32> to vector<128x1xf32>
    %cst_40 = arith.constant 2.560000e+02 : f32
    %77 = vector.broadcast %cst_40 : f32 to vector<128x1xf32>
    %78 = arith.divf %76, %77 : vector<128x1xf32>
    %79 = arith.mulf %73, %73 : vector<128x1xf32>
    %80 = arith.subf %78, %79 : vector<128x1xf32>
    %81 = vector.broadcast %73 : vector<128x1xf32> to vector<128x256xf32>
    %82 = arith.subf %69, %81 : vector<128x256xf32>
    %cst_41 = arith.constant 9.99999974E-6 : f32
    %83 = vector.broadcast %cst_41 : f32 to vector<128x1xf32>
    %84 = arith.addf %80, %83 : vector<128x1xf32>
    %85 = math.rsqrt %84 : vector<128x1xf32>
    %86 = vector.broadcast %85 : vector<128x1xf32> to vector<128x256xf32>
    %87 = arith.mulf %82, %86 : vector<128x256xf32>
    %c0_42 = arith.constant 0 : index
    %c0_43 = arith.constant 0 : index
    %88 = vector.load %arg14[%c0_42, %c0_43] : memref<1x256xf32, #tpu.memory_space<vmem>>, vector<1x256xf32>
    %89 = vector.broadcast %88 : vector<1x256xf32> to vector<128x256xf32>
    %90 = arith.mulf %87, %89 : vector<128x256xf32>
    %c0_44 = arith.constant 0 : index
    %c0_45 = arith.constant 0 : index
    %91 = vector.load %arg15[%c0_44, %c0_45] : memref<1x256xf32, #tpu.memory_space<vmem>>, vector<1x256xf32>
    %92 = vector.broadcast %91 : vector<1x256xf32> to vector<128x256xf32>
    %93 = arith.addf %90, %92 : vector<128x256xf32>
    %c0_46 = arith.constant 0 : index
    %c0_47 = arith.constant 0 : index
    %c0_48 = arith.constant 0 : index
    %94 = vector.load %arg16[%c0_46, %c0_47, %c0_48] : memref<1x128x256xf32, #tpu.memory_space<vmem>>, vector<1x128x256xf32>
    %95 = vector.shape_cast %94 : vector<1x128x256xf32> to vector<128x256xf32>
    %96 = vector.shape_cast %93 : vector<128x256xf32> to vector<1x128x256xf32>
    tpu.vector_store %arg16[%c0_46, %c0_47, %c0_48], %96 {strides = array<i32>} : memref<1x128x256xf32, #tpu.memory_space<vmem>>, vector<1x128x256xf32>,
    return
  }
  func.func @transform_0(%arg0: i32, %arg1: i32) -> (i32, i32, i32) {
    %c0_i32 = arith.constant 0 : i32
    %c0_i32_0 = arith.constant 0 : i32
    %c0_i32_1 = arith.constant 0 : i32
    return %arg0, %c0_i32, %c0_i32_0 : i32, i32, i32
  }
  func.func @transform_1(%arg0: i32, %arg1: i32) -> (i32, i32, i32) {
    %c0_i32 = arith.constant 0 : i32
    %c0_i32_0 = arith.constant 0 : i32
    return %arg0, %arg1, %c0_i32 : i32, i32, i32
  }
  func.func @transform_2(%arg0: i32, %arg1: i32) -> (i32, i32) {
    %c0_i32 = arith.constant 0 : i32
    %c0_i32_0 = arith.constant 0 : i32
    %c0_i32_1 = arith.constant 0 : i32
    return %c0_i32, %c0_i32_0 : i32, i32
  }
  func.func @transform_3(%arg0: i32, %arg1: i32) -> (i32, i32) {
    %c0_i32 = arith.constant 0 : i32
    %c0_i32_0 = arith.constant 0 : i32
    %c0_i32_1 = arith.constant 0 : i32
    return %c0_i32, %c0_i32_0 : i32, i32
  }
  func.func @transform_4(%arg0: i32, %arg1: i32) -> (i32, i32) {
    %c0_i32 = arith.constant 0 : i32
    %c0_i32_0 = arith.constant 0 : i32
    %c0_i32_1 = arith.constant 0 : i32
    return %c0_i32, %c0_i32_0 : i32, i32
  }
  func.func @transform_5(%arg0: i32, %arg1: i32) -> (i32, i32) {
    %c0_i32 = arith.constant 0 : i32
    %c0_i32_0 = arith.constant 0 : i32
    %c0_i32_1 = arith.constant 0 : i32
    return %c0_i32, %c0_i32_0 : i32, i32
  }
  func.func @transform_6(%arg0: i32, %arg1: i32) -> (i32, i32) {
    %c0_i32 = arith.constant 0 : i32
    %c0_i32_0 = arith.constant 0 : i32
    %c0_i32_1 = arith.constant 0 : i32
    return %c0_i32, %c0_i32_0 : i32, i32
  }
  func.func @transform_7(%arg0: i32, %arg1: i32) -> (i32, i32) {
    %c0_i32 = arith.constant 0 : i32
    %c0_i32_0 = arith.constant 0 : i32
    %c0_i32_1 = arith.constant 0 : i32
    return %c0_i32, %c0_i32_0 : i32, i32
  }
  func.func @transform_8(%arg0: i32, %arg1: i32) -> (i32, i32) {
    %c0_i32 = arith.constant 0 : i32
    %c0_i32_0 = arith.constant 0 : i32
    %c0_i32_1 = arith.constant 0 : i32
    return %c0_i32, %c0_i32_0 : i32, i32
  }
  func.func @transform_9(%arg0: i32, %arg1: i32) -> (i32, i32) {
    %c0_i32 = arith.constant 0 : i32
    %c0_i32_0 = arith.constant 0 : i32
    %c0_i32_1 = arith.constant 0 : i32
    return %c0_i32, %c0_i32_0 : i32, i32
  }
  func.func @transform_10(%arg0: i32, %arg1: i32) -> (i32, i32) {
    %c0_i32 = arith.constant 0 : i32
    %c0_i32_0 = arith.constant 0 : i32
    %c0_i32_1 = arith.constant 0 : i32
    return %c0_i32, %c0_i32_0 : i32, i32
  }
  func.func @transform_11(%arg0: i32, %arg1: i32) -> (i32, i32) {
    %c0_i32 = arith.constant 0 : i32
    %c0_i32_0 = arith.constant 0 : i32
    %c0_i32_1 = arith.constant 0 : i32
    return %c0_i32, %c0_i32_0 : i32, i32
  }
  func.func @transform_12(%arg0: i32, %arg1: i32) -> (i32, i32) {
    %c0_i32 = arith.constant 0 : i32
    %c0_i32_0 = arith.constant 0 : i32
    %c0_i32_1 = arith.constant 0 : i32
    return %c0_i32, %c0_i32_0 : i32, i32
  }
  func.func @transform_13(%arg0: i32, %arg1: i32) -> (i32, i32) {
    %c0_i32 = arith.constant 0 : i32
    %c0_i32_0 = arith.constant 0 : i32
    %c0_i32_1 = arith.constant 0 : i32
    return %c0_i32, %c0_i32_0 : i32, i32
  }
  func.func @transform_14(%arg0: i32, %arg1: i32) -> (i32, i32, i32) {
    %c0_i32 = arith.constant 0 : i32
    %c0_i32_0 = arith.constant 0 : i32
    return %arg0, %arg1, %c0_i32 : i32, i32, i32
  }
}

</mosaic_0001>

<bundles_post_ra>
// kernel: tpu_custom_call.1
= control target key start
LH: loop header
LB: loop body
LE: loop exit
PB: predicated region body
PF: predicated region fallthrough
CT: control target
= control target key end

     0   :  { %s8367_s0 = inlined_call_operand.hbm [shape: bf16[2,128,256], index: 0, kind: input, shape index: {}]   ;;  %s8368_s1 = inlined_call_operand.hbm [shape: f32[2,128,256], index: 1, kind: input, shape index: {}]   ;;  %s8369_s2 = inlined_call_operand.hbm [shape: bf16[128,128], index: 2, kind: input, shape index: {}]   ;;  %s8370_s3 = inlined_call_operand.hbm [shape: bf16[128,128], index: 3, kind: input, shape index: {}]   ;;  %s8371_s4 = inlined_call_operand.hbm [shape: bf16[256,256], index: 4, kind: input, shape index: {}]   ;;  %s8372_s5 = inlined_call_operand.hbm [shape: bf16[256,256], index: 5, kind: input, shape index: {}]   ;;  %s8373_s6 = inlined_call_operand.vmem [shape: f32[1,256], index: 6, kind: input, shape index: {}]   ;;  %s8374_s7 = inlined_call_operand.vmem [shape: f32[1,256], index: 7, kind: input, shape index: {}]   ;;  %s8375_s8 = inlined_call_operand.hbm [shape: bf16[256,512], index: 8, kind: input, shape index: {}]   ;;  %s8376_s9 = inlined_call_operand.vmem [shape: f32[1,512], index: 9, kind: input, shape index: {}]   ;;  %s8377_s10 = inlined_call_operand.hbm [shape: bf16[512,256], index: 10, kind: input, shape index: {}]   ;;  %s8378_s11 = inlined_call_operand.vmem [shape: f32[1,256], index: 11, kind: input, shape index: {}]   ;;  %s8379_s12 = inlined_call_operand.vmem [shape: f32[1,256], index: 12, kind: input, shape index: {}]   ;;  %s8380_s13 = inlined_call_operand.vmem [shape: f32[1,256], index: 13, kind: input, shape index: {}]   ;;  %s8381_s14 = inlined_call_operand.hbm [shape: f32[2,128,256], index: 14, kind: output, shape index: {}]  }
   0x1   :  { %8422 = sst [smem:[#allocation55_spill]] %s8367_s0 }
   0x2   :  { %8423 = sst [smem:[#allocation56_spill]] %s8369_s2 }
   0x3   :  { %8424 = sst [smem:[#allocation57_spill]] %s8370_s3 }
   0x4   :  { %8425 = sst [smem:[#allocation58_spill]] %s8371_s4 }
   0x5   :  { %8426 = sst [smem:[#allocation59_spill]] %s8372_s5 }
   0x6   :  { %8427 = sst [smem:[#allocation60_spill]] %s8374_s7 }
   0x7   :  { %8428 = sst [smem:[#allocation61_spill]] %s8375_s8 }
   0x8   :  { %8429 = sst [smem:[#allocation62_spill]] %s8376_s9 }
   0x9   :  { %8430 = sst [smem:[#allocation63_spill]] %s8377_s10 }
   0xa   :  { %8431 = sst [smem:[#allocation64_spill]] %s8378_s11 }
   0xb   :  { %8432 = sst [smem:[#allocation65_spill]] %s8379_s12 }
   0xc   :  { %8433 = sst [smem:[#allocation66_spill]] %s8380_s13 }
   0xd   :  { %8434 = sst [smem:[#allocation67_spill]] %s8381_s14 }
   0xe   :  { %19 = vsyncpa [#allocation3], 0 }
   0xf   :  { %21 = vsyncpa [#allocation3 + $0x1], 0 }
  0x10   :  { %22 = vsyncpa [#allocation6], 0 }
  0x11   :  { %24 = vsyncpa [#allocation6 + $0x1], 0 }
  0x12   :  { %25 = vsyncpa [#allocation9], 0 }
  0x13   :  { %26 = vsyncpa [#allocation12], 0 }
  0x14   :  { %27 = vsyncpa [#allocation15], 0 }
  0x15   :  { %28 = vsyncpa [#allocation4], 0 }
  0x16   :  { %30 = vsyncpa [#allocation4 + $0x1], 0  ;;  %s6117_s29 = smov 0   ;;  %s6119_s30 = smov 0  }
  0x17   :  { %s6121_s15 = smov 0   ;;  %s6123_s16 = smov 0  }
  0x18   :  { %s6125_s17 = smov 0   ;;  %s6127_s18 = smov 0  }
  0x19 LB: > { %8435 = sst [smem:[#allocation24_spill]] %s6014_s16  ;;  %s6148_s19 = sadd.s32 4294967295, %s6022_s18   ;;  %s6022_s18 = sphi %s6127_s18, %s36_s18   ;;  %s6018_s17 = sphi %s6125_s17, %s8542_s17   ;;  %s6014_s16 = sphi %s6123_s16, %s8541_s16   ;;  %s6010_s15 = sphi %s6121_s15, %s8540_s15   ;;  %s6006_s30 = sphi %s6119_s30, %s8539_s30   ;;  %s6002_s29 = sphi %s6117_s29, %s8538_s29  }
  0x1a   : > { %p4683_p0 = scmp.ge.s32.totalorder %s6022_s18, 1  ;;  %p8383_p1 = scmp.eq.s32.totalorder %s6148_s19, 0 }
  0x1b   : > { %p387_p2 = scmp.lt.s32.totalorder %s6022_s18, 3  ;;  %s6024_s21 = smov [#allocation7]  }
  0x1c   : > { %s399_s22 = sshll.u32 %s6024_s21, 4  ;;  %s6025_s24 = smov [#allocation8]   ;;  %s6157_s22 = int_to_ptr.vmem [resolvable:$true] %s399_s22 }
  0x1d   : > { %p6153_p3 = pnand %p4683_p0, %p387_p2  ;;  %s412_s25 = sshll.u32 %s6025_s24, 4  ;;  %s6168_s25 = int_to_ptr.vmem [resolvable:$true] %s412_s25 }
  0x1e   : > { %s8438_s2 = sld [smem:[#allocation56_spill]] }
  0x1f   : > { %s8436_s20 = scalar_select %p6153_p3, 1, 0 }
  0x20   : > { %p5065_p4 = pneg %p6153_p3 }
  0x22   : > { %p6164_p6 = pnand %p5065_p4, %p8383_p1 }
  0x24   : > { %s5692_s28 = scalar_lea.hbm %s8438_s2, 1024  ;;  %p6178_p8 = pneg %p6164_p6 }
  0x25   : > { %p5693_p7 = scmp.ne.s32.totalorder %s8438_s2, %s5692_s28  ;;  %p5699_p11 = scmp.lt.u32.totalorder %s5692_s28, %s8438_s2 }
  0x27   : > { %p5695_p9 = pnand %p6178_p8, %p5693_p7 }
  0x29   : > { %p5696_p10 = pneg %p5695_p9 }
  0x2b   : > { %p5701_p12 = pnand %p5699_p11, %p5696_p10 }
  0x2d   : > { %5704 = shalt.err (!%p5701_p12)
}
  0x2e   : > { %s5705_s14 = scalar_lea.vmem %s6157_s22, 1024  ;;  %p5713_p4 = scmp.lt.s32.totalorder %s6157_s22, %s6157_s22 }
  0x2f   : > { %p5706_p13 = scmp.ne.s32.totalorder %s6157_s22, %s5705_s14  ;;  %p5714_p5 = scmp.lt.s32.totalorder %s5705_s14, %s5705_s14 }
  0x31   : > { %p5708_p0 = pnand %p5706_p13, %p6178_p8  ;;  %p5715_p7 = por %p5714_p5, %p5713_p4 }
  0x33   : > { %p5709_p2 = pneg %p5708_p0 }
  0x35   : > { %p5716_p9 = pnand %p5715_p7, %p5709_p2 }
  0x37   : > { %5719 = shalt.err (!%p5716_p9)
}
  0x38   : > { %s6026_s26 = smov 64   ;;  %s6027_s13 = smov 4  }
  0x39   : > { %5068 = dma.hbm_to_vmem [thread:$0]  (!%p6164_p6), %s8438_s2, 1024, %s6157_s22, [#allocation6], %s6026_s26, %s6026_s26, %s6027_s13  }
  0x3a   : > { %s8440_s3 = sld [smem:[#allocation57_spill]] }
  0x40   : > { %s5720_s12 = scalar_lea.hbm %s8440_s3, 1024 }
  0x41   : > { %p5721_p5 = scmp.ne.s32.totalorder %s8440_s3, %s5720_s12  ;;  %p5727_p12 = scmp.lt.u32.totalorder %s5720_s12, %s8440_s3 }
  0x43   : > { %p5723_p10 = pnand %p5721_p5, %p6178_p8 }
  0x45   : > { %p5724_p11 = pneg %p5723_p10 }
  0x47   : > { %p5729_p13 = pnand %p5727_p12, %p5724_p11 }
  0x49   : > { %5732 = shalt.err (!%p5729_p13)
}
  0x4a   : > { %s5733_s22 = scalar_lea.vmem %s6168_s25, 1024  ;;  %p5741_p7 = scmp.lt.s32.totalorder %s6168_s25, %s6168_s25 }
  0x4b   : > { %p5734_p0 = scmp.ne.s32.totalorder %s6168_s25, %s5733_s22  ;;  %p5742_p9 = scmp.lt.s32.totalorder %s5733_s22, %s5733_s22 }
  0x4d   : > { %p5736_p2 = pnand %p5734_p0, %p6178_p8  ;;  %p5743_p5 = por %p5742_p9, %p5741_p7 }
  0x4f   : > { %p5737_p4 = pneg %p5736_p2 }
  0x51   : > { %p5744_p10 = pnand %p5743_p5, %p5737_p4 }
  0x53   : > { %5747 = shalt.err (!%p5744_p10)
}
  0x54   : > { %5071 = dma.hbm_to_vmem [thread:$0]  (!%p6164_p6), %s8440_s3, 1024, %s6168_s25, [#allocation9], %s6026_s26, %s6026_s26, %s6027_s13  }
  0x55   : > { %s6028_s11 = smov [#allocation11]   ;;  %s6029_s27 = smov [#allocation10]  }
  0x56   : > { %s438_s12 = sshll.u32 %s6028_s11, 4  ;;  %s425_s28 = sshll.u32 %s6029_s27, 4  ;;  %s439_s12 = int_to_ptr.vmem [resolvable:$true] %s438_s12  ;;  %s6222_s28 = int_to_ptr.vmem [resolvable:$true] %s425_s28 }
  0x57   : > { %s8441_s5 = sld [smem:[#allocation59_spill]] }
  0x5d   : > { %s5748_s14 = scalar_lea.hbm %s8441_s5, 4096 }
  0x5e   : > { %p5749_p11 = scmp.ne.s32.totalorder %s8441_s5, %s5748_s14  ;;  %p5755_p0 = scmp.lt.u32.totalorder %s5748_s14, %s8441_s5 }
  0x60   : > { %p5751_p12 = pnand %p5749_p11, %p6178_p8 }
  0x62   : > { %p5752_p13 = pneg %p5751_p12 }
  0x64   : > { %p5757_p2 = pnand %p5755_p0, %p5752_p13 }
  0x66   : > { %5760 = shalt.err (!%p5757_p2)
}
  0x67   : > { %s5761_s26 = scalar_lea.vmem %s439_s12, 4096  ;;  %p5769_p5 = scmp.lt.s32.totalorder %s439_s12, %s439_s12 }
  0x68   : > { %p5762_p4 = scmp.ne.s32.totalorder %s439_s12, %s5761_s26  ;;  %p5770_p10 = scmp.lt.s32.totalorder %s5761_s26, %s5761_s26 }
  0x6a   : > { %p5764_p7 = pnand %p5762_p4, %p6178_p8  ;;  %p5771_p1 = por %p5770_p10, %p5769_p5 }
  0x6c   : > { %p5765_p9 = pneg %p5764_p7 }
  0x6e   : > { %p5772_p3 = pnand %p5771_p1, %p5765_p9 }
  0x70   : > { %5775 = shalt.err (!%p5772_p3)
}
  0x71   : > { %s8385_s2 = smov 128   ;;  %s8387_s13 = smov 8  }
  0x72   : > { %5077 = dma.hbm_to_vmem [thread:$0]  (!%p6164_p6), %s8441_s5, 4096, %s439_s12, [#allocation12], %s8385_s2, %s8385_s2, %s8387_s13  }
  0x73   : > { %s8442_s4 = sld [smem:[#allocation58_spill]] }
  0x79   : > { %s5776_s24 = scalar_lea.hbm %s8442_s4, 4096 }
  0x7a   : > { %p5777_p1 = scmp.ne.s32.totalorder %s8442_s4, %s5776_s24  ;;  %p5783_p12 = scmp.lt.u32.totalorder %s5776_s24, %s8442_s4 }
  0x7c   : > { %p5779_p3 = pnand %p5777_p1, %p6178_p8 }
  0x7e   : > { %p5780_p11 = pneg %p5779_p3 }
  0x80   : > { %p5785_p13 = pnand %p5783_p12, %p5780_p11 }
  0x82   : > { %5788 = shalt.err (!%p5785_p13)
}
  0x83   : > { %s5789_s12 = scalar_lea.vmem %s6222_s28, 4096  ;;  %p5797_p7 = scmp.lt.s32.totalorder %s6222_s28, %s6222_s28 }
  0x84   : > { %p5790_p0 = scmp.ne.s32.totalorder %s6222_s28, %s5789_s12  ;;  %p5798_p9 = scmp.lt.s32.totalorder %s5789_s12, %s5789_s12 }
  0x86   : > { %p5792_p2 = pnand %p5790_p0, %p6178_p8  ;;  %p5799_p5 = por %p5798_p9, %p5797_p7 }
  0x88   : > { %p5793_p4 = pneg %p5792_p2 }
  0x8a   : > { %p5800_p10 = pnand %p5799_p5, %p5793_p4 }
  0x8c   : > { %5803 = shalt.err (!%p5800_p10)
}
  0x8d   : > { %5074 = dma.hbm_to_vmem [thread:$0]  (!%p6164_p6), %s8442_s4, 4096, %s6222_s28, [#allocation9], %s8385_s2, %s8385_s2, %s8387_s13  }
  0x8e   : > { %s6032_s11 = smov [#allocation13]   ;;  %s8443_s8 = sld [smem:[#allocation61_spill]] }
  0x8f   : > { %s457_s27 = sshll.u32 %s6032_s11, 4  ;;  %s458_s27 = int_to_ptr.vmem [resolvable:$true] %s457_s27 }
  0x94   : > { %s5804_s14 = scalar_lea.hbm %s8443_s8, 8192 }
  0x95   : > { %p5805_p1 = scmp.ne.s32.totalorder %s8443_s8, %s5804_s14  ;;  %p5811_p12 = scmp.lt.u32.totalorder %s5804_s14, %s8443_s8 }
  0x97   : > { %p5807_p3 = pnand %p5805_p1, %p6178_p8 }
  0x99   : > { %p5808_p11 = pneg %p5807_p3 }
  0x9b   : > { %p5813_p13 = pnand %p5811_p12, %p5808_p11 }
  0x9d   : > { %5816 = shalt.err (!%p5813_p13)
}
  0x9e   : > { %s5817_s28 = scalar_lea.vmem %s458_s27, 8192  ;;  %p5825_p7 = scmp.lt.s32.totalorder %s458_s27, %s458_s27 }
  0x9f   : > { %p5818_p0 = scmp.ne.s32.totalorder %s458_s27, %s5817_s28  ;;  %p5826_p9 = scmp.lt.s32.totalorder %s5817_s28, %s5817_s28 }
  0xa1   : > { %p5820_p2 = pnand %p5818_p0, %p6178_p8  ;;  %p5827_p5 = por %p5826_p9, %p5825_p7 }
  0xa3   : > { %p5821_p4 = pneg %p5820_p2 }
  0xa5   : > { %p5828_p10 = pnand %p5827_p5, %p5821_p4 }
  0xa7   : > { %5831 = shalt.err (!%p5828_p10)
}
  0xa8   : > { %s8389_s26 = smov 256   ;;  %s8390_s9 = smov 16  }
  0xa9   : > { %5080 = dma.hbm_to_vmem [thread:$0]  (!%p6164_p6), %s8443_s8, 8192, %s458_s27, [#allocation12], %s8389_s26, %s8389_s26, %s8390_s9  }
  0xaa   : > { %s6035_s24 = smov [#allocation14]   ;;  %s8444_s10 = sld [smem:[#allocation63_spill]] }
  0xab   : > { %s473_s14 = sshll.u32 %s6035_s24, 4  ;;  %s474_s14 = int_to_ptr.vmem [resolvable:$true] %s473_s14 }
  0xb0   : > { %s5832_s25 = scalar_lea.hbm %s8444_s10, 8192 }
  0xb1   : > { %p5833_p1 = scmp.ne.s32.totalorder %s8444_s10, %s5832_s25  ;;  %p5839_p12 = scmp.lt.u32.totalorder %s5832_s25, %s8444_s10 }
  0xb3   : > { %p5835_p3 = pnand %p5833_p1, %p6178_p8 }
  0xb5   : > { %p5836_p11 = pneg %p5835_p3 }
  0xb7   : > { %p5841_p13 = pnand %p5839_p12, %p5836_p11 }
  0xb9   : > { %5844 = shalt.err (!%p5841_p13)
}
  0xba   : > { %s5845_s27 = scalar_lea.vmem %s474_s14, 8192  ;;  %p5853_p7 = scmp.lt.s32.totalorder %s474_s14, %s474_s14 }
  0xbb   : > { %p5846_p0 = scmp.ne.s32.totalorder %s474_s14, %s5845_s27  ;;  %p5854_p9 = scmp.lt.s32.totalorder %s5845_s27, %s5845_s27 }
  0xbd   : > { %p5848_p2 = pnand %p5846_p0, %p6178_p8  ;;  %p5855_p5 = por %p5854_p9, %p5853_p7 }
  0xbf   : > { %p5849_p4 = pneg %p5848_p2 }
  0xc1   : > { %p5856_p10 = pnand %p5855_p5, %p5849_p4 }
  0xc3   : > { %5859 = shalt.err (!%p5856_p10)
}
  0xc4   : > { %s8445_s11 = smov 8   ;;  %s8446_s21 = smov 128  }
  0xc5   : > { %5083 = dma.hbm_to_vmem [thread:$0]  (!%p6164_p6), %s8444_s10, 8192, %s474_s14, [#allocation15], %s8446_s21, %s8446_s21, %s8445_s11  }
  0xc6   : > { %s4682_s16 = sadd.s32 4294967294, %s6022_s18   ;;  %s48_s23 = sadd.s32 1, %s6018_s17 }
  0xc7   : > { %p50_p8 = scmp.ge.s32.totalorder %s48_s23, 2  ;;  %s55_s24 = sadd.s32 1, %s6010_s15 }
  0xc8   : > { %p62_p1 = scmp.ne.s32.totalorder %s6010_s15, %s6006_s30  ;;  %p63_p3 = scmp.eq.s32.totalorder %s6022_s18, 0 }
  0xc9   : > { %s8544_s23 = smov (%p50_p8, %s48_s23), 0  ;;  %p68_p12 = scmp.ne.s32.totalorder %s6006_s30, %s6002_s29 }
  0xca   : > { %p6321_p11 = por %p63_p3, %p62_p1  ;;  %s52_s14 = ssub.s32 %s6018_s17, %s8544_s23 }
  0xcb   : > { %p374_p6 = scmp.eq.s32.totalorder %s6148_s19, 1  ;;  %p53_p13 = scmp.eq.s32.totalorder %s52_s14, 0 }
  0xcc   : > { %p8448_p0 = scmp.eq.s32.totalorder %s6148_s19, 0  ;;  %p380_p7 = scmp.eq.s32.totalorder %s4682_s16, 1 }
  0xcd   : > { %p6336_p4 = por %p374_p6, %p62_p1  ;;  %p5101_p5 = scmp.lt.s32.totalorder %s6022_s18, 2 }
  0xce   : > { %p6332_p2 = por %p8448_p0, %p68_p12  ;;  %p6343_p9 = por %p380_p7, %p68_p12 }
  0xcf   : > { %s8450_s25 = scalar_select %p6336_p4, 1, 0 }
  0xd0   : > { %s6341_s12 = scalar_select %p53_p13, %s6010_s15, %s55_s24  }
  0xd1   : > { %s8451_s28 = scalar_select %p6343_p9, 1, 0 }
  0xd2   : > { %s6349_s27 = sand.u32 1, %s6010_s15   ;;  %s4936_s2 = sshll.u32 %s6018_s17, 11 }
  0xd3   : > { %s4691_s13 = sshll.u32 %s6349_s27, 7  ;;  %s8452_s0 = sld [smem:[#allocation55_spill]] }
  0xd4   : > { %s500_s16 = scalar_lea.vmem [#allocation2], %s4691_s13  ;;  %p6360_p10 = pnand %p5101_p5, %p6321_p11 }
  0xd5   : > { %s507_s24 = sshll.u32 %s500_s16, 4  ;;  %s497_s5 = scalar_lea.sflag [#allocation3], %s6349_s27  ;;  %s6364_s24 = int_to_ptr.vmem [resolvable:$true] %s507_s24 }
  0xd6   : > { %p5862_p1 = pneg %p6360_p10 }
  0xd9   : > { %s6356_s9 = scalar_lea.hbm %s8452_s0, %s4936_s2  ;;  %s5865_s13 = scalar_lea.hbm %s8452_s0, 4096 }
  0xda   : > { %s5860_s26 = scalar_lea.hbm %s6356_s9, 2048  ;;  %p5866_p11 = scmp.lt.u32.totalorder %s6356_s9, %s8452_s0 }
  0xdb   : > { %p5861_p8 = scmp.ne.s32.totalorder %s6356_s9, %s5860_s26  ;;  %p5867_p6 = scmp.lt.u32.totalorder %s5865_s13, %s5860_s26 }
  0xdc   : > { %p5869_p0 = scmp.lt.u32.totalorder %s5860_s26, %s6356_s9 }
  0xdd   : > { %p5863_p3 = pnand %p5862_p1, %p5861_p8  ;;  %p5868_p13 = por %p5867_p6, %p5866_p11 }
  0xdf   : > { %p5864_p12 = pneg %p5863_p3  ;;  %p5870_p7 = por %p5869_p0, %p5868_p13 }
  0xe1   : > { %p5871_p5 = pnand %p5870_p7, %p5864_p12 }
  0xe3   : > { %5874 = shalt.err (!%p5871_p5)
}
  0xe4   : > { %s5875_s4 = scalar_lea.vmem %s6364_s24, 2048  ;;  %s6036_s2 = smov [#allocation2]  }
  0xe5   : > { %p5876_p8 = scmp.ne.s32.totalorder %s6364_s24, %s5875_s4  ;;  %s5880_s22 = sshll.u32 %s6036_s2, 4  ;;  %s5881_s22 = int_to_ptr.vmem [resolvable:$false] %s5880_s22 }
  0xe6   : > { %s5882_s14 = scalar_lea.vmem %s5881_s22, 4096  ;;  %p5883_p4 = scmp.lt.s32.totalorder %s6364_s24, %s5881_s22 }
  0xe7   : > { %p5878_p3 = pnand %p5876_p8, %p5862_p1  ;;  %p5884_p11 = scmp.lt.s32.totalorder %s5882_s14, %s5875_s4 }
  0xe9   : > { %p5879_p9 = pneg %p5878_p3  ;;  %p5885_p6 = por %p5884_p11, %p5883_p4 }
  0xeb   : > { %p5886_p13 = pnand %p5885_p6, %p5879_p9 }
  0xed   : > { %5889 = shalt.err (!%p5886_p13)
}
  0xee   : > { %5087 = dma.hbm_to_vmem [thread:$0]  (!%p6360_p10), %s6356_s9, 2048, %s6364_s24, %s497_s5, %s8446_s21, %s8446_s21, %s8445_s11  }
  0xef   : > { %s4694_s26 = sshll.u32 %s6349_s27, 8  ;;  %s4937_s13 = sshll.u32 %s6018_s17, 12 }
  0xf0   : > { %s6403_s2 = scalar_lea.hbm %s8368_s1, %s4937_s13  ;;  %s521_s22 = scalar_lea.vmem [#allocation5], %s4694_s26 }
  0xf1   : > { %s531_s14 = sshll.u32 %s521_s22, 4  ;;  %s8454_s0 = sand.u32 1, %s6022_s18   ;;  %s6405_s14 = int_to_ptr.vmem [resolvable:$true] %s531_s14 }
  0xf2   : > { %s6409_s8 = scalar_lea.sflag [#allocation6], %s8454_s0  ;;  %s5890_s10 = scalar_lea.hbm %s6403_s2, 4096 }
  0xf3   : > { %p5891_p4 = scmp.ne.s32.totalorder %s6403_s2, %s5890_s10  ;;  %s5895_s11 = scalar_lea.hbm %s8368_s1, 8192 }
  0xf4   : > { %p5896_p0 = scmp.lt.u32.totalorder %s6403_s2, %s8368_s1  ;;  %p5897_p7 = scmp.lt.u32.totalorder %s5895_s11, %s5890_s10 }
  0xf5   : > { %p5893_p9 = pnand %p5891_p4, %p5862_p1  ;;  %p5899_p8 = scmp.lt.u32.totalorder %s5890_s10, %s6403_s2 }
  0xf6   : > { %p5898_p5 = por %p5897_p7, %p5896_p0 }
  0xf7   : > { %p5894_p12 = pneg %p5893_p9 }
  0xf8   : > { %p5900_p3 = por %p5899_p8, %p5898_p5 }
  0xfa   : > { %p5901_p11 = pnand %p5900_p3, %p5894_p12 }
  0xfc   : > { %5904 = shalt.err (!%p5901_p11)
}
  0xfd   : > { %s5905_s0 = scalar_lea.vmem %s6405_s14, 4096  ;;  %s6037_s24 = smov [#allocation5]  }
  0xfe   : > { %p5906_p6 = scmp.ne.s32.totalorder %s6405_s14, %s5905_s0  ;;  %s5910_s26 = sshll.u32 %s6037_s24, 4  ;;  %s5911_s26 = int_to_ptr.vmem [resolvable:$false] %s5910_s26 }
  0xff   : > { %s5912_s13 = scalar_lea.vmem %s5911_s26, 8192  ;;  %p5913_p9 = scmp.lt.s32.totalorder %s6405_s14, %s5911_s26 }
 0x100   : > { %p5908_p13 = pnand %p5906_p6, %p5862_p1  ;;  %p5914_p0 = scmp.lt.s32.totalorder %s5912_s13, %s5905_s0 }
 0x102   : > { %p5909_p4 = pneg %p5908_p13  ;;  %p5915_p7 = por %p5914_p0, %p5913_p9 }
 0x104   : > { %p5916_p5 = pnand %p5915_p7, %p5909_p4 }
 0x106   : > { %5919 = shalt.err (!%p5916_p5)
}
 0x107   : > { %s8455_s10 = smov 16   ;;  %s8456_s4 = smov 256  }
 0x108   : > { %5090 = dma.hbm_to_vmem [thread:$0]  (!%p6360_p10), %s6403_s2, 4096, %s6405_s14, %s6409_s8, %s8456_s4, %s8456_s4, %s8455_s10  }
 0x109   : > { %p8457_p1 = scmp.ne.s32.totalorder %s8436_s20, 0 }
 0x10b   : > { %543 = sbr.rel (%p8457_p1) target bundleno = 1750 (0x6d6), region = 76 }
 0x112   : > { %s6441_s16 = sand.u32 1, %s6006_s30  }
 0x113   : > { %s4698_s22 = sshll.u32 %s6441_s16, 7  ;;  %s546_s5 = scalar_lea.sflag [#allocation3], %s6441_s16 }
 0x114   : > { %s6445_s9 = scalar_lea.vmem [#allocation2], %s4698_s22 }
 0x115   : > { %5973 = dma.done.wait (%p6332_p2), %s546_s5, 2048  }
 0x116   : > { %5975 = vsyncadd (%p6332_p2), %s546_s5, 4294965248  ;;  %s554_s3 = sand.u32 1, %s6148_s19   ;;  %s4699_s8 = sshll.u32 %s6441_s16, 8 }
 0x117   : > { %s555_s20 = scalar_lea.sflag [#allocation6], %s554_s3  ;;  %s6455_s2 = scalar_lea.vmem [#allocation5], %s4699_s8 }
 0x118   : > { %5977 = dma.done.wait (%p6332_p2), %s555_s20, 4096  }
 0x119   : > { %5979 = vsyncadd (%p6332_p2), %s555_s20, 4294963200  ;;  %p8458_p10 = scmp.eq.s32.totalorder %s6148_s19, 0 }
 0x11b   : > { %5981 = dma.done.wait (%p8458_p10), [#allocation6], 1024   ;;  %p8459_p12 = pmov %p8458_p10 }
 0x11c   : > { %p8460_p8 = pmov %p8458_p10 }
 0x11d   : > { %5983 = vsyncadd (%p8459_p12), [#allocation6], 4294966272 }
 0x11e   : > { %5985 = dma.done.wait (%p8460_p8), [#allocation9], 5120   ;;  %p8461_p3 = pmov %p8460_p8 }
 0x120   : > { %5987 = vsyncadd (%p8461_p3), [#allocation9], 4294962176  ;;  %p8462_p11 = pmov %p8461_p3 }
 0x121   : > { %p8463_p6 = pmov %p8461_p3 }
 0x122   : > { %5989 = dma.done.wait (%p8462_p11), [#allocation12], 12288  }
 0x123   : > { %5991 = vsyncadd (%p8463_p6), [#allocation12], 4294955008  ;;  %p8464_p2 = pmov %p8461_p3 }
 0x125   : > { %5993 = dma.done.wait (%p8464_p2), [#allocation15], 8192   ;;  %p8465_p13 = pmov %p8464_p2 }
 0x126   : > { %v6038_v0 = vmov 0   ;;  %v5172_v1 = vld [vmem:[%s6445_s9 + $0x4] ss:$8 sps:$4 sm:$0xff]   ;;  %v5174_v2 = vld [vmem:[%s6445_s9] ss:$8 sps:$4 sm:$0xff]   ;;  %v5200_v39 = vld [vmem:[#allocation7 + $0x10] sm:$0xff]  }
 0x127   : > { %5995 = vsyncadd (%p8465_p13), [#allocation15], 4294959104  ;;  %850 = vmatprep.mubr.bf16.mxu0 %v6038_v0  ;;  %1011 = vmatprep.mubr.bf16.mxu1 %v6038_v0  ;;  %v5175_v3 = vld [vmem:[%s6445_s9 + $0x14] ss:$8 sps:$4 sm:$0xff]   ;;  %v5177_v4 = vld [vmem:[%s6445_s9 + $0x10] ss:$8 sps:$4 sm:$0xff]  }
 0x128   : > { %818 = vmatprep.subr.bf16.mxu0 %v5172_v1  ;;  %979 = vmatprep.subr.bf16.mxu1 %v5172_v1  ;;  %v5178_v5 = vld [vmem:[%s6445_s9 + $0x24] ss:$8 sps:$4 sm:$0xff]   ;;  %v5180_v6 = vld [vmem:[%s6445_s9 + $0x20] ss:$8 sps:$4 sm:$0xff]   ;;  %v5181_v7 = vld [vmem:[%s6445_s9 + $0x34] ss:$8 sps:$4 sm:$0xff]  }
 0x129   : > { %819 = vmatpush1.bf16.msra.mxu0 %v5174_v2  ;;  %980 = vmatpush1.bf16.msra.mxu1 %v5174_v2  ;;  %v5183_v8 = vld [vmem:[%s6445_s9 + $0x30] ss:$8 sps:$4 sm:$0xff]   ;;  %v5184_v9 = vld [vmem:[%s6445_s9 + $0x44] ss:$8 sps:$4 sm:$0xff]   ;;  %v5186_v10 = vld [vmem:[%s6445_s9 + $0x40] ss:$8 sps:$4 sm:$0xff]  }
 0x12a   : > { %820 = vmatprep.subr.bf16.mxu0 %v5175_v3  ;;  %981 = vmatprep.subr.bf16.mxu1 %v5175_v3  ;;  %v5187_v11 = vld [vmem:[%s6445_s9 + $0x54] ss:$8 sps:$4 sm:$0xff]   ;;  %v5189_v12 = vld [vmem:[%s6445_s9 + $0x50] ss:$8 sps:$4 sm:$0xff]   ;;  %v5190_v13 = vld [vmem:[%s6445_s9 + $0x64] ss:$8 sps:$4 sm:$0xff]  }
 0x12b   : > { %v5192_v14 = vld [vmem:[%s6445_s9 + $0x60] ss:$8 sps:$4 sm:$0xff]   ;;  %v5193_v15 = vld [vmem:[%s6445_s9 + $0x74] ss:$8 sps:$4 sm:$0xff]   ;;  %v5195_v16 = vld [vmem:[%s6445_s9 + $0x70] ss:$8 sps:$4 sm:$0xff]  }
 0x12c   : > { %v5214_v17 = vld [vmem:[#allocation11 + $0x4] ss:$8 sps:$4 sm:$0xff]   ;;  %v5212_v21 = vld [vmem:[#allocation11] ss:$8 sps:$4 sm:$0xff]   ;;  %v5220_v23 = vld [vmem:[#allocation11 + $0x14] ss:$8 sps:$4 sm:$0xff]  }
 0x12d   : > { %821 = vmatpush1.bf16.msra.mxu0 %v5177_v4  ;;  %982 = vmatpush1.bf16.msra.mxu1 %v5177_v4  ;;  %v5217_v18 = vld [vmem:[#allocation10 + $0x4] ss:$8 sps:$4 sm:$0xff]   ;;  %v5215_v22 = vld [vmem:[#allocation10] ss:$8 sps:$4 sm:$0xff]   ;;  %v5223_v24 = vld [vmem:[#allocation10 + $0x14] ss:$8 sps:$4 sm:$0xff]  }
 0x12e   : > { %822 = vmatprep.subr.bf16.mxu0 %v5178_v5  ;;  %983 = vmatprep.subr.bf16.mxu1 %v5178_v5  ;;  %v5196_v19 = vld [vmem:[#allocation7] sm:$0xff]   ;;  %v5218_v25 = vld [vmem:[#allocation11 + $0x10] ss:$8 sps:$4 sm:$0xff]   ;;  %v5198_v29 = vld [vmem:[#allocation7 + $0x8] sm:$0xff]   ;;  %s8466_s21 = sld [smem:[#allocation60_spill]]  ;;  %s8497_s24 = sld [smem:[#allocation62_spill]] }
 0x12f   : > { %v5197_v20 = vld [vmem:[#allocation8] sm:$0xff]   ;;  %v5221_v26 = vld [vmem:[#allocation10 + $0x10] ss:$8 sps:$4 sm:$0xff]   ;;  %v5199_v30 = vld [vmem:[#allocation8 + $0x8] sm:$0xff]   ;;  %s8500_s10 = sld [smem:[#allocation64_spill]]  ;;  %s8531_s5 = sld [smem:[#allocation65_spill]] }
 0x130   : > { %v5226_v27 = vld [vmem:[#allocation11 + $0x24] ss:$8 sps:$4 sm:$0xff]   ;;  %v5224_v31 = vld [vmem:[#allocation11 + $0x20] ss:$8 sps:$4 sm:$0xff]   ;;  %v5232_v33 = vld [vmem:[#allocation11 + $0x34] ss:$8 sps:$4 sm:$0xff]  }
 0x131   : > { %823 = vmatpush1.bf16.msra.mxu0 %v5180_v6  ;;  %984 = vmatpush1.bf16.msra.mxu1 %v5180_v6  ;;  %v5229_v28 = vld [vmem:[#allocation10 + $0x24] ss:$8 sps:$4 sm:$0xff]   ;;  %v5227_v32 = vld [vmem:[#allocation10 + $0x20] ss:$8 sps:$4 sm:$0xff]   ;;  %v5235_v34 = vld [vmem:[#allocation10 + $0x34] ss:$8 sps:$4 sm:$0xff]  }
 0x132   : > { %824 = vmatprep.subr.bf16.mxu0 %v5181_v7  ;;  %985 = vmatprep.subr.bf16.mxu1 %v5181_v7  ;;  %v5230_v35 = vld [vmem:[#allocation11 + $0x30] ss:$8 sps:$4 sm:$0xff]   ;;  %v5238_v37 = vld [vmem:[#allocation11 + $0x44] ss:$8 sps:$4 sm:$0xff]   ;;  %v5236_v41 = vld [vmem:[#allocation11 + $0x40] ss:$8 sps:$4 sm:$0xff]  }
 0x133   : > { %v5233_v36 = vld [vmem:[#allocation10 + $0x30] ss:$8 sps:$4 sm:$0xff]   ;;  %v5241_v38 = vld [vmem:[#allocation10 + $0x44] ss:$8 sps:$4 sm:$0xff]   ;;  %v5239_v42 = vld [vmem:[#allocation10 + $0x40] ss:$8 sps:$4 sm:$0xff]  }
 0x134   : > { %v5201_v40 = vld [vmem:[#allocation8 + $0x10] sm:$0xff]   ;;  %v5250_v47 = vld [vmem:[#allocation11 + $0x64] ss:$8 sps:$4 sm:$0xff]   ;;  %v5202_v49 = vld [vmem:[#allocation7 + $0x18] sm:$0xff]   ;;  %s8532_s20 = sld [smem:[#allocation66_spill]]  ;;  %s4494_s0 = scalar_lea.sflag [#allocation4], %s6441_s16 }
 0x135   : > { %825 = vmatpush1.bf16.msra.mxu0 %v5183_v8  ;;  %986 = vmatpush1.bf16.msra.mxu1 %v5183_v8  ;;  %v5244_v43 = vld [vmem:[#allocation11 + $0x54] ss:$8 sps:$4 sm:$0xff]   ;;  %v5242_v45 = vld [vmem:[#allocation11 + $0x50] ss:$8 sps:$4 sm:$0xff]   ;;  %v5253_v48 = vld [vmem:[#allocation10 + $0x64] ss:$8 sps:$4 sm:$0xff]  }
 0x136   : > { %826 = vmatprep.subr.bf16.mxu0 %v5184_v9  ;;  %987 = vmatprep.subr.bf16.mxu1 %v5184_v9  ;;  %v5247_v44 = vld [vmem:[#allocation10 + $0x54] ss:$8 sps:$4 sm:$0xff]   ;;  %v5245_v46 = vld [vmem:[#allocation10 + $0x50] ss:$8 sps:$4 sm:$0xff]   ;;  %v5248_v51 = vld [vmem:[#allocation11 + $0x60] ss:$8 sps:$4 sm:$0xff]  }
 0x137   : > { %v5203_v50 = vld [vmem:[#allocation8 + $0x18] sm:$0xff]   ;;  %v5251_v52 = vld [vmem:[#allocation10 + $0x60] ss:$8 sps:$4 sm:$0xff]   ;;  %v5262_v57 = vld [vmem:[#allocation11 + $0x84] ss:$8 sps:$4 sm:$0xff]   ;;  %p8535_p9 = scmp.ne.s32.totalorder %s8450_s25, 0 }
 0x138   : > { %v5256_v53 = vld [vmem:[#allocation11 + $0x74] ss:$8 sps:$4 sm:$0xff]   ;;  %v5254_v55 = vld [vmem:[#allocation11 + $0x70] ss:$8 sps:$4 sm:$0xff]   ;;  %v5265_v58 = vld [vmem:[#allocation10 + $0x84] ss:$8 sps:$4 sm:$0xff]  }
 0x139   : > { %827 = vmatpush1.bf16.msra.mxu0 %v5186_v10  ;;  %988 = vmatpush1.bf16.msra.mxu1 %v5186_v10  ;;  %v5259_v54 = vld [vmem:[#allocation10 + $0x74] ss:$8 sps:$4 sm:$0xff]   ;;  %v5257_v56 = vld [vmem:[#allocation10 + $0x70] ss:$8 sps:$4 sm:$0xff]   ;;  %v5204_v59 = vld [vmem:[#allocation7 + $0x20] sm:$0xff]   ;;  %s6039_s26 = smov [#allocation16]  }
 0x13a   : > { %828 = vmatprep.subr.bf16.mxu0 %v5187_v11  ;;  %989 = vmatprep.subr.bf16.mxu1 %v5187_v11  ;;  %v5205_v60 = vld [vmem:[#allocation8 + $0x20] sm:$0xff]   ;;  %v5268_v63 = vld [vmem:[#allocation11 + $0x94] ss:$8 sps:$4 sm:$0xff]   ;;  %v5266_v2 = vld [vmem:[#allocation11 + $0x90] ss:$8 sps:$4 sm:$0xff]   ;;  %s5924_s13 = sshll.u32 %s6039_s26, 4  ;;  %s5925_s13 = int_to_ptr.vmem [resolvable:$false] %s5924_s13 }
 0x13b   : > { %v5260_v61 = vld [vmem:[#allocation11 + $0x80] ss:$8 sps:$4 sm:$0xff]   ;;  %v5271_v1 = vld [vmem:[#allocation10 + $0x94] ss:$8 sps:$4 sm:$0xff]   ;;  %v5269_v3 = vld [vmem:[#allocation10 + $0x90] ss:$8 sps:$4 sm:$0xff]  }
 0x13c   : > { %v5263_v62 = vld [vmem:[#allocation10 + $0x80] ss:$8 sps:$4 sm:$0xff]   ;;  %v5274_v4 = vld [vmem:[#allocation11 + $0xa4] ss:$8 sps:$4 sm:$0xff]   ;;  %v5280_v10 = vld [vmem:[#allocation11 + $0xb4] ss:$8 sps:$4 sm:$0xff]  }
 0x13d   : > { %829 = vmatpush1.bf16.msra.mxu0 %v5189_v12  ;;  %990 = vmatpush1.bf16.msra.mxu1 %v5189_v12  ;;  %v5277_v5 = vld [vmem:[#allocation10 + $0xa4] ss:$8 sps:$4 sm:$0xff]   ;;  %v5272_v8 = vld [vmem:[#allocation11 + $0xa0] ss:$8 sps:$4 sm:$0xff]   ;;  %v5283_v11 = vld [vmem:[#allocation10 + $0xb4] ss:$8 sps:$4 sm:$0xff]  }
 0x13e   : > { %830 = vmatprep.subr.bf16.mxu0 %v5190_v13  ;;  %991 = vmatprep.subr.bf16.mxu1 %v5190_v13  ;;  %v5206_v6 = vld [vmem:[#allocation7 + $0x28] sm:$0xff]   ;;  %v5278_v12 = vld [vmem:[#allocation11 + $0xb0] ss:$8 sps:$4 sm:$0xff]  }
 0x13f   : > { %v5207_v7 = vld [vmem:[#allocation8 + $0x28] sm:$0xff]   ;;  %v5281_v13 = vld [vmem:[#allocation10 + $0xb0] ss:$8 sps:$4 sm:$0xff]  }
 0x140   : > { %v5275_v9 = vld [vmem:[#allocation10 + $0xa0] ss:$8 sps:$4 sm:$0xff]  }
 0x141   : > { %831 = vmatpush1.bf16.msra.mxu0 %v5192_v14  ;;  %992 = vmatpush1.bf16.msra.mxu1 %v5192_v14  ;;  %v5286_v14 = vld [vmem:[#allocation11 + $0xc4] ss:$8 sps:$4 sm:$0xff]  }
 0x142   : > { %832 = vmatprep.subr.bf16.mxu0 %v5193_v15  ;;  %993 = vmatprep.subr.bf16.mxu1 %v5193_v15  ;;  %v5289_v15 = vld [vmem:[#allocation10 + $0xc4] ss:$8 sps:$4 sm:$0xff]  }
 0x145   : > { %833 = vmatpush1.bf16.msra.mxu0 %v5195_v16  ;;  %994 = vmatpush1.bf16.msra.mxu1 %v5195_v16  ;;  %v5208_v16 = vld [vmem:[#allocation7 + $0x30] sm:$0xff]  }
 0x146   : > { %1348 = vmatprep.subr.bf16.mxu1 %v5214_v17  ;;  %1621 = vmatprep.subr.bf16.mxu0 %v5217_v18  ;;  %v5209_v17 = vld [vmem:[#allocation8 + $0x30] sm:$0xff]   ;;  %v5284_v18 = vld [vmem:[#allocation11 + $0xc0] ss:$8 sps:$4 sm:$0xff]  }
 0x148   : > { %851 = vmatmul.mubr.bf16.vlgmr.msra.gmra.mrb[0].mxu0 %v5196_v19  ;;  %1012 = vmatmul.mubr.bf16.vlgmr.msra.gmra.mrb[0].mxu1 %v5197_v20  ;;  %v5287_v19 = vld [vmem:[#allocation10 + $0xc0] ss:$8 sps:$4 sm:$0xff]   ;;  %v5292_v20 = vld [vmem:[#allocation11 + $0xd4] ss:$8 sps:$4 sm:$0xff]  }
 0x149   : > { %860 = vmatprep.mubr.bf16.mxu0 %v6038_v0  ;;  %1021 = vmatprep.mubr.bf16.mxu1 %v6038_v0 }
 0x14a   : > { %1349 = vmatpush1.bf16.msra.mxu1 %v5212_v21  ;;  %1622 = vmatpush1.bf16.msra.mxu0 %v5215_v22  ;;  %v5295_v21 = vld [vmem:[#allocation10 + $0xd4] ss:$8 sps:$4 sm:$0xff]   ;;  %v5290_v22 = vld [vmem:[#allocation11 + $0xd0] ss:$8 sps:$4 sm:$0xff]  }
 0x14b   : > { %1350 = vmatprep.subr.bf16.mxu1 %v5220_v23  ;;  %1623 = vmatprep.subr.bf16.mxu0 %v5223_v24  ;;  %v5293_v23 = vld [vmem:[#allocation10 + $0xd0] ss:$8 sps:$4 sm:$0xff]   ;;  %v5298_v24 = vld [vmem:[#allocation11 + $0xe4] ss:$8 sps:$4 sm:$0xff]  }
 0x14e   : > { %1351 = vmatpush1.bf16.msra.mxu1 %v5218_v25  ;;  %1624 = vmatpush1.bf16.msra.mxu0 %v5221_v26  ;;  %v5301_v25 = vld [vmem:[#allocation10 + $0xe4] ss:$8 sps:$4 sm:$0xff]   ;;  %v5210_v26 = vld [vmem:[#allocation7 + $0x38] sm:$0xff]  }
 0x14f   : > { %1352 = vmatprep.subr.bf16.mxu1 %v5226_v27  ;;  %1625 = vmatprep.subr.bf16.mxu0 %v5229_v28  ;;  %v5211_v27 = vld [vmem:[#allocation8 + $0x38] sm:$0xff]   ;;  %v5296_v28 = vld [vmem:[#allocation11 + $0xe0] ss:$8 sps:$4 sm:$0xff]  }
 0x150   : > { %861 = vmatmul.mubr.bf16.gmra.mrb[4].mxu0 %v5198_v29  ;;  %1022 = vmatmul.mubr.bf16.gmra.mrb[4].mxu1 %v5199_v30  ;;  %v5299_v29 = vld [vmem:[#allocation10 + $0xe0] ss:$8 sps:$4 sm:$0xff]   ;;  %v5304_v30 = vld [vmem:[#allocation11 + $0xf4] ss:$8 sps:$4 sm:$0xff]  }
 0x151   : > { %870 = vmatprep.mubr.bf16.mxu0 %v6038_v0  ;;  %1031 = vmatprep.mubr.bf16.mxu1 %v6038_v0 }
 0x152   : > { %1353 = vmatpush1.bf16.msra.mxu1 %v5224_v31  ;;  %1626 = vmatpush1.bf16.msra.mxu0 %v5227_v32  ;;  %v5302_v31 = vld [vmem:[#allocation11 + $0xf0] ss:$8 sps:$4 sm:$0xff]  }
 0x153   : > { %1354 = vmatprep.subr.bf16.mxu1 %v5232_v33  ;;  %1627 = vmatprep.subr.bf16.mxu0 %v5235_v34  ;;  %v5305_v32 = vld [vmem:[#allocation10 + $0xf0] ss:$8 sps:$4 sm:$0xff]  }
 0x156   : > { %1355 = vmatpush1.bf16.msra.mxu1 %v5230_v35  ;;  %1628 = vmatpush1.bf16.msra.mxu0 %v5233_v36 }
 0x157   : > { %1356 = vmatprep.subr.bf16.mxu1 %v5238_v37  ;;  %1629 = vmatprep.subr.bf16.mxu0 %v5241_v38 }
 0x158   : > { %871 = vmatmul.mubr.bf16.gmra.mrb[8].mxu0 %v5200_v39  ;;  %1032 = vmatmul.mubr.bf16.gmra.mrb[8].mxu1 %v5201_v40 }
 0x159   : > { %880 = vmatprep.mubr.bf16.mxu0 %v6038_v0  ;;  %1041 = vmatprep.mubr.bf16.mxu1 %v6038_v0 }
 0x15a   : > { %1357 = vmatpush1.bf16.msra.mxu1 %v5236_v41  ;;  %1630 = vmatpush1.bf16.msra.mxu0 %v5239_v42 }
 0x15b   : > { %1358 = vmatprep.subr.bf16.mxu1 %v5244_v43  ;;  %1631 = vmatprep.subr.bf16.mxu0 %v5247_v44 }
 0x15e   : > { %1359 = vmatpush1.bf16.msra.mxu1 %v5242_v45  ;;  %1632 = vmatpush1.bf16.msra.mxu0 %v5245_v46 }
 0x15f   : > { %1360 = vmatprep.subr.bf16.mxu1 %v5250_v47  ;;  %1633 = vmatprep.subr.bf16.mxu0 %v5253_v48 }
 0x160   : > { %881 = vmatmul.mubr.bf16.gmra.mrb[12].mxu0 %v5202_v49  ;;  %1042 = vmatmul.mubr.bf16.gmra.mrb[12].mxu1 %v5203_v50 }
 0x161   : > { %890 = vmatprep.mubr.bf16.mxu0 %v6038_v0  ;;  %1051 = vmatprep.mubr.bf16.mxu1 %v6038_v0 }
 0x162   : > { %1361 = vmatpush1.bf16.msra.mxu1 %v5248_v51  ;;  %1634 = vmatpush1.bf16.msra.mxu0 %v5251_v52 }
 0x163   : > { %1362 = vmatprep.subr.bf16.mxu1 %v5256_v53  ;;  %1635 = vmatprep.subr.bf16.mxu0 %v5259_v54 }
 0x166   : > { %1363 = vmatpush1.bf16.msra.mxu1 %v5254_v55  ;;  %1636 = vmatpush1.bf16.msra.mxu0 %v5257_v56 }
 0x167   : > { %1364 = vmatprep.subr.bf16.mxu1 %v5262_v57  ;;  %1637 = vmatprep.subr.bf16.mxu0 %v5265_v58 }
 0x168   : > { %891 = vmatmul.mubr.bf16.gmra.mrb[16].mxu0 %v5204_v59  ;;  %1052 = vmatmul.mubr.bf16.gmra.mrb[16].mxu1 %v5205_v60 }
 0x169   : > { %900 = vmatprep.mubr.bf16.mxu0 %v6038_v0  ;;  %1061 = vmatprep.mubr.bf16.mxu1 %v6038_v0 }
 0x16a   : > { %1365 = vmatpush1.bf16.msra.mxu1 %v5260_v61  ;;  %1638 = vmatpush1.bf16.msra.mxu0 %v5263_v62 }
 0x16b   : > { %1366 = vmatprep.subr.bf16.mxu1 %v5268_v63  ;;  %1639 = vmatprep.subr.bf16.mxu0 %v5271_v1 }
 0x16e   : > { %1367 = vmatpush1.bf16.msra.mxu1 %v5266_v2  ;;  %1640 = vmatpush1.bf16.msra.mxu0 %v5269_v3 }
 0x16f   : > { %1368 = vmatprep.subr.bf16.mxu1 %v5274_v4  ;;  %1641 = vmatprep.subr.bf16.mxu0 %v5277_v5 }
 0x170   : > { %901 = vmatmul.mubr.bf16.gmra.mrb[20].mxu0 %v5206_v6  ;;  %1062 = vmatmul.mubr.bf16.gmra.mrb[20].mxu1 %v5207_v7 }
 0x171   : > { %910 = vmatprep.mubr.bf16.mxu0 %v6038_v0  ;;  %1071 = vmatprep.mubr.bf16.mxu1 %v6038_v0 }
 0x172   : > { %1369 = vmatpush1.bf16.msra.mxu1 %v5272_v8  ;;  %1642 = vmatpush1.bf16.msra.mxu0 %v5275_v9 }
 0x173   : > { %1370 = vmatprep.subr.bf16.mxu1 %v5280_v10  ;;  %1643 = vmatprep.subr.bf16.mxu0 %v5283_v11 }
 0x176   : > { %1371 = vmatpush1.bf16.msra.mxu1 %v5278_v12  ;;  %1644 = vmatpush1.bf16.msra.mxu0 %v5281_v13 }
 0x177   : > { %1372 = vmatprep.subr.bf16.mxu1 %v5286_v14  ;;  %1645 = vmatprep.subr.bf16.mxu0 %v5289_v15 }
 0x178   : > { %911 = vmatmul.mubr.bf16.gmra.mrb[24].mxu0 %v5208_v16  ;;  %1072 = vmatmul.mubr.bf16.gmra.mrb[24].mxu1 %v5209_v17 }
 0x179   : > { %920 = vmatprep.mubr.bf16.mxu0 %v6038_v0  ;;  %1081 = vmatprep.mubr.bf16.mxu1 %v6038_v0  ;;  %v5307_v0 = vld [vmem:[#allocation10 + $0xf4] ss:$8 sps:$4 sm:$0xff]  }
 0x17a   : > { %1373 = vmatpush1.bf16.msra.mxu1 %v5284_v18  ;;  %1646 = vmatpush1.bf16.msra.mxu0 %v5287_v19 }
 0x17b   : > { %1374 = vmatprep.subr.bf16.mxu1 %v5292_v20  ;;  %1647 = vmatprep.subr.bf16.mxu0 %v5295_v21 }
 0x17e   : > { %1375 = vmatpush1.bf16.msra.mxu1 %v5290_v22  ;;  %1648 = vmatpush1.bf16.msra.mxu0 %v5293_v23 }
 0x17f   : > { %1376 = vmatprep.subr.bf16.mxu1 %v5298_v24  ;;  %1649 = vmatprep.subr.bf16.mxu0 %v5301_v25 }
 0x180   : > { %921 = vmatmul.mubr.bf16.gmra.mrb[28].mxu0 %v5210_v26  ;;  %1082 = vmatmul.mubr.bf16.gmra.mrb[28].mxu1 %v5211_v27 }
 0x182   : > { %1377 = vmatpush1.bf16.msra.mxu1 %v5296_v28  ;;  %1650 = vmatpush1.bf16.msra.mxu0 %v5299_v29 }
 0x183   : > { %1378 = vmatprep.subr.bf16.mxu1 %v5304_v30  ;;  %1651 = vmatprep.subr.bf16.mxu0 %v5307_v0 }
 0x186   : > { %1379 = vmatpush1.bf16.msra.mxu1 %v5302_v31  ;;  %1652 = vmatpush1.bf16.msra.mxu0 %v5305_v32 }
 0x21b   : > { %v852_v33 = vpop.f32.mrb[0].mxu0  ;;  %v1013_v34 = vpop.f32.mrb[0].mxu1 }
 0x21c   : > { %v854_v35 = vpop.f32.mrb[1].mxu0  ;;  %v1015_v36 = vpop.f32.mrb[1].mxu1 }
 0x21d   : > { %v856_v37 = vpop.f32.mrb[2].mxu0  ;;  %v1017_v38 = vpop.f32.mrb[2].mxu1 }
 0x21e   : > { %v1092_v39 = vpack.c.bf16 %v856_v37, %v852_v33  ;;  %v1140_v40 = vpack.c.bf16 %v1017_v38, %v1013_v34  ;;  %v858_v41 = vpop.f32.mrb[3].mxu0  ;;  %v1019_v42 = vpop.f32.mrb[3].mxu1 }
 0x21f   : > { %v1093_v43 = vpack.c.bf16 %v858_v41, %v854_v35  ;;  %v1141_v44 = vpack.c.bf16 %v1019_v42, %v1015_v36 }
 0x221   : > { %1380 = vmatprep.mubr.bf16.mxu1 %v1141_v44  ;;  %1653 = vmatprep.mubr.bf16.mxu0 %v1093_v43 }
 0x222   : > { %1381 = vmatmul.mubr.bf16.vlgmr.msra.gmra.mrb[32].mxu1 %v1140_v40  ;;  %1654 = vmatmul.mubr.bf16.vlgmr.msra.gmra.mrb[32].mxu0 %v1092_v39 }
 0x223   : > { %v862_v45 = vpop.f32.mrb[4].mxu0  ;;  %v1023_v46 = vpop.f32.mrb[4].mxu1 }
 0x224   : > { %v864_v47 = vpop.f32.mrb[5].mxu0  ;;  %v1025_v48 = vpop.f32.mrb[5].mxu1 }
 0x225   : > { %v866_v49 = vpop.f32.mrb[6].mxu0  ;;  %v1027_v50 = vpop.f32.mrb[6].mxu1 }
 0x226   : > { %v1094_v51 = vpack.c.bf16 %v866_v49, %v862_v45  ;;  %v1142_v52 = vpack.c.bf16 %v1027_v50, %v1023_v46  ;;  %v868_v53 = vpop.f32.mrb[7].mxu0  ;;  %v1029_v54 = vpop.f32.mrb[7].mxu1 }
 0x227   : > { %v1095_v55 = vpack.c.bf16 %v868_v53, %v864_v47  ;;  %v1143_v56 = vpack.c.bf16 %v1029_v54, %v1025_v48 }
 0x229   : > { %1390 = vmatprep.mubr.bf16.mxu1 %v1143_v56  ;;  %1663 = vmatprep.mubr.bf16.mxu0 %v1095_v55 }
 0x22a   : > { %1391 = vmatmul.mubr.bf16.gmra.mrb[36].mxu1 %v1142_v52  ;;  %1664 = vmatmul.mubr.bf16.gmra.mrb[36].mxu0 %v1094_v51 }
 0x22b   : > { %v872_v57 = vpop.f32.mrb[8].mxu0  ;;  %v1033_v58 = vpop.f32.mrb[8].mxu1 }
 0x22c   : > { %v874_v59 = vpop.f32.mrb[9].mxu0  ;;  %v1035_v60 = vpop.f32.mrb[9].mxu1 }
 0x22d   : > { %v876_v61 = vpop.f32.mrb[10].mxu0  ;;  %v1037_v62 = vpop.f32.mrb[10].mxu1 }
 0x22e   : > { %v1096_v63 = vpack.c.bf16 %v876_v61, %v872_v57  ;;  %v1144_v1 = vpack.c.bf16 %v1037_v62, %v1033_v58  ;;  %v878_v2 = vpop.f32.mrb[11].mxu0  ;;  %v1039_v3 = vpop.f32.mrb[11].mxu1 }
 0x22f   : > { %v1097_v4 = vpack.c.bf16 %v878_v2, %v874_v59  ;;  %v1145_v5 = vpack.c.bf16 %v1039_v3, %v1035_v60  ;;  %v5308_v2 = vld [vmem:[#allocation13] ss:$16 sps:$4 sm:$0xff]   ;;  %v5310_v3 = vld [vmem:[#allocation13 + $0x4] ss:$16 sps:$4 sm:$0xff]  }
 0x230   : > { %2597 = vmatprep.subr.bf16.mxu1 %v5310_v3 }
 0x231   : > { %1400 = vmatprep.mubr.bf16.mxu1 %v1145_v5  ;;  %1673 = vmatprep.mubr.bf16.mxu0 %v1097_v4  ;;  %v5313_v4 = vld [vmem:[#allocation13 + $0x24] ss:$16 sps:$4 sm:$0xff]   ;;  %v5311_v5 = vld [vmem:[#allocation13 + $0x20] ss:$16 sps:$4 sm:$0xff]  }
 0x232   : > { %1401 = vmatmul.mubr.bf16.gmra.mrb[40].mxu1 %v1144_v1  ;;  %1674 = vmatmul.mubr.bf16.gmra.mrb[40].mxu0 %v1096_v63 }
 0x233   : > { %v882_v6 = vpop.f32.mrb[12].mxu0  ;;  %v1043_v7 = vpop.f32.mrb[12].mxu1  ;;  %2598 = vmatpush1.bf16.msra.mxu1 %v5308_v2 }
 0x234   : > { %v884_v8 = vpop.f32.mrb[13].mxu0  ;;  %v1045_v9 = vpop.f32.mrb[13].mxu1  ;;  %2599 = vmatprep.subr.bf16.mxu1 %v5313_v4 }
 0x235   : > { %v886_v10 = vpop.f32.mrb[14].mxu0  ;;  %v1047_v11 = vpop.f32.mrb[14].mxu1 }
 0x236   : > { %v1098_v12 = vpack.c.bf16 %v886_v10, %v882_v6  ;;  %v1146_v13 = vpack.c.bf16 %v1047_v11, %v1043_v7  ;;  %v888_v14 = vpop.f32.mrb[15].mxu0  ;;  %v1049_v15 = vpop.f32.mrb[15].mxu1  ;;  %v5316_v6 = vld [vmem:[#allocation13 + $0x44] ss:$16 sps:$4 sm:$0xff]   ;;  %v5314_v7 = vld [vmem:[#allocation13 + $0x40] ss:$16 sps:$4 sm:$0xff]  }
 0x237   : > { %v1099_v16 = vpack.c.bf16 %v888_v14, %v884_v8  ;;  %v1147_v17 = vpack.c.bf16 %v1049_v15, %v1045_v9  ;;  %2600 = vmatpush1.bf16.msra.mxu1 %v5311_v5  ;;  %v5319_v8 = vld [vmem:[#allocation13 + $0x64] ss:$16 sps:$4 sm:$0xff]   ;;  %v5317_v9 = vld [vmem:[#allocation13 + $0x60] ss:$16 sps:$4 sm:$0xff]  }
 0x238   : > { %2601 = vmatprep.subr.bf16.mxu1 %v5316_v6  ;;  %v5322_v10 = vld [vmem:[#allocation13 + $0x84] ss:$16 sps:$4 sm:$0xff]   ;;  %v5320_v11 = vld [vmem:[#allocation13 + $0x80] ss:$16 sps:$4 sm:$0xff]  }
 0x239   : > { %1410 = vmatprep.mubr.bf16.mxu1 %v1147_v17  ;;  %1683 = vmatprep.mubr.bf16.mxu0 %v1099_v16  ;;  %v5328_v14 = vld [vmem:[#allocation13 + $0xc4] ss:$16 sps:$4 sm:$0xff]   ;;  %v5326_v15 = vld [vmem:[#allocation13 + $0xc0] ss:$16 sps:$4 sm:$0xff]  }
 0x23a   : > { %1411 = vmatmul.mubr.bf16.gmra.mrb[44].mxu1 %v1146_v13  ;;  %1684 = vmatmul.mubr.bf16.gmra.mrb[44].mxu0 %v1098_v12  ;;  %v5325_v12 = vld [vmem:[#allocation13 + $0xa4] ss:$16 sps:$4 sm:$0xff]   ;;  %v5323_v13 = vld [vmem:[#allocation13 + $0xa0] ss:$16 sps:$4 sm:$0xff]  }
 0x23b   : > { %v892_v18 = vpop.f32.mrb[16].mxu0  ;;  %v1053_v19 = vpop.f32.mrb[16].mxu1  ;;  %2602 = vmatpush1.bf16.msra.mxu1 %v5314_v7  ;;  %v5331_v16 = vld [vmem:[#allocation13 + $0xe4] ss:$16 sps:$4 sm:$0xff]   ;;  %v5329_v17 = vld [vmem:[#allocation13 + $0xe0] ss:$16 sps:$4 sm:$0xff]  }
 0x23c   : > { %v894_v20 = vpop.f32.mrb[17].mxu0  ;;  %v1055_v21 = vpop.f32.mrb[17].mxu1  ;;  %2603 = vmatprep.subr.bf16.mxu1 %v5319_v8 }
 0x23d   : > { %v896_v22 = vpop.f32.mrb[18].mxu0  ;;  %v1057_v23 = vpop.f32.mrb[18].mxu1 }
 0x23e   : > { %v1100_v24 = vpack.c.bf16 %v896_v22, %v892_v18  ;;  %v1148_v25 = vpack.c.bf16 %v1057_v23, %v1053_v19  ;;  %v898_v26 = vpop.f32.mrb[19].mxu0  ;;  %v1059_v27 = vpop.f32.mrb[19].mxu1  ;;  %v5334_v18 = vld [vmem:[#allocation13 + $0x104] ss:$16 sps:$4 sm:$0xff]   ;;  %v5332_v19 = vld [vmem:[#allocation13 + $0x100] ss:$16 sps:$4 sm:$0xff]  }
 0x23f   : > { %v1101_v28 = vpack.c.bf16 %v898_v26, %v894_v20  ;;  %v1149_v29 = vpack.c.bf16 %v1059_v27, %v1055_v21  ;;  %2604 = vmatpush1.bf16.msra.mxu1 %v5317_v9  ;;  %v1734_v22 = vld [vmem:[%s6455_s2] sm:$0xff]  ;;  %v1735_v26 = vld [vmem:[%s6455_s2 + $0x8] sm:$0xff] }
 0x240   : > { %2605 = vmatprep.subr.bf16.mxu1 %v5322_v10  ;;  %v1742_v9 = vld [vmem:[%s6455_s2 + $0x40] sm:$0xff] }
 0x241   : > { %1420 = vmatprep.mubr.bf16.mxu1 %v1149_v29  ;;  %1693 = vmatprep.mubr.bf16.mxu0 %v1101_v28 }
 0x242   : > { %1421 = vmatmul.mubr.bf16.gmra.mrb[48].mxu1 %v1148_v25  ;;  %1694 = vmatmul.mubr.bf16.gmra.mrb[48].mxu0 %v1100_v24 }
 0x243   : > { %v902_v30 = vpop.f32.mrb[20].mxu0  ;;  %v1063_v0 = vpop.f32.mrb[20].mxu1  ;;  %2606 = vmatpush1.bf16.msra.mxu1 %v5320_v11 }
 0x244   : > { %v904_v31 = vpop.f32.mrb[21].mxu0  ;;  %v1065_v32 = vpop.f32.mrb[21].mxu1  ;;  %2607 = vmatprep.subr.bf16.mxu1 %v5325_v12 }
 0x245   : > { %v906_v33 = vpop.f32.mrb[22].mxu0  ;;  %v1067_v34 = vpop.f32.mrb[22].mxu1 }
 0x246   : > { %v1102_v35 = vpack.c.bf16 %v906_v33, %v902_v30  ;;  %v1150_v36 = vpack.c.bf16 %v1067_v34, %v1063_v0  ;;  %v908_v37 = vpop.f32.mrb[23].mxu0  ;;  %v1069_v38 = vpop.f32.mrb[23].mxu1  ;;  %v1736_v30 = vld [vmem:[%s6455_s2 + $0x10] sm:$0xff]  ;;  %v1737_v34 = vld [vmem:[%s6455_s2 + $0x18] sm:$0xff] }
 0x247   : > { %v1103_v39 = vpack.c.bf16 %v908_v37, %v904_v31  ;;  %v1151_v40 = vpack.c.bf16 %v1069_v38, %v1065_v32  ;;  %2608 = vmatpush1.bf16.msra.mxu1 %v5323_v13 }
 0x248   : > { %2609 = vmatprep.subr.bf16.mxu1 %v5328_v14 }
 0x249   : > { %1430 = vmatprep.mubr.bf16.mxu1 %v1151_v40  ;;  %1703 = vmatprep.mubr.bf16.mxu0 %v1103_v39 }
 0x24a   : > { %1431 = vmatmul.mubr.bf16.gmra.mrb[52].mxu1 %v1150_v36  ;;  %1704 = vmatmul.mubr.bf16.gmra.mrb[52].mxu0 %v1102_v35 }
 0x24b   : > { %v912_v41 = vpop.f32.mrb[24].mxu0  ;;  %v1073_v42 = vpop.f32.mrb[24].mxu1  ;;  %2610 = vmatpush1.bf16.msra.mxu1 %v5326_v15 }
 0x24c   : > { %v914_v43 = vpop.f32.mrb[25].mxu0  ;;  %v1075_v44 = vpop.f32.mrb[25].mxu1  ;;  %2611 = vmatprep.subr.bf16.mxu1 %v5331_v16  ;;  %v1743_v16 = vld [vmem:[%s6455_s2 + $0x48] sm:$0xff] }
 0x24d   : > { %v916_v45 = vpop.f32.mrb[26].mxu0  ;;  %v1077_v46 = vpop.f32.mrb[26].mxu1 }
 0x24e   : > { %v1104_v47 = vpack.c.bf16 %v916_v45, %v912_v41  ;;  %v1152_v48 = vpack.c.bf16 %v1077_v46, %v1073_v42  ;;  %v918_v49 = vpop.f32.mrb[27].mxu0  ;;  %v1079_v50 = vpop.f32.mrb[27].mxu1 }
 0x24f   : > { %v1105_v51 = vpack.c.bf16 %v918_v49, %v914_v43  ;;  %v1153_v52 = vpack.c.bf16 %v1079_v50, %v1075_v44  ;;  %2612 = vmatpush1.bf16.msra.mxu1 %v5329_v17  ;;  %v1738_v44 = vld [vmem:[%s6455_s2 + $0x20] sm:$0xff] }
 0x250   : > { %2613 = vmatprep.subr.bf16.mxu1 %v5334_v18 }
 0x251   : > { %1440 = vmatprep.mubr.bf16.mxu1 %v1153_v52  ;;  %1713 = vmatprep.mubr.bf16.mxu0 %v1105_v51  ;;  %v1739_v51 = vld [vmem:[%s6455_s2 + $0x28] sm:$0xff] }
 0x252   : > { %1441 = vmatmul.mubr.bf16.gmra.mrb[56].mxu1 %v1152_v48  ;;  %1714 = vmatmul.mubr.bf16.gmra.mrb[56].mxu0 %v1104_v47 }
 0x253   : > { %v922_v53 = vpop.f32.mrb[28].mxu0  ;;  %v1083_v54 = vpop.f32.mrb[28].mxu1  ;;  %2614 = vmatpush1.bf16.msra.mxu1 %v5332_v19 }
 0x254   : > { %v924_v55 = vpop.f32.mrb[29].mxu0  ;;  %v1085_v56 = vpop.f32.mrb[29].mxu1 }
 0x255   : > { %v926_v57 = vpop.f32.mrb[30].mxu0  ;;  %v1087_v58 = vpop.f32.mrb[30].mxu1 }
 0x256   : > { %v1106_v59 = vpack.c.bf16 %v926_v57, %v922_v53  ;;  %v1154_v60 = vpack.c.bf16 %v1087_v58, %v1083_v54  ;;  %v928_v61 = vpop.f32.mrb[31].mxu0  ;;  %v1089_v62 = vpop.f32.mrb[31].mxu1 }
 0x257   : > { %v1107_v63 = vpack.c.bf16 %v928_v61, %v924_v55  ;;  %v1155_v1 = vpack.c.bf16 %v1089_v62, %v1085_v56  ;;  %v1740_v55 = vld [vmem:[%s6455_s2 + $0x30] sm:$0xff]  ;;  %v1741_v61 = vld [vmem:[%s6455_s2 + $0x38] sm:$0xff] }
 0x259   : > { %1450 = vmatprep.mubr.bf16.mxu1 %v1155_v1  ;;  %1723 = vmatprep.mubr.bf16.mxu0 %v1107_v63 }
 0x25a   : > { %1451 = vmatmul.mubr.bf16.gmra.mrb[60].mxu1 %v1154_v60  ;;  %1724 = vmatmul.mubr.bf16.gmra.mrb[60].mxu0 %v1106_v59 }
 0x2f5   : > { %v1382_v20 = vpop.f32.mrb[32].mxu1  ;;  %v1655_v21 = vpop.f32.mrb[32].mxu0 }
 0x2f6   : > { %v1656_v23 = vadd.f32 %v1655_v21, %v1382_v20  ;;  %v1384_v24 = vpop.f32.mrb[33].mxu1  ;;  %v1657_v25 = vpop.f32.mrb[33].mxu0  ;;  %v1744_v20 = vld [vmem:[%s6455_s2 + $0x50] sm:$0xff] }
 0x2f7   : > { %v1658_v27 = vadd.f32 %v1657_v25, %v1384_v24  ;;  %v1386_v28 = vpop.f32.mrb[34].mxu1  ;;  %v1659_v29 = vpop.f32.mrb[34].mxu0 }
 0x2f8   : > { %v6512_v0 = vadd.f32 %v1734_v22, %v1656_v23  ;;  %v1660_v31 = vadd.f32 %v1659_v29, %v1386_v28  ;;  %v1388_v32 = vpop.f32.mrb[35].mxu1  ;;  %v1661_v33 = vpop.f32.mrb[35].mxu0 }
 0x2f9   : > { %v6515_v35 = vadd.f32 %v1735_v26, %v1658_v27  ;;  %v1662_v36 = vadd.f32 %v1661_v33, %v1388_v32  ;;  %v1745_v26 = vld [vmem:[%s6455_s2 + $0x58] sm:$0xff] }
 0x2fa   : > { %v6517_v37 = vadd.f32 %v1736_v30, %v1660_v31  ;;  %v1863_v38 = vmul.f32 %v6512_v0, %v6512_v0 }
 0x2fb   : > { %v6521_v39 = vadd.f32 %v1737_v34, %v1662_v36  ;;  %v1798_v40 = vadd.f32 %v6515_v35, %v6512_v0  ;;  %v1864_v41 = vmul.f32 %v6515_v35, %v6515_v35 }
 0x2fc   : > { %v1865_v46 = vmul.f32 %v6517_v37, %v6517_v37 }
 0x2fd   : > { %v1392_v42 = vpop.f32.mrb[36].mxu1  ;;  %v1665_v43 = vpop.f32.mrb[36].mxu0  ;;  %1799 = vadd.xlane.f32.xlu0 %v1798_v40  ;;  %v1895_v45 = vadd.f32 %v1864_v41, %v1863_v38  ;;  %v1866_v47 = vmul.f32 %v6521_v39, %v6521_v39  ;;  %v1801_v56 = vadd.f32 %v6521_v39, %v6517_v37  ;;  %v1746_v40 = vld [vmem:[%s6455_s2 + $0x60] sm:$0xff] }
 0x2fe   : > { %v1666_v48 = vadd.f32 %v1665_v43, %v1392_v42  ;;  %v1394_v49 = vpop.f32.mrb[37].mxu1  ;;  %v1667_v50 = vpop.f32.mrb[37].mxu0 }
 0x2ff   : > { %v1668_v52 = vadd.f32 %v1667_v50, %v1394_v49  ;;  %v1396_v53 = vpop.f32.mrb[38].mxu1  ;;  %v1669_v54 = vpop.f32.mrb[38].mxu0  ;;  %1896 = vadd.xlane.f32.xlu1 %v1895_v45  ;;  %v1898_v1 = vadd.f32 %v1866_v47, %v1865_v46  ;;  %v5335_v49 = vld [vmem:[#allocation13 + $0x120] ss:$16 sps:$4 sm:$0xff]  }
 0x300   : > { %v6536_v57 = vadd.f32 %v1738_v44, %v1666_v48  ;;  %v1670_v58 = vadd.f32 %v1669_v54, %v1396_v53  ;;  %v1398_v59 = vpop.f32.mrb[39].mxu1  ;;  %v1671_v60 = vpop.f32.mrb[39].mxu0  ;;  %v5337_v44 = vld [vmem:[#allocation13 + $0x124] ss:$16 sps:$4 sm:$0xff]   ;;  %v1747_v48 = vld [vmem:[%s6455_s2 + $0x68] sm:$0xff] }
 0x301   : > { %v6539_v62 = vadd.f32 %v1739_v51, %v1668_v52  ;;  %v1672_v63 = vadd.f32 %v1671_v60, %v1398_v59  ;;  %1802 = vadd.xlane.f32.xlu0 %v1801_v56  ;;  %v1748_v53 = vld [vmem:[%s6455_s2 + $0x70] sm:$0xff]  ;;  %2615 = vmatprep.subr.bf16.mxu1 %v5337_v44  ;;  %v1749_v60 = vld [vmem:[%s6455_s2 + $0x78] sm:$0xff] }
 0x302   : > { %v6541_v2 = vadd.f32 %v1740_v55, %v1670_v58  ;;  %v1867_v5 = vmul.f32 %v6536_v57, %v6536_v57  ;;  %2616 = vmatpush1.bf16.msra.mxu1 %v5335_v49  ;;  %v5346_v44 = vld [vmem:[#allocation13 + $0x184] ss:$16 sps:$4 sm:$0xff]   ;;  %v5344_v49 = vld [vmem:[#allocation13 + $0x180] ss:$16 sps:$4 sm:$0xff]  }
 0x303   : > { %v6543_v3 = vadd.f32 %v1741_v61, %v1672_v63  ;;  %1899 = vadd.xlane.f32.xlu1 %v1898_v1  ;;  %v1804_v4 = vadd.f32 %v6539_v62, %v6536_v57  ;;  %v1868_v6 = vmul.f32 %v6539_v62, %v6539_v62 }
 0x304   : > { %v1869_v11 = vmul.f32 %v6541_v2, %v6541_v2 }
 0x305   : > { %v1402_v7 = vpop.f32.mrb[40].mxu1  ;;  %v1675_v8 = vpop.f32.mrb[40].mxu0  ;;  %1805 = vadd.xlane.f32.xlu0 %v1804_v4  ;;  %v1807_v10 = vadd.f32 %v6543_v3, %v6541_v2  ;;  %v1870_v12 = vmul.f32 %v6543_v3, %v6543_v3  ;;  %v1901_v21 = vadd.f32 %v1868_v6, %v1867_v5  ;;  %v5340_v5 = vld [vmem:[#allocation13 + $0x144] ss:$16 sps:$4 sm:$0xff]  }
 0x306   : > { %v1676_v13 = vadd.f32 %v1675_v8, %v1402_v7  ;;  %v1404_v14 = vpop.f32.mrb[41].mxu1  ;;  %v1677_v15 = vpop.f32.mrb[41].mxu0  ;;  %2617 = vmatprep.subr.bf16.mxu1 %v5340_v5 }
 0x307   : > { %v1678_v17 = vadd.f32 %v1677_v15, %v1404_v14  ;;  %v1406_v18 = vpop.f32.mrb[42].mxu1  ;;  %v1679_v19 = vpop.f32.mrb[42].mxu0  ;;  %1808 = vadd.xlane.f32.xlu1 %v1807_v10  ;;  %v1904_v29 = vadd.f32 %v1870_v12, %v1869_v11  ;;  %v5338_v10 = vld [vmem:[#allocation13 + $0x140] ss:$16 sps:$4 sm:$0xff]  }
 0x308   : > { %v6560_v22 = vadd.f32 %v1742_v9, %v1676_v13  ;;  %v1680_v23 = vadd.f32 %v1679_v19, %v1406_v18  ;;  %v1408_v24 = vpop.f32.mrb[43].mxu1  ;;  %v1681_v25 = vpop.f32.mrb[43].mxu0  ;;  %v1750_v13 = vld [vmem:[%s6455_s2 + $0x80] sm:$0xff]  ;;  %2618 = vmatpush1.bf16.msra.mxu1 %v5338_v10 }
 0x309   : > { %v6563_v27 = vadd.f32 %v1743_v16, %v1678_v17  ;;  %v1682_v28 = vadd.f32 %v1681_v25, %v1408_v24  ;;  %1902 = vadd.xlane.f32.xlu0 %v1901_v21  ;;  %v5343_v21 = vld [vmem:[#allocation13 + $0x164] ss:$16 sps:$4 sm:$0xff]  }
 0x30a   : > { %v6565_v30 = vadd.f32 %v1744_v20, %v1680_v23  ;;  %v1871_v33 = vmul.f32 %v6560_v22, %v6560_v22  ;;  %v1751_v20 = vld [vmem:[%s6455_s2 + $0x88] sm:$0xff]  ;;  %2619 = vmatprep.subr.bf16.mxu1 %v5343_v21  ;;  %v5352_v21 = vld [vmem:[#allocation13 + $0x1c4] ss:$16 sps:$4 sm:$0xff]  }
 0x30b   : > { %v6567_v31 = vadd.f32 %v1745_v26, %v1682_v28  ;;  %1905 = vadd.xlane.f32.xlu1 %v1904_v29  ;;  %v1810_v32 = vadd.f32 %v6563_v27, %v6560_v22  ;;  %v1872_v34 = vmul.f32 %v6563_v27, %v6563_v27  ;;  %v1752_v26 = vld [vmem:[%s6455_s2 + $0x90] sm:$0xff] }
 0x30c   : > { %v1873_v42 = vmul.f32 %v6565_v30, %v6565_v30  ;;  %v5341_v29 = vld [vmem:[#allocation13 + $0x160] ss:$16 sps:$4 sm:$0xff]  }
 0x30d   : > { %v1412_v36 = vpop.f32.mrb[44].mxu1  ;;  %v1685_v38 = vpop.f32.mrb[44].mxu0  ;;  %1811 = vadd.xlane.f32.xlu0 %v1810_v32  ;;  %v1813_v41 = vadd.f32 %v6567_v31, %v6565_v30  ;;  %v1874_v43 = vmul.f32 %v6567_v31, %v6567_v31  ;;  %v1907_v54 = vadd.f32 %v1872_v34, %v1871_v33  ;;  %2620 = vmatpush1.bf16.msra.mxu1 %v5341_v29 }
 0x30e   : > { %v1686_v45 = vadd.f32 %v1685_v38, %v1412_v36  ;;  %v1414_v46 = vpop.f32.mrb[45].mxu1  ;;  %v1687_v47 = vpop.f32.mrb[45].mxu0  ;;  %v1753_v38 = vld [vmem:[%s6455_s2 + $0x98] sm:$0xff]  ;;  %2621 = vmatprep.subr.bf16.mxu1 %v5346_v44 }
 0x30f   : > { %v1688_v50 = vadd.f32 %v1687_v47, %v1414_v46  ;;  %v1416_v51 = vpop.f32.mrb[46].mxu1  ;;  %v1689_v52 = vpop.f32.mrb[46].mxu0  ;;  %1814 = vadd.xlane.f32.xlu1 %v1813_v41  ;;  %v1910_v1 = vadd.f32 %v1874_v43, %v1873_v42 }
 0x310   : > { %v6584_v55 = vadd.f32 %v1746_v40, %v1686_v45  ;;  %v1690_v56 = vadd.f32 %v1689_v52, %v1416_v51  ;;  %v1418_v58 = vpop.f32.mrb[47].mxu1  ;;  %v1691_v59 = vpop.f32.mrb[47].mxu0  ;;  %v1754_v52 = vld [vmem:[%s6455_s2 + $0xa0] sm:$0xff] }
 0x311   : > { %v6587_v61 = vadd.f32 %v1747_v48, %v1688_v50  ;;  %v1692_v63 = vadd.f32 %v1691_v59, %v1418_v58  ;;  %1908 = vadd.xlane.f32.xlu0 %v1907_v54  ;;  %2622 = vmatpush1.bf16.msra.mxu1 %v5344_v49 }
 0x312   : > { %v6589_v4 = vadd.f32 %v1748_v53, %v1690_v56  ;;  %v1875_v8 = vmul.f32 %v6584_v55, %v6584_v55 }
 0x313   : > { %v6591_v6 = vadd.f32 %v1749_v60, %v1692_v63  ;;  %1911 = vadd.xlane.f32.xlu1 %v1910_v1  ;;  %v1816_v7 = vadd.f32 %v6587_v61, %v6584_v55  ;;  %v1876_v9 = vmul.f32 %v6587_v61, %v6587_v61  ;;  %v1755_v63 = vld [vmem:[%s6455_s2 + $0xa8] sm:$0xff]  ;;  %v5349_v1 = vld [vmem:[#allocation13 + $0x1a4] ss:$16 sps:$4 sm:$0xff]  }
 0x314   : > { %v1877_v15 = vmul.f32 %v6589_v4, %v6589_v4  ;;  %2623 = vmatprep.subr.bf16.mxu1 %v5349_v1 }
 0x315   : > { %v1422_v11 = vpop.f32.mrb[48].mxu1  ;;  %v1695_v12 = vpop.f32.mrb[48].mxu0  ;;  %1817 = vadd.xlane.f32.xlu0 %v1816_v7  ;;  %v1819_v14 = vadd.f32 %v6591_v6, %v6589_v4  ;;  %v1878_v16 = vmul.f32 %v6591_v6, %v6591_v6  ;;  %v1913_v28 = vadd.f32 %v1876_v9, %v1875_v8  ;;  %v1756_v9 = vld [vmem:[%s6455_s2 + $0xb0] sm:$0xff] }
 0x316   : > { %v1696_v17 = vadd.f32 %v1695_v12, %v1422_v11  ;;  %v1424_v18 = vpop.f32.mrb[49].mxu1  ;;  %v1697_v19 = vpop.f32.mrb[49].mxu0  ;;  %v5347_v11 = vld [vmem:[#allocation13 + $0x1a0] ss:$16 sps:$4 sm:$0xff]  }
 0x317   : > { %v1698_v23 = vadd.f32 %v1697_v19, %v1424_v18  ;;  %v1426_v24 = vpop.f32.mrb[50].mxu1  ;;  %v1699_v25 = vpop.f32.mrb[50].mxu0  ;;  %1820 = vadd.xlane.f32.xlu1 %v1819_v14  ;;  %v1916_v42 = vadd.f32 %v1878_v16, %v1877_v15  ;;  %v1757_v16 = vld [vmem:[%s6455_s2 + $0xb8] sm:$0xff]  ;;  %2624 = vmatpush1.bf16.msra.mxu1 %v5347_v11 }
 0x318   : > { %v6608_v32 = vadd.f32 %v1750_v13, %v1696_v17  ;;  %v1700_v33 = vadd.f32 %v1699_v25, %v1426_v24  ;;  %v1428_v34 = vpop.f32.mrb[51].mxu1  ;;  %v1701_v36 = vpop.f32.mrb[51].mxu0  ;;  %2625 = vmatprep.subr.bf16.mxu1 %v5352_v21 }
 0x319   : > { %v6611_v40 = vadd.f32 %v1751_v20, %v1698_v23  ;;  %v1702_v41 = vadd.f32 %v1701_v36, %v1428_v34  ;;  %1914 = vadd.xlane.f32.xlu0 %v1913_v28  ;;  %v5350_v28 = vld [vmem:[#allocation13 + $0x1c0] ss:$16 sps:$4 sm:$0xff]  }
 0x31a   : > { %v6613_v43 = vadd.f32 %v1752_v26, %v1700_v33  ;;  %v1879_v47 = vmul.f32 %v6608_v32, %v6608_v32  ;;  %v1758_v34 = vld [vmem:[%s6455_s2 + $0xc0] sm:$0xff] }
 0x31b   : > { %v6615_v45 = vadd.f32 %v1753_v38, %v1702_v41  ;;  %1917 = vadd.xlane.f32.xlu1 %v1916_v42  ;;  %v1822_v46 = vadd.f32 %v6611_v40, %v6608_v32  ;;  %v1880_v48 = vmul.f32 %v6611_v40, %v6611_v40  ;;  %2626 = vmatpush1.bf16.msra.mxu1 %v5350_v28 }
 0x31c   : > { %v1881_v54 = vmul.f32 %v6613_v43, %v6613_v43 }
 0x31d   : > { %v1432_v50 = vpop.f32.mrb[52].mxu1  ;;  %v1705_v51 = vpop.f32.mrb[52].mxu0  ;;  %1823 = vadd.xlane.f32.xlu0 %v1822_v46  ;;  %v1825_v53 = vadd.f32 %v6615_v45, %v6613_v43  ;;  %v1882_v56 = vmul.f32 %v6615_v45, %v6615_v45  ;;  %v1919_v10 = vadd.f32 %v1880_v48, %v1879_v47  ;;  %v1759_v47 = vld [vmem:[%s6455_s2 + $0xc8] sm:$0xff]  ;;  %v5355_v48 = vld [vmem:[#allocation13 + $0x1e4] ss:$16 sps:$4 sm:$0xff]  }
 0x31e   : > { %v1706_v58 = vadd.f32 %v1705_v51, %v1432_v50  ;;  %v1434_v59 = vpop.f32.mrb[53].mxu1  ;;  %v1707_v60 = vpop.f32.mrb[53].mxu0  ;;  %2627 = vmatprep.subr.bf16.mxu1 %v5355_v48  ;;  %v1765_v48 = vld [vmem:[%s6455_s2 + $0xf8] sm:$0xff] }
 0x31f   : > { %v1708_v5 = vadd.f32 %v1707_v60, %v1434_v59  ;;  %v1436_v7 = vpop.f32.mrb[54].mxu1  ;;  %v1709_v8 = vpop.f32.mrb[54].mxu0  ;;  %1826 = vadd.xlane.f32.xlu1 %v1825_v53  ;;  %v1922_v19 = vadd.f32 %v1882_v56, %v1881_v54  ;;  %v5353_v54 = vld [vmem:[#allocation13 + $0x1e0] ss:$16 sps:$4 sm:$0xff]  }
 0x320   : > { %v6632_v12 = vadd.f32 %v1754_v52, %v1706_v58  ;;  %v1710_v13 = vadd.f32 %v1709_v8, %v1436_v7  ;;  %v1438_v14 = vpop.f32.mrb[55].mxu1  ;;  %v1711_v15 = vpop.f32.mrb[55].mxu0  ;;  %v1760_v52 = vld [vmem:[%s6455_s2 + $0xd0] sm:$0xff]  ;;  %2628 = vmatpush1.bf16.msra.mxu1 %v5353_v54 }
 0x321   : > { %v6635_v17 = vadd.f32 %v1755_v63, %v1708_v5  ;;  %v1712_v18 = vadd.f32 %v1711_v15, %v1438_v14  ;;  %1920 = vadd.xlane.f32.xlu0 %v1919_v10  ;;  %v1761_v63 = vld [vmem:[%s6455_s2 + $0xd8] sm:$0xff] }
 0x322   : > { %v6637_v20 = vadd.f32 %v1756_v9, %v1710_v13  ;;  %v1883_v25 = vmul.f32 %v6632_v12, %v6632_v12  ;;  %v5358_v14 = vld [vmem:[#allocation13 + $0xc] ss:$16 sps:$4 sm:$0xff]  }
 0x323   : > { %v6639_v23 = vadd.f32 %v1757_v16, %v1712_v18  ;;  %1923 = vadd.xlane.f32.xlu1 %v1922_v19  ;;  %v1828_v24 = vadd.f32 %v6635_v17, %v6632_v12  ;;  %v1884_v26 = vmul.f32 %v6635_v17, %v6635_v17  ;;  %v1762_v18 = vld [vmem:[%s6455_s2 + $0xe0] sm:$0xff]  ;;  %2710 = vmatprep.subr.bf16.mxu1 %v5358_v14 }
 0x324   : > { %v1885_v38 = vmul.f32 %v6637_v20, %v6637_v20 }
 0x325   : > { %v1442_v29 = vpop.f32.mrb[56].mxu1  ;;  %v1715_v33 = vpop.f32.mrb[56].mxu0  ;;  %1829 = vadd.xlane.f32.xlu0 %v1828_v24  ;;  %v1831_v36 = vadd.f32 %v6639_v23, %v6637_v20  ;;  %v1886_v41 = vmul.f32 %v6639_v23, %v6639_v23  ;;  %v1925_v53 = vadd.f32 %v1884_v26, %v1883_v25 }
 0x326   : > { %v1716_v42 = vadd.f32 %v1715_v33, %v1442_v29  ;;  %v1444_v44 = vpop.f32.mrb[57].mxu1  ;;  %v1717_v46 = vpop.f32.mrb[57].mxu0  ;;  %v1763_v29 = vld [vmem:[%s6455_s2 + $0xe8] sm:$0xff] }
 0x327   : > { %v1718_v49 = vadd.f32 %v1717_v46, %v1444_v44  ;;  %v1446_v50 = vpop.f32.mrb[58].mxu1  ;;  %v1719_v51 = vpop.f32.mrb[58].mxu0  ;;  %1832 = vadd.xlane.f32.xlu1 %v1831_v36  ;;  %v1928_v7 = vadd.f32 %v1886_v41, %v1885_v38  ;;  %v1764_v38 = vld [vmem:[%s6455_s2 + $0xf0] sm:$0xff]  ;;  %s8121_s2 = scalar_lea.vmem [#allocation16], %s4699_s8  ;;  %s8533_s8 = sld [smem:[#allocation24_spill]] }
 0x328   : > { %v6656_v56 = vadd.f32 %v1758_v34, %v1716_v42  ;;  %v1720_v58 = vadd.f32 %v1719_v51, %v1446_v50  ;;  %v1448_v59 = vpop.f32.mrb[59].mxu1  ;;  %v1721_v60 = vpop.f32.mrb[59].mxu0  ;;  %s4510_s7 = sshll.u32 %s8121_s2, 4  ;;  %s8312_s7 = int_to_ptr.vmem [resolvable:$true] %s4510_s7 }
 0x329   : > { %v6659_v1 = vadd.f32 %v1759_v47, %v1718_v49  ;;  %v1722_v5 = vadd.f32 %v1721_v60, %v1448_v59  ;;  %1926 = vadd.xlane.f32.xlu0 %v1925_v53  ;;  %p5927_p5 = scmp.lt.s32.totalorder %s8312_s7, %s5925_s13 }
 0x32a   : > { %v6661_v8 = vadd.f32 %v1760_v52, %v1720_v58  ;;  %v1887_v11 = vmul.f32 %v6656_v56, %v6656_v56 }
 0x32b   : > { %v6663_v9 = vadd.f32 %v1761_v63, %v1722_v5  ;;  %1929 = vadd.xlane.f32.xlu1 %v1928_v7  ;;  %v1834_v10 = vadd.f32 %v6659_v1, %v6656_v56  ;;  %v1888_v13 = vmul.f32 %v6659_v1, %v6659_v1 }
 0x32c   : > { %v1889_v21 = vmul.f32 %v6661_v8, %v6661_v8 }
 0x32d   : > { %v1452_v15 = vpop.f32.mrb[60].mxu1  ;;  %1835 = vadd.xlane.f32.xlu0 %v1834_v10  ;;  %v1725_v16 = vpop.f32.mrb[60].mxu0  ;;  %v1837_v19 = vadd.f32 %v6663_v9, %v6661_v8  ;;  %v1890_v24 = vmul.f32 %v6663_v9, %v6663_v9  ;;  %v1931_v41 = vadd.f32 %v1888_v13, %v1887_v11  ;;  %s4938_s19 = sshll.u32 %s8533_s8, 12 }
 0x32e   : > { %v1726_v25 = vadd.f32 %v1725_v16, %v1452_v15  ;;  %v1454_v26 = vpop.f32.mrb[61].mxu1  ;;  %v1727_v28 = vpop.f32.mrb[61].mxu0 }
 0x32f   : > { %v1728_v33 = vadd.f32 %v1727_v28, %v1454_v26  ;;  %v1456_v34 = vpop.f32.mrb[62].mxu1  ;;  %1838 = vadd.xlane.f32.xlu1 %v1837_v19  ;;  %v1729_v36 = vpop.f32.mrb[62].mxu0  ;;  %v1934_v51 = vadd.f32 %v1890_v24, %v1889_v21 }
 0x330   : > { %v6680_v42 = vadd.f32 %v1762_v18, %v1726_v25  ;;  %v1730_v44 = vadd.f32 %v1729_v36, %v1456_v34  ;;  %v1458_v46 = vpop.f32.mrb[63].mxu1  ;;  %v1731_v47 = vpop.f32.mrb[63].mxu0 }
 0x331   : > { %v6683_v49 = vadd.f32 %v1763_v29, %v1728_v33  ;;  %v1732_v50 = vadd.f32 %v1731_v47, %v1458_v46  ;;  %1932 = vadd.xlane.f32.xlu0 %v1931_v41 }
 0x332   : > { %v6685_v52 = vadd.f32 %v1764_v38, %v1730_v44  ;;  %v1891_v58 = vmul.f32 %v6680_v42, %v6680_v42  ;;  %v2089_v38 = vlaneseq }
 0x333   : > { %v6687_v53 = vadd.f32 %v1765_v48, %v1732_v50  ;;  %1935 = vadd.xlane.f32.xlu1 %v1934_v51  ;;  %v1840_v54 = vadd.f32 %v6683_v49, %v6680_v42  ;;  %v1892_v59 = vmul.f32 %v6683_v49, %v6683_v49 }
 0x334   : > { %v1893_v63 = vmul.f32 %v6685_v52, %v6685_v52  ;;  %v6707_v51 = vshrl.u32 %v2089_v38, 7 }
 0x335   : > { %1841 = vadd.xlane.f32.xlu0 %v1840_v54  ;;  %v1843_v60 = vadd.f32 %v6687_v53, %v6685_v52  ;;  %v1894_v5 = vmul.f32 %v6687_v53, %v6687_v53  ;;  %v1937_v7 = vadd.f32 %v1892_v59, %v1891_v58 }
 0x337   : > { %1844 = vadd.xlane.f32.xlu1 %v1843_v60  ;;  %v1940_v10 = vadd.f32 %v1894_v5, %v1893_v63 }
 0x339   : > { %1938 = vadd.xlane.f32.xlu0 %v1937_v7 }
 0x33b   : > { %1941 = vadd.xlane.f32.xlu1 %v1940_v10 }
 0x38a   : > { %v1800_v11 = vpop.xlane.xlu0 %1799 }
 0x38b   : > { %v1847_v13 = vmul.f32 0.00390625, %v1800_v11  ;;  %v6714_v11 = vsub.s32 0, %v6707_v51 }
 0x38c   : > { %v1897_v14 = vpop.xlane.xlu1 %1896 }
 0x38d   : > { %v1943_v15 = vmul.f32 0.00390625, %v1897_v14  ;;  %v1959_v16 = vmul.f32 %v1847_v13, %v1847_v13  ;;  %v6717_v14 = vsub.s32 1, %v6707_v51 }
 0x38e   : > { %v1803_v18 = vpop.xlane.xlu0 %1802 }
 0x38f   : > { %v1975_v19 = vsub.f32 %v1943_v15, %v1959_v16  ;;  %v1848_v21 = vmul.f32 0.00390625, %v1803_v18  ;;  %v2087_v18 = vld [vmem:[%s8373_s6] sm:$0x3] }
 0x390   : > { %v1900_v24 = vpop.xlane.xlu1 %1899 }
 0x391   : > { %v2023_v25 = vadd.f32 1e-05, %v1975_v19  ;;  %v1944_v26 = vmul.f32 0.00390625, %v1900_v24  ;;  %v1960_v28 = vmul.f32 %v1848_v21, %v1848_v21  ;;  %v1991_v19 = vsub.f32 %v6512_v0, %v1847_v13 }
 0x392   : > { %v1806_v29 = vpop.xlane.xlu0 %1805  ;;  %v1992_v24 = vsub.f32 %v6515_v35, %v1847_v13  ;;  %v6735_v0 = vrot.slane %v2087_v18, %v6717_v14  ;;  %v1993_v35 = vsub.f32 %v6517_v37, %v1848_v21 }
 0x393   : > { %5500 = vrsqrt.f32 %v2023_v25  ;;  %v6701_v33 = vmul.f32 0.00390625, %v1806_v29  ;;  %v1976_v34 = vsub.f32 %v1944_v26, %v1960_v28 }
 0x394   : > { %v1809_v36 = vpop.xlane.xlu1 %1808 }
 0x395   : > { %v6703_v41 = vmul.f32 0.00390625, %v1809_v36  ;;  %v2024_v44 = vadd.f32 1e-05, %v1976_v34  ;;  %v1961_v47 = vmul.f32 %v6701_v33, %v6701_v33  ;;  %v2131_v34 = vld [vmem:[%s8466_s21] sm:$0x3]  ;;  %s8534_s21 = sld [smem:[#allocation67_spill]] }
 0x396   : > { %v1903_v46 = vpop.xlane.xlu0 %1902 }
 0x397   : > { %v1945_v48 = vmul.f32 0.00390625, %v1903_v46  ;;  %5502 = vrsqrt.f32 %v2024_v44  ;;  %v1962_v58 = vmul.f32 %v6703_v41, %v6703_v41  ;;  %v6732_v46 = vrot.slane %v2087_v18, %v6714_v11 }
 0x398   : > { %v1906_v50 = vpop.xlane.xlu1 %1905  ;;  %v6748_v18 = vrot.slane %v2131_v34, %v6717_v14 }
 0x399   : > { %v1977_v54 = vsub.f32 %v1945_v48, %v1961_v47  ;;  %v1946_v59 = vmul.f32 0.00390625, %v1906_v50 }
 0x39a   : > { %v1812_v60 = vpop.xlane.xlu0 %1811 }
 0x39b   : > { %v2025_v63 = vadd.f32 1e-05, %v1977_v54  ;;  %v1978_v5 = vsub.f32 %v1946_v59, %v1962_v58  ;;  %v6711_v7 = vmul.f32 0.00390625, %v1812_v60  ;;  %v1994_v54 = vsub.f32 %v6521_v39, %v1848_v21  ;;  %s8310_s27 = scalar_lea.hbm %s8534_s21, %s4938_s19 }
 0x39c   : > { %v1815_v10 = vpop.xlane.xlu1 %1814  ;;  %v6742_v59 = vrot.slane %v2131_v34, %v6714_v11  ;;  %v1995_v39 = vsub.f32 %v6536_v57, %v6701_v33  ;;  %v1996_v21 = vsub.f32 %v6539_v62, %v6701_v33  ;;  %v1998_v57 = vsub.f32 %v6543_v3, %v6703_v41 }
 0x39d   : > { %v5501_v15 = vpop.eup %5500  ;;  %5504 = vrsqrt.f32 %v2025_v63  ;;  %v2026_v16 = vadd.f32 1e-05, %v1978_v5  ;;  %v6724_v25 = vmul.f32 0.00390625, %v1815_v10  ;;  %v1963_v28 = vmul.f32 %v6711_v7, %v6711_v7 }
 0x39e   : > { %v1909_v26 = vpop.xlane.xlu0 %1908  ;;  %v2055_v36 = vmul.f32 %v5501_v15, %v1991_v19  ;;  %v2056_v44 = vmul.f32 %v5501_v15, %v1992_v24 }
 0x39f   : > { %5506 = vrsqrt.f32 %v2026_v16  ;;  %v1947_v29 = vmul.f32 0.00390625, %v1909_v26  ;;  %v1964_v47 = vmul.f32 %v6724_v25, %v6724_v25  ;;  %v5404_v26 = vld [vmem:[#allocation14] ss:$8 sps:$4 sm:$0xff]  }
 0x3a0   : > { %v1912_v38 = vpop.xlane.xlu1 %1911  ;;  %v2100_v37 = vmul.f32 %v6735_v0, %v2056_v44  ;;  %v2099_v19 = vmul.f32 %v6732_v46, %v2055_v36 }
 0x3a1   : > { %v1979_v13 = vsub.f32 %v1947_v29, %v1963_v28  ;;  %v1948_v48 = vmul.f32 0.00390625, %v1912_v38  ;;  %v5503_v50 = vpop.eup %5502  ;;  %v5406_v28 = vld [vmem:[#allocation14 + $0x4] ss:$8 sps:$4 sm:$0xff]   ;;  %v1997_v29 = vsub.f32 %v6541_v2, %v6703_v41 }
 0x3a2   : > { %v1818_v58 = vpop.xlane.xlu0 %1817  ;;  %v2057_v60 = vmul.f32 %v5503_v50, %v1993_v35  ;;  %v2058_v16 = vmul.f32 %v5503_v50, %v1994_v54  ;;  %v5409_v35 = vld [vmem:[#allocation14 + $0x14] ss:$8 sps:$4 sm:$0xff]   ;;  %3827 = vmatprep.subr.bf16.mxu0 %v5406_v28  ;;  %v6774_v54 = vadd.f32 %v6742_v59, %v2099_v19 }
 0x3a3   : > { %v2027_v63 = vadd.f32 1e-05, %v1979_v13  ;;  %v1980_v5 = vsub.f32 %v1948_v48, %v1964_v47  ;;  %v6744_v10 = vmul.f32 0.00390625, %v1818_v58  ;;  %v6768_v48 = vadd.f32 %v6748_v18, %v2100_v37  ;;  %3828 = vmatpush1.bf16.msra.mxu0 %v5404_v26 }
 0x3a4   : > { %v1821_v15 = vpop.xlane.xlu1 %1820  ;;  %v2102_v34 = vmul.f32 %v6735_v0, %v2058_v16  ;;  %v2101_v36 = vmul.f32 %v6732_v46, %v2057_v60  ;;  %3829 = vmatprep.subr.bf16.mxu0 %v5409_v35  ;;  %v5356_v16 = vld [vmem:[#allocation13 + $0x8] ss:$16 sps:$4 sm:$0xff]  }
 0x3a5   : > { %5508 = vrsqrt.f32 %v2027_v63  ;;  %v2028_v24 = vadd.f32 1e-05, %v1980_v5  ;;  %v6757_v38 = vmul.f32 0.00390625, %v1821_v15  ;;  %v1965_v62 = vmul.f32 %v6744_v10, %v6744_v10  ;;  %8467 = vst [vmem:[#allocation25_spill] sm:$0xff] %v6768_v48  ;;  %v5407_v5 = vld [vmem:[#allocation14 + $0x10] ss:$8 sps:$4 sm:$0xff]  }
 0x3a6   : > { %v1915_v44 = vpop.xlane.xlu0 %1914  ;;  %v6771_v50 = vadd.f32 %v6748_v18, %v2102_v34  ;;  %v6777_v60 = vadd.f32 %v6742_v59, %v2101_v36 }
 0x3a7   : > { %v5505_v13 = vpop.eup %5504  ;;  %5510 = vrsqrt.f32 %v2028_v24  ;;  %v1949_v33 = vmul.f32 0.00390625, %v1915_v44  ;;  %v1966_v2 = vmul.f32 %v6757_v38, %v6757_v38  ;;  %v5412_v44 = vld [vmem:[#allocation14 + $0x24] ss:$8 sps:$4 sm:$0xff]   ;;  %3830 = vmatpush1.bf16.msra.mxu0 %v5407_v5 }
 0x3a8   : > { %v1918_v47 = vpop.xlane.xlu1 %1917  ;;  %8468 = vst [vmem:[#allocation26_spill] sm:$0xff] %v6771_v50  ;;  %8469 = vst [vmem:[#allocation27_spill] sm:$0xff] %v6777_v60  ;;  %v2060_v63 = vmul.f32 %v5505_v13, %v1996_v21  ;;  %v6781_v15 = vpack.c.bf16 %v6771_v50, %v6768_v48  ;;  %v2059_v28 = vmul.f32 %v5505_v13, %v1995_v39  ;;  %v5361_v21 = vld [vmem:[#allocation13 + $0x2c] ss:$16 sps:$4 sm:$0xff]   ;;  %3831 = vmatprep.subr.bf16.mxu0 %v5412_v44 }
 0x3a9   : > { %v5507_v3 = vpop.eup %5506  ;;  %v1981_v41 = vsub.f32 %v1949_v33, %v1965_v62  ;;  %v1950_v58 = vmul.f32 0.00390625, %v1918_v47  ;;  %v6787_v36 = vpack.c.bf16 %v6777_v60, %v6774_v54  ;;  %v1999_v13 = vsub.f32 %v6560_v22, %v6711_v7  ;;  %v5364_v5 = vld [vmem:[#allocation13 + $0x4c] ss:$16 sps:$4 sm:$0xff]  }
 0x3aa   : > { %v1824_v37 = vpop.xlane.xlu0 %1823  ;;  %v2062_v24 = vmul.f32 %v5507_v3, %v1998_v57  ;;  %v2061_v19 = vmul.f32 %v5507_v3, %v1997_v29  ;;  %2629 = vmatprep.mubr.bf16.mxu1 %v6781_v15  ;;  %v2104_v33 = vmul.f32 %v6735_v0, %v2060_v63  ;;  %v2103_v39 = vmul.f32 %v6732_v46, %v2059_v28  ;;  %v5410_v3 = vld [vmem:[#allocation14 + $0x20] ss:$8 sps:$4 sm:$0xff]  }
 0x3ab   : > { %v2029_v26 = vadd.f32 1e-05, %v1981_v41  ;;  %v1982_v34 = vsub.f32 %v1950_v58, %v1966_v2  ;;  %v6783_v62 = vmul.f32 0.00390625, %v1824_v37  ;;  %v2000_v57 = vsub.f32 %v6563_v27, %v6711_v7  ;;  %2630 = vmatmul.mubr.bf16.vlgmr.msra.gmra.mrb[64].mxu1 %v6787_v36  ;;  %v5359_v58 = vld [vmem:[#allocation13 + $0x28] ss:$16 sps:$4 sm:$0xff]   ;;  %3832 = vmatpush1.bf16.msra.mxu0 %v5410_v3 }
 0x3ac   : > { %v1827_v35 = vpop.xlane.xlu1 %1826  ;;  %v2106_v47 = vmul.f32 %v6735_v0, %v2062_v24  ;;  %v2105_v29 = vmul.f32 %v6732_v46, %v2061_v19  ;;  %2711 = vmatpush1.bf16.msra.mxu1 %v5356_v16  ;;  %v6804_v24 = vadd.f32 %v6748_v18, %v2104_v33  ;;  %v6810_v16 = vadd.f32 %v6742_v59, %v2103_v39  ;;  %v5415_v19 = vld [vmem:[#allocation14 + $0x34] ss:$8 sps:$4 sm:$0xff]  }
 0x3ad   : > { %5512 = vrsqrt.f32 %v2029_v26  ;;  %v2030_v2 = vadd.f32 1e-05, %v1982_v34  ;;  %v6799_v41 = vmul.f32 0.00390625, %v1827_v35  ;;  %v1967_v63 = vmul.f32 %v6783_v62, %v6783_v62  ;;  %2712 = vmatprep.subr.bf16.mxu1 %v5361_v21  ;;  %3833 = vmatprep.subr.bf16.mxu0 %v5415_v19 }
 0x3ae   : > { %v1921_v37 = vpop.xlane.xlu0 %1920  ;;  %8470 = vst [vmem:[#allocation28_spill] sm:$0xff] %v6804_v24  ;;  %v6807_v22 = vadd.f32 %v6748_v18, %v2106_v47  ;;  %v6813_v28 = vadd.f32 %v6742_v59, %v2105_v29  ;;  %v2001_v26 = vsub.f32 %v6565_v30, %v6724_v25  ;;  %v2002_v34 = vsub.f32 %v6567_v31, %v6724_v25  ;;  %v5413_v30 = vld [vmem:[#allocation14 + $0x30] ss:$8 sps:$4 sm:$0xff]  }
 0x3af   : > { %v5509_v27 = vpop.eup %5508  ;;  %5514 = vrsqrt.f32 %v2030_v2  ;;  %v1951_v7 = vmul.f32 0.00390625, %v1921_v37  ;;  %v1968_v44 = vmul.f32 %v6799_v41, %v6799_v41  ;;  %v5362_v31 = vld [vmem:[#allocation13 + $0x48] ss:$16 sps:$4 sm:$0xff]   ;;  %3834 = vmatpush1.bf16.msra.mxu0 %v5413_v30 }
 0x3b0   : > { %8471 = vst [vmem:[#allocation29_spill] sm:$0xff] %v6807_v22  ;;  %8472 = vst [vmem:[#allocation30_spill] sm:$0xff] %v6813_v28  ;;  %v1924_v35 = vpop.xlane.xlu1 %1923  ;;  %v6823_v21 = vpack.c.bf16 %v6807_v22, %v6804_v24  ;;  %v6827_v29 = vpack.c.bf16 %v6813_v28, %v6810_v16  ;;  %v2064_v2 = vmul.f32 %v5509_v27, %v2000_v57  ;;  %2713 = vmatpush1.bf16.msra.mxu1 %v5359_v58  ;;  %v5418_v22 = vld [vmem:[#allocation14 + $0x44] ss:$8 sps:$4 sm:$0xff]  }
 0x3b1   : > { %v5511_v33 = vpop.eup %5510  ;;  %v1983_v47 = vsub.f32 %v1951_v7, %v1967_v63  ;;  %v1952_v39 = vmul.f32 0.00390625, %v1924_v35  ;;  %v2063_v50 = vmul.f32 %v5509_v27, %v1999_v13  ;;  %2714 = vmatprep.subr.bf16.mxu1 %v5364_v5  ;;  %v5367_v7 = vld [vmem:[#allocation13 + $0x6c] ss:$16 sps:$4 sm:$0xff]   ;;  %v2003_v13 = vsub.f32 %v6584_v55, %v6744_v10  ;;  %3835 = vmatprep.subr.bf16.mxu0 %v5418_v22 }
 0x3b2   : > { %2639 = vmatprep.mubr.bf16.mxu1 %v6823_v21  ;;  %v1830_v25 = vpop.xlane.xlu0 %1829  ;;  %v2066_v37 = vmul.f32 %v5511_v33, %v2002_v34  ;;  %v2065_v60 = vmul.f32 %v5511_v33, %v2001_v26  ;;  %v2108_v35 = vmul.f32 %v6735_v0, %v2064_v2  ;;  %v2004_v27 = vsub.f32 %v6587_v61, %v6744_v10  ;;  %v5416_v26 = vld [vmem:[#allocation14 + $0x40] ss:$8 sps:$4 sm:$0xff]  }
 0x3b3   : > { %v2031_v24 = vadd.f32 1e-05, %v1983_v47  ;;  %v1984_v48 = vsub.f32 %v1952_v39, %v1968_v44  ;;  %v6830_v63 = vmul.f32 0.00390625, %v1830_v25  ;;  %v2107_v58 = vmul.f32 %v6732_v46, %v2063_v50  ;;  %2640 = vmatmul.mubr.bf16.gmra.mrb[68].mxu1 %v6827_v29  ;;  %v5365_v34 = vld [vmem:[#allocation13 + $0x68] ss:$16 sps:$4 sm:$0xff]   ;;  %3836 = vmatpush1.bf16.msra.mxu0 %v5416_v26 }
 0x3b4   : > { %v1833_v57 = vpop.xlane.xlu1 %1832  ;;  %v2110_v3 = vmul.f32 %v6735_v0, %v2066_v37  ;;  %v2109_v28 = vmul.f32 %v6732_v46, %v2065_v60  ;;  %2715 = vmatpush1.bf16.msra.mxu1 %v5362_v31  ;;  %v6846_v44 = vadd.f32 %v6748_v18, %v2108_v35  ;;  %v5421_v47 = vld [vmem:[#allocation14 + $0x54] ss:$8 sps:$4 sm:$0xff]   ;;  %v2005_v39 = vsub.f32 %v6589_v4, %v6757_v38  ;;  %v5419_v4 = vld [vmem:[#allocation14 + $0x50] ss:$8 sps:$4 sm:$0xff]  }
 0x3b5   : > { %5516 = vrsqrt.f32 %v2031_v24  ;;  %v2032_v5 = vadd.f32 1e-05, %v1984_v48  ;;  %v6841_v19 = vmul.f32 0.00390625, %v1833_v57  ;;  %v1969_v50 = vmul.f32 %v6830_v63, %v6830_v63  ;;  %2716 = vmatprep.subr.bf16.mxu1 %v5367_v7  ;;  %v5370_v48 = vld [vmem:[#allocation13 + $0x8c] ss:$16 sps:$4 sm:$0xff]   ;;  %3837 = vmatprep.subr.bf16.mxu0 %v5421_v47 }
 0x3b6   : > { %v1927_v60 = vpop.xlane.xlu0 %1926  ;;  %8473 = vst [vmem:[#allocation31_spill] sm:$0xff] %v6846_v44  ;;  %v6849_v55 = vadd.f32 %v6748_v18, %v2110_v3  ;;  %v6852_v24 = vadd.f32 %v6742_v59, %v2107_v58  ;;  %v6855_v33 = vadd.f32 %v6742_v59, %v2109_v28  ;;  %v2006_v2 = vsub.f32 %v6591_v6, %v6757_v38  ;;  %v5368_v6 = vld [vmem:[#allocation13 + $0x88] ss:$16 sps:$4 sm:$0xff]  }
 0x3b7   : > { %v5513_v61 = vpop.eup %5512  ;;  %5518 = vrsqrt.f32 %v2032_v5  ;;  %v1953_v10 = vmul.f32 0.00390625, %v1927_v60  ;;  %v1970_v22 = vmul.f32 %v6841_v19, %v6841_v19  ;;  %v5424_v5 = vld [vmem:[#allocation14 + $0x64] ss:$8 sps:$4 sm:$0xff]   ;;  %3838 = vmatpush1.bf16.msra.mxu0 %v5419_v4  ;;  %v5427_v4 = vld [vmem:[#allocation14 + $0x74] ss:$8 sps:$4 sm:$0xff]  }
 0x3b8   : > { %8474 = vst [vmem:[#allocation32_spill] sm:$0xff] %v6849_v55  ;;  %8475 = vst [vmem:[#allocation33_spill] sm:$0xff] %v6852_v24  ;;  %v1930_v30 = vpop.xlane.xlu1 %1929  ;;  %v6865_v31 = vpack.c.bf16 %v6849_v55, %v6846_v44  ;;  %v6869_v28 = vpack.c.bf16 %v6855_v33, %v6852_v24  ;;  %v2068_v35 = vmul.f32 %v5513_v61, %v2004_v27  ;;  %2717 = vmatpush1.bf16.msra.mxu1 %v5365_v34 }
 0x3b9   : > { %8476 = vst [vmem:[#allocation34_spill] sm:$0xff] %v6855_v33  ;;  %v5515_v25 = vpop.eup %5514  ;;  %v1985_v37 = vsub.f32 %v1953_v10, %v1969_v50  ;;  %v1954_v7 = vmul.f32 0.00390625, %v1930_v30  ;;  %v2067_v3 = vmul.f32 %v5513_v61, %v2003_v13  ;;  %2718 = vmatprep.subr.bf16.mxu1 %v5370_v48  ;;  %v5373_v10 = vld [vmem:[#allocation13 + $0xac] ss:$16 sps:$4 sm:$0xff]   ;;  %v2007_v13 = vsub.f32 %v6608_v32, %v6783_v62 }
 0x3ba   : > { %2649 = vmatprep.mubr.bf16.mxu1 %v6865_v31  ;;  %v1836_v38 = vpop.xlane.xlu0 %1835  ;;  %v2070_v57 = vmul.f32 %v5515_v25, %v2006_v2  ;;  %v2069_v58 = vmul.f32 %v5515_v25, %v2005_v39  ;;  %v2112_v30 = vmul.f32 %v6735_v0, %v2068_v35  ;;  %v2008_v61 = vsub.f32 %v6611_v40, %v6783_v62  ;;  %v5422_v39 = vld [vmem:[#allocation14 + $0x60] ss:$8 sps:$4 sm:$0xff]  }
 0x3bb   : > { %v2033_v60 = vadd.f32 1e-05, %v1985_v37  ;;  %v1986_v55 = vsub.f32 %v1954_v7, %v1970_v22  ;;  %v6872_v50 = vmul.f32 0.00390625, %v1836_v38  ;;  %v2111_v34 = vmul.f32 %v6732_v46, %v2067_v3  ;;  %2650 = vmatmul.mubr.bf16.gmra.mrb[72].mxu1 %v6869_v28  ;;  %v5371_v2 = vld [vmem:[#allocation13 + $0xa8] ss:$16 sps:$4 sm:$0xff]   ;;  %3839 = vmatprep.subr.bf16.mxu0 %v5424_v5 }
 0x3bc   : > { %v1839_v27 = vpop.xlane.xlu1 %1838  ;;  %v2114_v26 = vmul.f32 %v6735_v0, %v2070_v57  ;;  %v2113_v33 = vmul.f32 %v6732_v46, %v2069_v58  ;;  %2719 = vmatpush1.bf16.msra.mxu1 %v5368_v6  ;;  %v6888_v37 = vadd.f32 %v6748_v18, %v2112_v30  ;;  %v2009_v6 = vsub.f32 %v6613_v43, %v6799_v41  ;;  %v5425_v43 = vld [vmem:[#allocation14 + $0x70] ss:$8 sps:$4 sm:$0xff]  }
 0x3bd   : > { %5520 = vrsqrt.f32 %v2033_v60  ;;  %v2034_v48 = vadd.f32 1e-05, %v1986_v55  ;;  %v6883_v47 = vmul.f32 0.00390625, %v1839_v27  ;;  %v1971_v22 = vmul.f32 %v6872_v50, %v6872_v50  ;;  %2720 = vmatprep.subr.bf16.mxu1 %v5373_v10  ;;  %v5376_v55 = vld [vmem:[#allocation13 + $0xcc] ss:$16 sps:$4 sm:$0xff]   ;;  %3840 = vmatpush1.bf16.msra.mxu0 %v5422_v39 }
 0x3be   : > { %v1933_v25 = vpop.xlane.xlu0 %1932  ;;  %8477 = vst [vmem:[#allocation35_spill] sm:$0xff] %v6888_v37  ;;  %v6891_v32 = vadd.f32 %v6748_v18, %v2114_v26  ;;  %v6894_v7 = vadd.f32 %v6742_v59, %v2111_v34  ;;  %v6897_v35 = vadd.f32 %v6742_v59, %v2113_v33  ;;  %v2010_v38 = vsub.f32 %v6615_v45, %v6799_v41  ;;  %v5374_v45 = vld [vmem:[#allocation13 + $0xc8] ss:$16 sps:$4 sm:$0xff]  }
 0x3bf   : > { %v5517_v40 = vpop.eup %5516  ;;  %5522 = vrsqrt.f32 %v2034_v48  ;;  %v1955_v62 = vmul.f32 0.00390625, %v1933_v25  ;;  %v1972_v57 = vmul.f32 %v6883_v47, %v6883_v47  ;;  %3841 = vmatprep.subr.bf16.mxu0 %v5427_v4 }
 0x3c0   : > { %8478 = vst [vmem:[#allocation36_spill] sm:$0xff] %v6891_v32  ;;  %8479 = vst [vmem:[#allocation37_spill] sm:$0xff] %v6894_v7  ;;  %v1936_v3 = vpop.xlane.xlu1 %1935  ;;  %v6907_v58 = vpack.c.bf16 %v6891_v32, %v6888_v37  ;;  %v6911_v33 = vpack.c.bf16 %v6897_v35, %v6894_v7  ;;  %v2072_v30 = vmul.f32 %v5517_v40, %v2008_v61  ;;  %2721 = vmatpush1.bf16.msra.mxu1 %v5371_v2 }
 0x3c1   : > { %8480 = vst [vmem:[#allocation38_spill] sm:$0xff] %v6897_v35  ;;  %v5519_v5 = vpop.eup %5518  ;;  %v1987_v60 = vsub.f32 %v1955_v62, %v1971_v22  ;;  %v1956_v10 = vmul.f32 0.00390625, %v1936_v3  ;;  %v2071_v26 = vmul.f32 %v5517_v40, %v2007_v13  ;;  %2722 = vmatprep.subr.bf16.mxu1 %v5376_v55  ;;  %v5379_v62 = vld [vmem:[#allocation13 + $0xec] ss:$16 sps:$4 sm:$0xff]   ;;  %v2011_v13 = vsub.f32 %v6632_v12, %v6830_v63 }
 0x3c2   : > { %2659 = vmatprep.mubr.bf16.mxu1 %v6907_v58  ;;  %v1842_v41 = vpop.xlane.xlu0 %1841  ;;  %v2074_v27 = vmul.f32 %v5519_v5, %v2010_v38  ;;  %v2073_v34 = vmul.f32 %v5519_v5, %v2009_v6  ;;  %v2116_v3 = vmul.f32 %v6735_v0, %v2072_v30  ;;  %v2012_v40 = vsub.f32 %v6635_v17, %v6830_v63  ;;  %v5377_v6 = vld [vmem:[#allocation13 + $0xe8] ss:$16 sps:$4 sm:$0xff]  }
 0x3c3   : > { %v2035_v48 = vadd.f32 1e-05, %v1987_v60  ;;  %v1988_v25 = vsub.f32 %v1956_v10, %v1972_v57  ;;  %v6914_v22 = vmul.f32 0.00390625, %v1842_v41  ;;  %v2115_v2 = vmul.f32 %v6732_v46, %v2071_v26  ;;  %2660 = vmatmul.mubr.bf16.gmra.mrb[76].mxu1 %v6911_v33  ;;  %3842 = vmatpush1.bf16.msra.mxu0 %v5425_v43  ;;  %v5382_v60 = vld [vmem:[#allocation13 + $0x10c] ss:$16 sps:$4 sm:$0xff]  }
 0x3c4   : > { %v1845_v61 = vpop.xlane.xlu1 %1844  ;;  %v2118_v39 = vmul.f32 %v6735_v0, %v2074_v27  ;;  %v2117_v32 = vmul.f32 %v6732_v46, %v2073_v34  ;;  %2723 = vmatpush1.bf16.msra.mxu1 %v5374_v45  ;;  %v6930_v5 = vadd.f32 %v6748_v18, %v2116_v3  ;;  %v2013_v43 = vsub.f32 %v6637_v20, %v6841_v19  ;;  %v5380_v20 = vld [vmem:[#allocation13 + $0x108] ss:$16 sps:$4 sm:$0xff]  }
 0x3c5   : > { %5524 = vrsqrt.f32 %v2035_v48  ;;  %v2036_v55 = vadd.f32 1e-05, %v1988_v25  ;;  %v6925_v4 = vmul.f32 0.00390625, %v1845_v61  ;;  %v1973_v38 = vmul.f32 %v6914_v22, %v6914_v22  ;;  %2724 = vmatprep.subr.bf16.mxu1 %v5379_v62 }
 0x3c6   : > { %v1939_v57 = vpop.xlane.xlu0 %1938  ;;  %8481 = vst [vmem:[#allocation39_spill] sm:$0xff] %v6930_v5  ;;  %v6933_v12 = vadd.f32 %v6748_v18, %v2118_v39  ;;  %v6936_v10 = vadd.f32 %v6742_v59, %v2115_v2  ;;  %v6939_v30 = vadd.f32 %v6742_v59, %v2117_v32  ;;  %v2014_v45 = vsub.f32 %v6639_v23, %v6841_v19  ;;  %v5385_v2 = vld [vmem:[#allocation13 + $0x12c] ss:$16 sps:$4 sm:$0xff]  }
 0x3c7   : > { %v5521_v17 = vpop.eup %5520  ;;  %5526 = vrsqrt.f32 %v2036_v55  ;;  %v1957_v63 = vmul.f32 0.00390625, %v1939_v57  ;;  %v1974_v41 = vmul.f32 %v6925_v4, %v6925_v4 }
 0x3c8   : > { %8482 = vst [vmem:[#allocation40_spill] sm:$0xff] %v6933_v12  ;;  %8483 = vst [vmem:[#allocation41_spill] sm:$0xff] %v6936_v10  ;;  %v1942_v27 = vpop.xlane.xlu1 %1941  ;;  %v6949_v26 = vpack.c.bf16 %v6933_v12, %v6930_v5  ;;  %v6953_v32 = vpack.c.bf16 %v6939_v30, %v6936_v10  ;;  %v2076_v62 = vmul.f32 %v5521_v17, %v2012_v40  ;;  %2725 = vmatpush1.bf16.msra.mxu1 %v5377_v6 }
 0x3c9   : > { %8484 = vst [vmem:[#allocation42_spill] sm:$0xff] %v6939_v30  ;;  %v5523_v34 = vpop.eup %5522  ;;  %v1989_v48 = vsub.f32 %v1957_v63, %v1973_v38  ;;  %v1958_v25 = vmul.f32 0.00390625, %v1942_v27  ;;  %v2075_v19 = vmul.f32 %v5521_v17, %v2011_v13  ;;  %2726 = vmatprep.subr.bf16.mxu1 %v5382_v60  ;;  %v2015_v40 = vsub.f32 %v6656_v56, %v6872_v50  ;;  %v5383_v17 = vld [vmem:[#allocation13 + $0x128] ss:$16 sps:$4 sm:$0xff]   ;;  %v5388_v27 = vld [vmem:[#allocation13 + $0x14c] ss:$16 sps:$4 sm:$0xff]  }
 0x3ca   : > { %2669 = vmatprep.mubr.bf16.mxu1 %v6949_v26  ;;  %v2078_v23 = vmul.f32 %v5523_v34, %v2014_v45  ;;  %v2077_v3 = vmul.f32 %v5523_v34, %v2013_v43  ;;  %v2120_v55 = vmul.f32 %v6735_v0, %v2076_v62  ;;  %v2016_v13 = vsub.f32 %v6659_v1, %v6872_v50  ;;  %v5457_v30 = vld [vmem:[#allocation14 + $0x114] ss:$8 sps:$4 sm:$0xff]  }
 0x3cb   : > { %v2037_v61 = vadd.f32 1e-05, %v1989_v48  ;;  %v1990_v39 = vsub.f32 %v1958_v25, %v1974_v41  ;;  %v2119_v57 = vmul.f32 %v6732_v46, %v2075_v19  ;;  %2670 = vmatmul.mubr.bf16.gmra.mrb[80].mxu1 %v6953_v32  ;;  %v2017_v56 = vsub.f32 %v6661_v8, %v6883_v47  ;;  %v5386_v8 = vld [vmem:[#allocation13 + $0x148] ss:$16 sps:$4 sm:$0xff]  }
 0x3cc   : > { %v2122_v38 = vmul.f32 %v6735_v0, %v2078_v23  ;;  %v2121_v63 = vmul.f32 %v6732_v46, %v2077_v3  ;;  %2727 = vmatpush1.bf16.msra.mxu1 %v5380_v20  ;;  %v6966_v60 = vadd.f32 %v6748_v18, %v2120_v55  ;;  %v2018_v50 = vsub.f32 %v6663_v9, %v6883_v47  ;;  %v5391_v9 = vld [vmem:[#allocation13 + $0x16c] ss:$16 sps:$4 sm:$0xff]  }
 0x3cd   : > { %5528 = vrsqrt.f32 %v2037_v61  ;;  %v2038_v6 = vadd.f32 1e-05, %v1990_v39  ;;  %2728 = vmatprep.subr.bf16.mxu1 %v5385_v2  ;;  %v6977_v1 = vadd.f32 %v6742_v59, %v2119_v57  ;;  %v2019_v2 = vsub.f32 %v6680_v42, %v6914_v22 }
 0x3ce   : > { %8485 = vst [vmem:[#allocation43_spill] sm:$0xff] %v6966_v60  ;;  %v6969_v43 = vadd.f32 %v6748_v18, %v2122_v38  ;;  %v6972_v45 = vadd.f32 %v6742_v59, %v2121_v63  ;;  %v2020_v55 = vsub.f32 %v6683_v49, %v6914_v22  ;;  %v5389_v38 = vld [vmem:[#allocation13 + $0x168] ss:$16 sps:$4 sm:$0xff]   ;;  %v2021_v42 = vsub.f32 %v6685_v52, %v6925_v4 }
 0x3cf   : > { %v5525_v41 = vpop.eup %5524  ;;  %5530 = vrsqrt.f32 %v2038_v6  ;;  %8488 = vst [vmem:[#allocation46_spill] sm:$0xff] %v6977_v1  ;;  %v2022_v49 = vsub.f32 %v6687_v53, %v6925_v4  ;;  %v5392_v52 = vld [vmem:[#allocation13 + $0x188] ss:$16 sps:$4 sm:$0xff]   ;;  %v5397_v53 = vld [vmem:[#allocation13 + $0x1ac] ss:$16 sps:$4 sm:$0xff]  }
 0x3d0   : > { %8486 = vst [vmem:[#allocation44_spill] sm:$0xff] %v6969_v43  ;;  %8487 = vst [vmem:[#allocation45_spill] sm:$0xff] %v6972_v45  ;;  %v6983_v34 = vpack.c.bf16 %v6969_v43, %v6966_v60  ;;  %v2080_v48 = vmul.f32 %v5525_v41, %v2016_v13  ;;  %v2079_v25 = vmul.f32 %v5525_v41, %v2015_v40  ;;  %2729 = vmatpush1.bf16.msra.mxu1 %v5383_v17  ;;  %v5394_v13 = vld [vmem:[#allocation13 + $0x18c] ss:$16 sps:$4 sm:$0xff]  }
 0x3d1   : > { %v5527_v62 = vpop.eup %5526  ;;  %v6987_v20 = vpack.c.bf16 %v6972_v45, %v6977_v1  ;;  %2730 = vmatprep.subr.bf16.mxu1 %v5388_v27 }
 0x3d2   : > { %2679 = vmatprep.mubr.bf16.mxu1 %v6983_v34  ;;  %v2082_v23 = vmul.f32 %v5527_v62, %v2018_v50  ;;  %v2124_v19 = vmul.f32 %v6735_v0, %v2080_v48  ;;  %v2081_v3 = vmul.f32 %v5527_v62, %v2017_v56  ;;  %v2123_v47 = vmul.f32 %v6732_v46, %v2079_v25 }
 0x3d3   : > { %2680 = vmatmul.mubr.bf16.gmra.mrb[84].mxu1 %v6987_v20 }
 0x3d4   : > { %v2126_v61 = vmul.f32 %v6735_v0, %v2082_v23  ;;  %v2125_v39 = vmul.f32 %v6732_v46, %v2081_v3  ;;  %2731 = vmatpush1.bf16.msra.mxu1 %v5386_v8  ;;  %v7000_v57 = vadd.f32 %v6748_v18, %v2124_v19  ;;  %v7011_v17 = vadd.f32 %v6742_v59, %v2123_v47  ;;  %v5395_v19 = vld [vmem:[#allocation13 + $0x1a8] ss:$16 sps:$4 sm:$0xff]  }
 0x3d5   : > { %2732 = vmatprep.subr.bf16.mxu1 %v5391_v9 }
 0x3d6   : > { %8489 = vst [vmem:[#allocation47_spill] sm:$0xff] %v7000_v57  ;;  %v7003_v63 = vadd.f32 %v6748_v18, %v2126_v61  ;;  %v7006_v40 = vadd.f32 %v6742_v59, %v2125_v39  ;;  %8492 = vst [vmem:[#allocation50_spill] sm:$0xff] %v7011_v17  ;;  %v5400_v61 = vld [vmem:[#allocation13 + $0x1cc] ss:$16 sps:$4 sm:$0xff]  }
 0x3d7   : > { %v5529_v6 = vpop.eup %5528 }
 0x3d8   : > { %8490 = vst [vmem:[#allocation48_spill] sm:$0xff] %v7003_v63  ;;  %8491 = vst [vmem:[#allocation49_spill] sm:$0xff] %v7006_v40  ;;  %v7017_v22 = vpack.c.bf16 %v7003_v63, %v7000_v57  ;;  %v2084_v41 = vmul.f32 %v5529_v6, %v2020_v55  ;;  %v2083_v56 = vmul.f32 %v5529_v6, %v2019_v2  ;;  %2733 = vmatpush1.bf16.msra.mxu1 %v5389_v38  ;;  %v5398_v2 = vld [vmem:[#allocation13 + $0x1c8] ss:$16 sps:$4 sm:$0xff]  }
 0x3d9   : > { %v5531_v27 = vpop.eup %5530  ;;  %v7021_v50 = vpack.c.bf16 %v7006_v40, %v7011_v17  ;;  %2734 = vmatprep.subr.bf16.mxu1 %v5394_v13  ;;  %v5401_v55 = vld [vmem:[#allocation13 + $0x1e8] ss:$16 sps:$4 sm:$0xff]  }
 0x3da   : > { %2689 = vmatprep.mubr.bf16.mxu1 %v7017_v22  ;;  %v2086_v48 = vmul.f32 %v5531_v27, %v2022_v49  ;;  %v2128_v25 = vmul.f32 %v6735_v0, %v2084_v41  ;;  %v2085_v62 = vmul.f32 %v5531_v27, %v2021_v42  ;;  %v2127_v4 = vmul.f32 %v6732_v46, %v2083_v56  ;;  %v5428_v38 = vld [vmem:[#allocation14 + $0x80] ss:$8 sps:$4 sm:$0xff]   ;;  %v5443_v6 = vld [vmem:[#allocation14 + $0xd0] ss:$8 sps:$4 sm:$0xff]   ;;  %v5451_v42 = vld [vmem:[#allocation14 + $0xf4] ss:$8 sps:$4 sm:$0xff]  }
 0x3db   : > { %2690 = vmatmul.mubr.bf16.gmra.mrb[88].mxu1 %v7021_v50  ;;  %v5449_v13 = vld [vmem:[#allocation14 + $0xf0] ss:$8 sps:$4 sm:$0xff]   ;;  %v7062_v49 = vld [vmem:[%s8497_s24] sm:$0xf]  ;;  %s5920_s24 = scalar_lea.vmem %s8312_s7, 4096 }
 0x3dc   : > { %v2130_v8 = vmul.f32 %v6735_v0, %v2086_v48  ;;  %v2129_v23 = vmul.f32 %v6732_v46, %v2085_v62  ;;  %2735 = vmatpush1.bf16.msra.mxu1 %v5392_v52  ;;  %v7030_v3 = vadd.f32 %v6748_v18, %v2128_v25  ;;  %v7039_v39 = vadd.f32 %v6742_v59, %v2127_v4  ;;  %p5921_p4 = scmp.ne.s32.totalorder %s8312_s7, %s5920_s24 }
 0x3dd   : > { %2736 = vmatprep.subr.bf16.mxu1 %v5397_v53  ;;  %v7070_v41 = vrot.slane %v7062_v49, %v6717_v14 }
 0x3de   : > { %8493 = vst [vmem:[#allocation51_spill] sm:$0xff] %v7030_v3  ;;  %v7033_v9 = vadd.f32 %v6748_v18, %v2130_v8  ;;  %v7036_v47 = vadd.f32 %v6742_v59, %v2129_v23  ;;  %8496 = vst [vmem:[#allocation54_spill] sm:$0xff] %v7039_v39  ;;  %v5403_v18 = vld [vmem:[#allocation13 + $0x1ec] ss:$16 sps:$4 sm:$0xff]   ;;  %p5922_p0 = pnand %p5921_p4, %p8535_p9 }
 0x3df   : > { %v5430_v59 = vld [vmem:[#allocation14 + $0x84] ss:$8 sps:$4 sm:$0xff]  }
 0x3e0   : > { %8494 = vst [vmem:[#allocation52_spill] sm:$0xff] %v7033_v9  ;;  %8495 = vst [vmem:[#allocation53_spill] sm:$0xff] %v7036_v47  ;;  %v2190_v46 = vpack.c.bf16 %v7033_v9, %v7030_v3  ;;  %v2189_v0 = vpack.c.bf16 %v7036_v47, %v7039_v39  ;;  %2737 = vmatpush1.bf16.msra.mxu1 %v5395_v19  ;;  %3843 = vmatprep.subr.bf16.mxu0 %v5430_v59  ;;  %p5923_p7 = pneg %p5922_p0 }
 0x3e1   : > { %2738 = vmatprep.subr.bf16.mxu1 %v5400_v61  ;;  %3844 = vmatpush1.bf16.msra.mxu0 %v5428_v38 }
 0x3e2   : > { %2699 = vmatprep.mubr.bf16.mxu1 %v2190_v46 }
 0x3e3   : > { %2700 = vmatmul.mubr.bf16.gmra.mrb[92].mxu1 %v2189_v0 }
 0x3e4   : > { %2739 = vmatpush1.bf16.msra.mxu1 %v5398_v2  ;;  %2742 = vmatprep.mubr.bf16.mxu1 %v6781_v15  ;;  %v5433_v15 = vld [vmem:[#allocation14 + $0x94] ss:$8 sps:$4 sm:$0xff]  }
 0x3e5   : > { %2740 = vmatprep.subr.bf16.mxu1 %v5403_v18  ;;  %3845 = vmatprep.subr.bf16.mxu0 %v5433_v15 }
 0x3e8   : > { %2741 = vmatpush1.bf16.msra.mxu1 %v5401_v55 }
 0x3eb   : > { %2743 = vmatmul.mubr.bf16.vlgmr.msra.gmra.mrb[96].mxu1 %v6787_v36  ;;  %v5431_v36 = vld [vmem:[#allocation14 + $0x90] ss:$8 sps:$4 sm:$0xff]  }
 0x3ec   : > { %2752 = vmatprep.mubr.bf16.mxu1 %v6823_v21  ;;  %3846 = vmatpush1.bf16.msra.mxu0 %v5431_v36  ;;  %v5436_v21 = vld [vmem:[#allocation14 + $0xa4] ss:$8 sps:$4 sm:$0xff]  }
 0x3ed   : > { %3847 = vmatprep.subr.bf16.mxu0 %v5436_v21 }
 0x3f3   : > { %2753 = vmatmul.mubr.bf16.gmra.mrb[100].mxu1 %v6827_v29  ;;  %v5434_v29 = vld [vmem:[#allocation14 + $0xa0] ss:$8 sps:$4 sm:$0xff]  }
 0x3f4   : > { %2762 = vmatprep.mubr.bf16.mxu1 %v6865_v31  ;;  %3848 = vmatpush1.bf16.msra.mxu0 %v5434_v29  ;;  %v5439_v31 = vld [vmem:[#allocation14 + $0xb4] ss:$8 sps:$4 sm:$0xff]  }
 0x3f5   : > { %3849 = vmatprep.subr.bf16.mxu0 %v5439_v31 }
 0x3fb   : > { %2763 = vmatmul.mubr.bf16.gmra.mrb[104].mxu1 %v6869_v28  ;;  %v5437_v28 = vld [vmem:[#allocation14 + $0xb0] ss:$8 sps:$4 sm:$0xff]  }
 0x3fc   : > { %2772 = vmatprep.mubr.bf16.mxu1 %v6907_v58  ;;  %3850 = vmatpush1.bf16.msra.mxu0 %v5437_v28  ;;  %v5442_v58 = vld [vmem:[#allocation14 + $0xc4] ss:$8 sps:$4 sm:$0xff]  }
 0x3fd   : > { %3851 = vmatprep.subr.bf16.mxu0 %v5442_v58 }
 0x403   : > { %2773 = vmatmul.mubr.bf16.gmra.mrb[108].mxu1 %v6911_v33  ;;  %v5440_v33 = vld [vmem:[#allocation14 + $0xc0] ss:$8 sps:$4 sm:$0xff]  }
 0x404   : > { %2782 = vmatprep.mubr.bf16.mxu1 %v6949_v26  ;;  %3852 = vmatpush1.bf16.msra.mxu0 %v5440_v33  ;;  %v5445_v26 = vld [vmem:[#allocation14 + $0xd4] ss:$8 sps:$4 sm:$0xff]   ;;  %v2267_v33 = vsub.s32 2, %v6707_v51 }
 0x405   : > { %3853 = vmatprep.subr.bf16.mxu0 %v5445_v26 }
 0x408   : > { %3854 = vmatpush1.bf16.msra.mxu0 %v5443_v6 }
 0x40b   : > { %2783 = vmatmul.mubr.bf16.gmra.mrb[112].mxu1 %v6953_v32  ;;  %v5448_v32 = vld [vmem:[#allocation14 + $0xe4] ss:$8 sps:$4 sm:$0xff]  }
 0x40c   : > { %2792 = vmatprep.mubr.bf16.mxu1 %v6983_v34  ;;  %v5446_v34 = vld [vmem:[#allocation14 + $0xe0] ss:$8 sps:$4 sm:$0xff]   ;;  %3855 = vmatprep.subr.bf16.mxu0 %v5448_v32 }
 0x40d   : > { %3856 = vmatpush1.bf16.msra.mxu0 %v5446_v34 }
 0x40e   : > { %3857 = vmatprep.subr.bf16.mxu0 %v5451_v42 }
 0x411   : > { %3858 = vmatpush1.bf16.msra.mxu0 %v5449_v13 }
 0x413   : > { %2793 = vmatmul.mubr.bf16.gmra.mrb[116].mxu1 %v6987_v20  ;;  %v5454_v20 = vld [vmem:[#allocation14 + $0x104] ss:$8 sps:$4 sm:$0xff]  }
 0x414   : > { %2802 = vmatprep.mubr.bf16.mxu1 %v7017_v22  ;;  %3940 = vmatprep.subr.bf16.mxu0 %v5454_v20  ;;  %v7066_v22 = vrot.slane %v7062_v49, %v6714_v11 }
 0x41b   : > { %2803 = vmatmul.mubr.bf16.gmra.mrb[120].mxu1 %v7021_v50 }
 0x41c   : > { %2812 = vmatprep.mubr.bf16.mxu1 %v2190_v46 }
 0x423   : > { %2813 = vmatmul.mubr.bf16.gmra.mrb[124].mxu1 %v2189_v0 }
 0x47e   : > { %v2631_v56 = vpop.f32.mrb[64].mxu1 }
 0x47f   : > { %v7073_v27 = vadd.f32 %v2631_v56, %v7066_v22  ;;  %v2633_v50 = vpop.f32.mrb[65].mxu1 }
 0x480   : > { %v7076_v52 = vadd.f32 %v2633_v50, %v7070_v41  ;;  %v2635_v48 = vpop.f32.mrb[66].mxu1 }
 0x481   : > { %v2823_v25 = vmul.f32 %v7073_v27, %v7073_v27  ;;  %v7081_v62 = vadd.f32 %v2635_v48, %v7066_v22  ;;  %v2637_v53 = vpop.f32.mrb[67].mxu1 }
 0x482   : > { %v2824_v4 = vmul.f32 %v7076_v52, %v7076_v52  ;;  %v7086_v8 = vadd.f32 %v2637_v53, %v7070_v41 }
 0x483   : > { %v2887_v23 = vmul.f32 %v2823_v25, %v7073_v27  ;;  %v2827_v19 = vmul.f32 %v7081_v62, %v7081_v62 }
 0x484   : > { %v2888_v61 = vmul.f32 %v2824_v4, %v7076_v52  ;;  %v2828_v46 = vmul.f32 %v7086_v8, %v7086_v8 }
 0x485   : > { %v2951_v0 = vmul.f32 0.044715, %v2887_v23  ;;  %v2891_v2 = vmul.f32 %v2827_v19, %v7081_v62 }
 0x486   : > { %v2952_v18 = vmul.f32 0.044715, %v2888_v61  ;;  %v2892_v55 = vmul.f32 %v2828_v46, %v7086_v8  ;;  %v2641_v59 = vpop.f32.mrb[68].mxu1 }
 0x487   : > { %v3015_v38 = vadd.f32 %v2951_v0, %v7073_v27  ;;  %v2955_v15 = vmul.f32 0.044715, %v2891_v2  ;;  %v7098_v36 = vadd.f32 %v2641_v59, %v7066_v22  ;;  %v2643_v21 = vpop.f32.mrb[69].mxu1 }
 0x488   : > { %v3016_v29 = vadd.f32 %v2952_v18, %v7076_v52  ;;  %v2956_v31 = vmul.f32 0.044715, %v2892_v55  ;;  %v7102_v28 = vadd.f32 %v2643_v21, %v7070_v41  ;;  %v2645_v58 = vpop.f32.mrb[70].mxu1  ;;  %v7126_v55 = vrot.slane %v7062_v49, %v2267_v33 }
 0x489   : > { %v3079_v26 = vmul.f32 0.7978846, %v3015_v38  ;;  %v3019_v6 = vadd.f32 %v2955_v15, %v7081_v62  ;;  %v2831_v32 = vmul.f32 %v7098_v36, %v7098_v36  ;;  %v7109_v34 = vadd.f32 %v2645_v58, %v7066_v22  ;;  %v2647_v42 = vpop.f32.mrb[71].mxu1 }
 0x48a   : > { %v3080_v13 = vmul.f32 0.7978846, %v3016_v29  ;;  %v3020_v20 = vadd.f32 %v2956_v31, %v7086_v8  ;;  %v2832_v56 = vmul.f32 %v7102_v28, %v7102_v28  ;;  %v7115_v50 = vadd.f32 %v2647_v42, %v7070_v41 }
 0x48b   : > { %5532 = vtanh.f32 %v3079_v26  ;;  %v3083_v48 = vmul.f32 0.7978846, %v3019_v6  ;;  %v2895_v25 = vmul.f32 %v2831_v32, %v7098_v36  ;;  %v2835_v53 = vmul.f32 %v7109_v34, %v7109_v34 }
 0x48c   : > { %5534 = vtanh.f32 %v3080_v13  ;;  %v3084_v4 = vmul.f32 0.7978846, %v3020_v20  ;;  %v2896_v23 = vmul.f32 %v2832_v56, %v7102_v28  ;;  %v2836_v19 = vmul.f32 %v7115_v50, %v7115_v50 }
 0x48d   : > { %5536 = vtanh.f32 %v3083_v48  ;;  %v2959_v61 = vmul.f32 0.044715, %v2895_v25  ;;  %v2899_v46 = vmul.f32 %v2835_v53, %v7109_v34  ;;  %v2271_v29 = vsub.s32 3, %v6707_v51 }
 0x48e   : > { %v2960_v0 = vmul.f32 0.044715, %v2896_v23  ;;  %v2900_v2 = vmul.f32 %v2836_v19, %v7115_v50  ;;  %v2651_v18 = vpop.f32.mrb[72].mxu1  ;;  %5538 = vtanh.f32 %v3084_v4 }
 0x48f   : > { %v3023_v59 = vadd.f32 %v2959_v61, %v7098_v36  ;;  %v2963_v38 = vmul.f32 0.044715, %v2899_v46  ;;  %v7130_v15 = vadd.f32 %v2651_v18, %v7066_v22  ;;  %v2653_v21 = vpop.f32.mrb[73].mxu1 }
 0x490   : > { %v3024_v31 = vadd.f32 %v2960_v0, %v7102_v28  ;;  %v2964_v58 = vmul.f32 0.044715, %v2900_v2  ;;  %v7135_v26 = vadd.f32 %v2653_v21, %v7070_v41  ;;  %v2655_v6 = vpop.f32.mrb[74].mxu1 }
 0x491   : > { %v3087_v32 = vmul.f32 0.7978846, %v3023_v59  ;;  %v3027_v33 = vadd.f32 %v2963_v38, %v7109_v34  ;;  %v2839_v42 = vmul.f32 %v7130_v15, %v7130_v15  ;;  %v7141_v13 = vadd.f32 %v2655_v6, %v7066_v22  ;;  %v2657_v20 = vpop.f32.mrb[75].mxu1 }
 0x492   : > { %v3088_v56 = vmul.f32 0.7978846, %v3024_v31  ;;  %v3028_v51 = vadd.f32 %v2964_v58, %v7115_v50  ;;  %v2840_v48 = vmul.f32 %v7135_v26, %v7135_v26  ;;  %v7147_v25 = vadd.f32 %v2657_v20, %v7070_v41 }
 0x493   : > { %5540 = vtanh.f32 %v3087_v32  ;;  %v3091_v53 = vmul.f32 0.7978846, %v3027_v33  ;;  %v2903_v4 = vmul.f32 %v2839_v42, %v7130_v15  ;;  %v2843_v23 = vmul.f32 %v7141_v13, %v7141_v13 }
 0x494   : > { %5542 = vtanh.f32 %v3088_v56  ;;  %v3092_v19 = vmul.f32 0.7978846, %v3028_v51  ;;  %v2904_v61 = vmul.f32 %v2840_v48, %v7135_v26  ;;  %v2844_v46 = vmul.f32 %v7147_v25, %v7147_v25 }
 0x495   : > { %v5533_v0 = vpop.eup %5532  ;;  %5544 = vtanh.f32 %v3091_v53  ;;  %v2967_v2 = vmul.f32 0.044715, %v2903_v4  ;;  %v2907_v18 = vmul.f32 %v2843_v23, %v7141_v13  ;;  %v7157_v59 = vrot.slane %v7062_v49, %v2271_v29 }
 0x496   : > { %v5535_v38 = vpop.eup %5534  ;;  %v3207_v21 = vadd.f32 1.0, %v5533_v0  ;;  %5546 = vtanh.f32 %v3092_v19  ;;  %v2968_v31 = vmul.f32 0.044715, %v2904_v61  ;;  %v2908_v58 = vmul.f32 %v2844_v46, %v7147_v25  ;;  %v2661_v6 = vpop.f32.mrb[76].mxu1 }
 0x497   : > { %v5537_v32 = vpop.eup %5536  ;;  %v3031_v33 = vadd.f32 %v2967_v2, %v7130_v15  ;;  %v2971_v42 = vmul.f32 0.044715, %v2907_v18  ;;  %v7162_v20 = vadd.f32 %v2661_v6, %v7066_v22  ;;  %v2663_v56 = vpop.f32.mrb[77].mxu1  ;;  %v3208_v51 = vadd.f32 1.0, %v5535_v38 }
 0x498   : > { %v3271_v48 = vmul.f32 0.5, %v3207_v21  ;;  %v3211_v53 = vadd.f32 1.0, %v5537_v32  ;;  %v3032_v49 = vadd.f32 %v2968_v31, %v7135_v26  ;;  %v2972_v29 = vmul.f32 0.044715, %v2908_v58  ;;  %v2665_v4 = vpop.f32.mrb[78].mxu1  ;;  %v5539_v2 = vpop.eup %5538 }
 0x499   : > { %v3095_v23 = vmul.f32 0.7978846, %v3031_v33  ;;  %v3035_v19 = vadd.f32 %v2971_v42, %v7141_v13  ;;  %v2847_v61 = vmul.f32 %v7162_v20, %v7162_v20  ;;  %v7169_v46 = vadd.f32 %v2663_v56, %v7070_v41  ;;  %v2667_v0 = vpop.f32.mrb[79].mxu1 }
 0x49a   : > { %v7172_v18 = vmul.f32 %v3271_v48, %v7073_v27  ;;  %v3275_v38 = vmul.f32 0.5, %v3211_v53  ;;  %v3096_v21 = vmul.f32 0.7978846, %v3032_v49  ;;  %v3036_v31 = vadd.f32 %v2972_v29, %v7147_v25 }
 0x49b   : > { %5548 = vtanh.f32 %v3095_v23  ;;  %v3099_v58 = vmul.f32 0.7978846, %v3035_v19  ;;  %v2911_v6 = vmul.f32 %v2847_v61, %v7162_v20  ;;  %v2848_v32 = vmul.f32 %v7169_v46, %v7169_v46 }
 0x49c   : > { %v7179_v33 = vmul.f32 %v3275_v38, %v7081_v62  ;;  %5550 = vtanh.f32 %v3096_v21  ;;  %v3100_v42 = vmul.f32 0.7978846, %v3036_v31  ;;  %v7182_v56 = vadd.f32 %v2665_v4, %v7066_v22 }
 0x49d   : > { %v7184_v27 = vpop.eup %5540  ;;  %5552 = vtanh.f32 %v3099_v58  ;;  %v2975_v48 = vmul.f32 0.044715, %v2911_v6  ;;  %v2912_v53 = vmul.f32 %v2848_v32, %v7169_v46  ;;  %v7188_v49 = vadd.f32 %v2667_v0, %v7070_v41 }
 0x49e   : > { %v7190_v29 = vpop.eup %5542  ;;  %5554 = vtanh.f32 %v3100_v42  ;;  %v2851_v23 = vmul.f32 %v7182_v56, %v7182_v56  ;;  %v2671_v4 = vpop.f32.mrb[80].mxu1  ;;  %v3212_v19 = vadd.f32 1.0, %v5539_v2  ;;  %v3272_v62 = vmul.f32 0.5, %v3208_v51 }
 0x49f   : > { %v7196_v61 = vpop.eup %5544  ;;  %v3039_v38 = vadd.f32 %v2975_v48, %v7162_v20  ;;  %v2976_v21 = vmul.f32 0.044715, %v2912_v53  ;;  %v2852_v0 = vmul.f32 %v7188_v49, %v7188_v49  ;;  %v7202_v31 = vadd.f32 %v2671_v4, %v7066_v22  ;;  %v2673_v58 = vpop.f32.mrb[81].mxu1 }
 0x4a0   : > { %v7204_v6 = vpop.eup %5546  ;;  %v2915_v32 = vmul.f32 %v2851_v23, %v7182_v56  ;;  %v7208_v42 = vadd.f32 %v2673_v58, %v7070_v41  ;;  %v2675_v2 = vpop.f32.mrb[82].mxu1  ;;  %v3276_v9 = vmul.f32 0.5, %v3212_v19 }
 0x4a1   : > { %v3103_v47 = vmul.f32 0.7978846, %v3039_v38  ;;  %v3040_v48 = vadd.f32 %v2976_v21, %v7169_v46  ;;  %v2916_v53 = vmul.f32 %v2852_v0, %v7188_v49  ;;  %v2855_v4 = vmul.f32 %v7202_v31, %v7202_v31  ;;  %v2677_v3 = vpop.f32.mrb[83].mxu1 }
 0x4a2   : > { %v2979_v39 = vmul.f32 0.044715, %v2915_v32  ;;  %v2856_v63 = vmul.f32 %v7208_v42, %v7208_v42  ;;  %v7217_v23 = vadd.f32 %v2675_v2, %v7066_v22  ;;  %v7220_v58 = vadd.f32 %v2677_v3, %v7070_v41 }
 0x4a3   : > { %5556 = vtanh.f32 %v3103_v47  ;;  %v3104_v51 = vmul.f32 0.7978846, %v3040_v48  ;;  %v2980_v19 = vmul.f32 0.044715, %v2916_v53  ;;  %v2919_v38 = vmul.f32 %v2855_v4, %v7202_v31 }
 0x4a4   : > { %v3043_v21 = vadd.f32 %v2979_v39, %v7182_v56  ;;  %v2920_v0 = vmul.f32 %v2856_v63, %v7208_v42  ;;  %v2859_v32 = vmul.f32 %v7217_v23, %v7217_v23  ;;  %v2860_v40 = vmul.f32 %v7220_v58, %v7220_v58 }
 0x4a5   : > { %v7229_v2 = vpop.eup %5548  ;;  %5558 = vtanh.f32 %v3104_v51  ;;  %v3044_v3 = vadd.f32 %v2980_v19, %v7188_v49  ;;  %v2983_v47 = vmul.f32 0.044715, %v2919_v38  ;;  %v3336_v48 = vmul.f32 %v3272_v62, %v7076_v52 }
 0x4a6   : > { %v7233_v53 = vpop.eup %5550  ;;  %v3107_v4 = vmul.f32 0.7978846, %v3043_v21  ;;  %v2984_v39 = vmul.f32 0.044715, %v2920_v0  ;;  %v2923_v63 = vmul.f32 %v2859_v32, %v7217_v23  ;;  %v2924_v57 = vmul.f32 %v2860_v40, %v7220_v58  ;;  %v2681_v17 = vpop.f32.mrb[84].mxu1 }
 0x4a7   : > { %v7237_v43 = vpop.eup %5552  ;;  %v3108_v45 = vmul.f32 0.7978846, %v3044_v3  ;;  %v3047_v60 = vadd.f32 %v2983_v47, %v7202_v31  ;;  %v3340_v51 = vmul.f32 %v3276_v9, %v7086_v8  ;;  %v7242_v19 = vadd.f32 %v2681_v17, %v7066_v22  ;;  %v2683_v52 = vpop.f32.mrb[85].mxu1  ;;  %v5452_v3 = vld [vmem:[#allocation14 + $0x100] ss:$8 sps:$4 sm:$0xff]  }
 0x4a8   : > { %v7244_v62 = vpop.eup %5554  ;;  %5560 = vtanh.f32 %v3107_v4  ;;  %v3048_v38 = vadd.f32 %v2984_v39, %v7208_v42  ;;  %v2987_v21 = vmul.f32 0.044715, %v2923_v63  ;;  %v2988_v0 = vmul.f32 0.044715, %v2924_v57  ;;  %v2685_v40 = vpop.f32.mrb[86].mxu1 }
 0x4a9   : > { %5562 = vtanh.f32 %v3108_v45  ;;  %v3111_v32 = vmul.f32 0.7978846, %v3047_v60  ;;  %v3400_v1 = vpack.c.bf16 %v3340_v51, %v3336_v48  ;;  %v2863_v47 = vmul.f32 %v7242_v19, %v7242_v19  ;;  %v2687_v9 = vpop.f32.mrb[87].mxu1 }
 0x4aa   : > { %v3112_v8 = vmul.f32 0.7978846, %v3048_v38  ;;  %v3051_v17 = vadd.f32 %v2987_v21, %v7217_v23  ;;  %v3052_v12 = vadd.f32 %v2988_v0, %v7220_v58  ;;  %v7252_v4 = vadd.f32 %v2683_v52, %v7070_v41 }
 0x4ab   : > { %5564 = vtanh.f32 %v3111_v32  ;;  %3859 = vmatprep.mubr.bf16.mxu0 %v3400_v1  ;;  %v2927_v45 = vmul.f32 %v2863_v47, %v7242_v19  ;;  %v7256_v60 = vadd.f32 %v2685_v40, %v7066_v22  ;;  %v7259_v57 = vadd.f32 %v2687_v9, %v7070_v41  ;;  %v5455_v1 = vld [vmem:[#allocation14 + $0x110] ss:$8 sps:$4 sm:$0xff]   ;;  %v5460_v40 = vld [vmem:[#allocation14 + $0x124] ss:$8 sps:$4 sm:$0xff]  }
 0x4ac   : > { %5566 = vtanh.f32 %v3112_v8  ;;  %v3115_v48 = vmul.f32 0.7978846, %v3051_v17  ;;  %v3116_v39 = vmul.f32 0.7978846, %v3052_v12  ;;  %v8498_v63 = vpack.c.bf16 %v7179_v33, %v7172_v18 }
 0x4ad   : > { %v2864_v51 = vmul.f32 %v7252_v4, %v7252_v4  ;;  %v7266_v52 = vpop.eup %5556  ;;  %v2991_v38 = vmul.f32 0.044715, %v2927_v45  ;;  %v2867_v21 = vmul.f32 %v7256_v60, %v7256_v60  ;;  %v2868_v0 = vmul.f32 %v7259_v57, %v7259_v57 }
 0x4ae   : > { %3860 = vmatmul.mubr.bf16.vlgmr.msra.gmra.mrb[64].mxu0 %v8498_v63  ;;  %v3216_v12 = vadd.f32 1.0, %v7190_v29  ;;  %5568 = vtanh.f32 %v3115_v48  ;;  %v3220_v33 = vadd.f32 1.0, %v7204_v6  ;;  %v3215_v32 = vadd.f32 1.0, %v7184_v27  ;;  %v5458_v29 = vld [vmem:[#allocation14 + $0x120] ss:$8 sps:$4 sm:$0xff]  }
 0x4af   : > { %3941 = vmatpush1.bf16.msra.mxu0 %v5452_v3  ;;  %v2928_v18 = vmul.f32 %v2864_v51, %v7252_v4  ;;  %v2691_v3 = vpop.f32.mrb[88].mxu1  ;;  %v7276_v47 = vpop.eup %5558  ;;  %5570 = vtanh.f32 %v3116_v39  ;;  %v3055_v9 = vadd.f32 %v2991_v38, %v7242_v19  ;;  %v2931_v8 = vmul.f32 %v2867_v21, %v7256_v60 }
 0x4b0   : > { %3942 = vmatprep.subr.bf16.mxu0 %v5457_v30  ;;  %v2932_v17 = vmul.f32 %v2868_v0, %v7259_v57  ;;  %v2693_v45 = vpop.f32.mrb[89].mxu1  ;;  %v3280_v48 = vmul.f32 0.5, %v3216_v12  ;;  %v3284_v63 = vmul.f32 0.5, %v3220_v33  ;;  %v3219_v6 = vadd.f32 1.0, %v7196_v61  ;;  %v5463_v33 = vld [vmem:[#allocation14 + $0x134] ss:$8 sps:$4 sm:$0xff]  }
 0x4b1   : > { %v2992_v30 = vmul.f32 0.044715, %v2928_v18  ;;  %v2695_v51 = vpop.f32.mrb[90].mxu1  ;;  %v3119_v5 = vmul.f32 0.7978846, %v3055_v9  ;;  %v7283_v39 = vadd.f32 %v2691_v3, %v7066_v22  ;;  %v3279_v12 = vmul.f32 0.5, %v3215_v32 }
 0x4b2   : > { %v2995_v27 = vmul.f32 0.044715, %v2931_v8  ;;  %v2996_v10 = vmul.f32 0.044715, %v2932_v17  ;;  %v7285_v38 = vpop.eup %5560  ;;  %v3344_v0 = vmul.f32 %v3280_v48, %v7102_v28  ;;  %v3348_v18 = vmul.f32 %v3284_v63, %v7115_v50  ;;  %v2697_v61 = vpop.f32.mrb[91].mxu1 }
 0x4b3   : > { %3943 = vmatpush1.bf16.msra.mxu0 %v5455_v1  ;;  %v3056_v21 = vadd.f32 %v2992_v30, %v7252_v4  ;;  %v7290_v35 = vpop.eup %5562  ;;  %5572 = vtanh.f32 %v3119_v5  ;;  %v3283_v9 = vmul.f32 0.5, %v3219_v6  ;;  %v3343_v30 = vmul.f32 %v3279_v12, %v7098_v36 }
 0x4b4   : > { %3944 = vmatprep.subr.bf16.mxu0 %v5460_v40  ;;  %v3059_v1 = vadd.f32 %v2995_v27, %v7256_v60  ;;  %v3060_v3 = vadd.f32 %v2996_v10, %v7259_v57  ;;  %v3404_v17 = vpack.c.bf16 %v3348_v18, %v3344_v0  ;;  %v2871_v28 = vmul.f32 %v7283_v39, %v7283_v39  ;;  %v5461_v10 = vld [vmem:[#allocation14 + $0x130] ss:$8 sps:$4 sm:$0xff]   ;;  %v5466_v0 = vld [vmem:[#allocation14 + $0x144] ss:$8 sps:$4 sm:$0xff]  }
 0x4b5   : > { %v3120_v8 = vmul.f32 0.7978846, %v3056_v21  ;;  %v7297_v50 = vpop.eup %5564  ;;  %v3347_v48 = vmul.f32 %v3283_v9, %v7109_v34  ;;  %v7301_v5 = vadd.f32 %v2693_v45, %v7070_v41  ;;  %v7307_v6 = vadd.f32 %v2695_v51, %v7066_v22 }
 0x4b6   : > { %v3123_v40 = vmul.f32 0.7978846, %v3059_v1  ;;  %v3124_v32 = vmul.f32 0.7978846, %v3060_v3  ;;  %v7303_v63 = vpop.eup %5566  ;;  %3869 = vmatprep.mubr.bf16.mxu0 %v3404_v17  ;;  %v2935_v36 = vmul.f32 %v2871_v28, %v7283_v39  ;;  %v7310_v27 = vadd.f32 %v2697_v61, %v7070_v41  ;;  %v2701_v21 = vpop.f32.mrb[92].mxu1 }
 0x4b7   : > { %3945 = vmatpush1.bf16.msra.mxu0 %v5458_v29  ;;  %5574 = vtanh.f32 %v3120_v8  ;;  %v3403_v34 = vpack.c.bf16 %v3347_v48, %v3343_v30  ;;  %v2872_v29 = vmul.f32 %v7301_v5, %v7301_v5  ;;  %v3224_v45 = vadd.f32 1.0, %v7233_v53  ;;  %v2703_v18 = vpop.f32.mrb[93].mxu1  ;;  %v5464_v48 = vld [vmem:[#allocation14 + $0x140] ss:$8 sps:$4 sm:$0xff]  }
 0x4b8   : > { %3946 = vmatprep.subr.bf16.mxu0 %v5463_v33  ;;  %5576 = vtanh.f32 %v3123_v40  ;;  %v7315_v12 = vpop.eup %5568  ;;  %v2999_v33 = vmul.f32 0.044715, %v2935_v36  ;;  %v2875_v51 = vmul.f32 %v7307_v6, %v7307_v6  ;;  %v2876_v61 = vmul.f32 %v7310_v27, %v7310_v27  ;;  %v2705_v1 = vpop.f32.mrb[94].mxu1 }
 0x4b9   : > { %5578 = vtanh.f32 %v3124_v32  ;;  %v7321_v3 = vpop.eup %5570  ;;  %3870 = vmatmul.mubr.bf16.gmra.mrb[68].mxu0 %v3403_v34  ;;  %v2936_v9 = vmul.f32 %v2872_v29, %v7301_v5  ;;  %v3228_v53 = vadd.f32 1.0, %v7244_v62  ;;  %v3288_v8 = vmul.f32 0.5, %v3224_v45  ;;  %v2707_v30 = vpop.f32.mrb[95].mxu1  ;;  %v5469_v45 = vld [vmem:[#allocation14 + $0x154] ss:$8 sps:$4 sm:$0xff]  }
 0x4ba   : > { %v3223_v17 = vadd.f32 1.0, %v7229_v2  ;;  %v3063_v28 = vadd.f32 %v2999_v33, %v7283_v39  ;;  %v2939_v40 = vmul.f32 %v2875_v51, %v7307_v6  ;;  %v2940_v32 = vmul.f32 %v2876_v61, %v7310_v27 }
 0x4bb   : > { %3947 = vmatpush1.bf16.msra.mxu0 %v5461_v10  ;;  %v3227_v36 = vadd.f32 1.0, %v7237_v43  ;;  %v3000_v37 = vmul.f32 0.044715, %v2936_v9  ;;  %v3292_v34 = vmul.f32 0.5, %v3228_v53  ;;  %v3352_v29 = vmul.f32 %v3288_v8, %v7135_v26  ;;  %v5467_v53 = vld [vmem:[#allocation14 + $0x150] ss:$8 sps:$4 sm:$0xff]  }
 0x4bc   : > { %3948 = vmatprep.subr.bf16.mxu0 %v5466_v0  ;;  %v3287_v62 = vmul.f32 0.5, %v3223_v17  ;;  %v3127_v7 = vmul.f32 0.7978846, %v3063_v28  ;;  %v3003_v2 = vmul.f32 0.044715, %v2939_v40  ;;  %v7332_v33 = vadd.f32 %v2701_v21, %v7066_v22 }
 0x4bd   : > { %v3004_v44 = vmul.f32 0.044715, %v2940_v32  ;;  %v7334_v10 = vpop.eup %5572  ;;  %v3064_v51 = vadd.f32 %v3000_v37, %v7301_v5  ;;  %v3356_v61 = vmul.f32 %v3292_v34, %v7147_v25  ;;  %v3291_v43 = vmul.f32 0.5, %v3227_v36 }
 0x4be   : > { %v3351_v9 = vmul.f32 %v3287_v62, %v7130_v15  ;;  %5580 = vtanh.f32 %v3127_v7  ;;  %v3067_v26 = vadd.f32 %v3003_v2, %v7307_v6  ;;  %v2879_v21 = vmul.f32 %v7332_v33, %v7332_v33  ;;  %v2744_v8 = vpop.f32.mrb[96].mxu1  ;;  %v5472_v15 = vld [vmem:[#allocation14 + $0x164] ss:$8 sps:$4 sm:$0xff]  }
 0x4bf   : > { %v3068_v0 = vadd.f32 %v3004_v44, %v7310_v27  ;;  %3949 = vmatpush1.bf16.msra.mxu0 %v5464_v48  ;;  %v3128_v17 = vmul.f32 0.7978846, %v3064_v51  ;;  %v3408_v28 = vpack.c.bf16 %v3356_v61, %v3352_v29  ;;  %v3355_v37 = vmul.f32 %v3291_v43, %v7141_v13  ;;  %v7347_v7 = vpop.f32.mrb[97].mxu1  ;;  %v5470_v61 = vld [vmem:[#allocation14 + $0x160] ss:$8 sps:$4 sm:$0xff]  }
 0x4c0   : > { %3950 = vmatprep.subr.bf16.mxu0 %v5469_v45  ;;  %v7345_v25 = vadd.f32 %v2703_v18, %v7070_v41  ;;  %v3131_v44 = vmul.f32 0.7978846, %v3067_v26  ;;  %v2943_v48 = vmul.f32 %v2879_v21, %v7332_v33  ;;  %v7353_v36 = vadd.f32 %v2705_v1, %v7066_v22  ;;  %v2748_v34 = vpop.f32.mrb[98].mxu1 }
 0x4c1   : > { %v7349_v40 = vpop.eup %5574  ;;  %v3132_v32 = vmul.f32 0.7978846, %v3068_v0  ;;  %5582 = vtanh.f32 %v3128_v17  ;;  %3879 = vmatprep.mubr.bf16.mxu0 %v3408_v28  ;;  %v3407_v13 = vpack.c.bf16 %v3355_v37, %v3351_v9  ;;  %v7360_v62 = vadd.f32 %v2707_v30, %v7070_v41  ;;  %v2750_v45 = vpop.f32.mrb[99].mxu1  ;;  %v5475_v9 = vld [vmem:[#allocation14 + $0x174] ss:$8 sps:$4 sm:$0xff]  }
 0x4c2   : > { %v7355_v29 = vpop.eup %5576  ;;  %v2880_v18 = vmul.f32 %v7345_v25, %v7345_v25  ;;  %5584 = vtanh.f32 %v3131_v44  ;;  %v3007_v51 = vmul.f32 0.044715, %v2943_v48  ;;  %v2883_v22 = vmul.f32 %v7353_v36, %v7353_v36  ;;  %v5473_v44 = vld [vmem:[#allocation14 + $0x170] ss:$8 sps:$4 sm:$0xff]  }
 0x4c3   : > { %v7362_v2 = vpop.eup %5578  ;;  %3951 = vmatpush1.bf16.msra.mxu0 %v5467_v53  ;;  %v3232_v1 = vadd.f32 1.0, %v7276_v47  ;;  %5586 = vtanh.f32 %v3132_v32  ;;  %v2884_v41 = vmul.f32 %v7360_v62, %v7360_v62  ;;  %v3236_v30 = vadd.f32 1.0, %v7290_v35 }
 0x4c4   : > { %3880 = vmatmul.mubr.bf16.gmra.mrb[72].mxu0 %v3407_v13  ;;  %v2944_v43 = vmul.f32 %v2880_v18, %v7345_v25  ;;  %3952 = vmatprep.subr.bf16.mxu0 %v5472_v15  ;;  %v3071_v26 = vadd.f32 %v3007_v51, %v7332_v33  ;;  %v2947_v0 = vmul.f32 %v2883_v22, %v7353_v36  ;;  %v3231_v21 = vadd.f32 1.0, %v7266_v52 }
 0x4c5   : > { %v3296_v53 = vmul.f32 0.5, %v3232_v1  ;;  %v2948_v17 = vmul.f32 %v2884_v41, %v7360_v62  ;;  %v3300_v28 = vmul.f32 0.5, %v3236_v30  ;;  %v3235_v37 = vadd.f32 1.0, %v7285_v38  ;;  %v5478_v1 = vld [vmem:[#allocation14 + $0x184] ss:$8 sps:$4 sm:$0xff]  }
 0x4c6   : > { %v3008_v47 = vmul.f32 0.044715, %v2944_v43  ;;  %v3135_v32 = vmul.f32 0.7978846, %v3071_v26  ;;  %v3011_v48 = vmul.f32 0.044715, %v2947_v0 }
 0x4c7   : > { %v3360_v35 = vmul.f32 %v3296_v53, %v7169_v46  ;;  %v3295_v15 = vmul.f32 0.5, %v3231_v21  ;;  %3953 = vmatpush1.bf16.msra.mxu0 %v5470_v61  ;;  %v7377_v13 = vpop.f32.mrb[100].mxu1  ;;  %v3012_v51 = vmul.f32 0.044715, %v2948_v17  ;;  %v3364_v52 = vmul.f32 %v3300_v28, %v7188_v49  ;;  %v5476_v17 = vld [vmem:[#allocation14 + $0x180] ss:$8 sps:$4 sm:$0xff]  }
 0x4c8   : > { %v3072_v18 = vadd.f32 %v3008_v47, %v7345_v25  ;;  %v3299_v22 = vmul.f32 0.5, %v3235_v37  ;;  %3954 = vmatprep.subr.bf16.mxu0 %v5475_v9  ;;  %v7381_v43 = vpop.f32.mrb[101].mxu1  ;;  %v7383_v38 = vpop.eup %5580  ;;  %5588 = vtanh.f32 %v3135_v32  ;;  %v3075_v41 = vadd.f32 %v3011_v48, %v7353_v36  ;;  %v5481_v48 = vld [vmem:[#allocation14 + $0x194] ss:$8 sps:$4 sm:$0xff]  }
 0x4c9   : > { %v3359_v46 = vmul.f32 %v3295_v15, %v7162_v20  ;;  %v7388_v61 = vadd.f32 %v2744_v8, %v7126_v55  ;;  %v7390_v30 = vpop.f32.mrb[102].mxu1  ;;  %v3076_v49 = vadd.f32 %v3012_v51, %v7360_v62  ;;  %v3412_v0 = vpack.c.bf16 %v3364_v52, %v3360_v35 }
 0x4ca   : > { %v3136_v26 = vmul.f32 0.7978846, %v3072_v18  ;;  %v3363_v9 = vmul.f32 %v3299_v22, %v7182_v56  ;;  %v7394_v53 = vpop.f32.mrb[103].mxu1  ;;  %v3139_v21 = vmul.f32 0.7978846, %v3075_v41  ;;  %v7400_v20 = vadd.f32 %v7347_v7, %v7157_v59 }
 0x4cb   : > { %v2825_v47 = vmul.f32 %v7388_v61, %v7388_v61  ;;  %3955 = vmatpush1.bf16.msra.mxu0 %v5473_v44  ;;  %v7403_v8 = vadd.f32 %v2748_v34, %v7126_v55  ;;  %v7405_v28 = vpop.eup %5582  ;;  %v3140_v37 = vmul.f32 0.7978846, %v3076_v49  ;;  %3889 = vmatprep.mubr.bf16.mxu0 %v3412_v0  ;;  %v7408_v32 = vadd.f32 %v2750_v45, %v7157_v59 }
 0x4cc   : > { %5590 = vtanh.f32 %v3136_v26  ;;  %v3411_v56 = vpack.c.bf16 %v3363_v9, %v3359_v46  ;;  %3956 = vmatprep.subr.bf16.mxu0 %v5478_v1  ;;  %v7410_v44 = vpop.eup %5584  ;;  %v2826_v34 = vmul.f32 %v7400_v20, %v7400_v20  ;;  %v3240_v18 = vadd.f32 1.0, %v7303_v63  ;;  %v5479_v46 = vld [vmem:[#allocation14 + $0x190] ss:$8 sps:$4 sm:$0xff]   ;;  %v5484_v63 = vld [vmem:[#allocation14 + $0x1a4] ss:$8 sps:$4 sm:$0xff]  }
 0x4cd   : > { %5592 = vtanh.f32 %v3139_v21  ;;  %v2889_v7 = vmul.f32 %v2825_v47, %v7388_v61  ;;  %v2829_v35 = vmul.f32 %v7403_v8, %v7403_v8  ;;  %v7417_v15 = vpop.eup %5586  ;;  %v2830_v45 = vmul.f32 %v7408_v32, %v7408_v32 }
 0x4ce   : > { %5594 = vtanh.f32 %v3140_v37  ;;  %3890 = vmatmul.mubr.bf16.gmra.mrb[76].mxu0 %v3411_v56  ;;  %v3244_v51 = vadd.f32 1.0, %v7321_v3  ;;  %v2890_v22 = vmul.f32 %v2826_v34, %v7400_v20  ;;  %v3239_v41 = vadd.f32 1.0, %v7297_v50  ;;  %v7426_v26 = vpop.f32.mrb[104].mxu1 }
 0x4cf   : > { %v2953_v52 = vmul.f32 0.044715, %v2889_v7  ;;  %v2893_v1 = vmul.f32 %v2829_v35, %v7403_v8  ;;  %3957 = vmatpush1.bf16.msra.mxu0 %v5476_v17  ;;  %v2894_v49 = vmul.f32 %v2830_v45, %v7408_v32  ;;  %v3304_v0 = vmul.f32 0.5, %v3240_v18  ;;  %v7430_v3 = vpop.f32.mrb[105].mxu1 }
 0x4d0   : > { %v3308_v9 = vmul.f32 0.5, %v3244_v51  ;;  %v3243_v21 = vadd.f32 1.0, %v7315_v12  ;;  %3958 = vmatprep.subr.bf16.mxu0 %v5481_v48  ;;  %v2954_v37 = vmul.f32 0.044715, %v2890_v22  ;;  %v3303_v7 = vmul.f32 0.5, %v3239_v41  ;;  %v7433_v50 = vpop.f32.mrb[106].mxu1 }
 0x4d1   : > { %v3017_v47 = vadd.f32 %v2953_v52, %v7388_v61  ;;  %v2957_v56 = vmul.f32 0.044715, %v2893_v1  ;;  %v2958_v17 = vmul.f32 0.044715, %v2894_v49  ;;  %v3368_v34 = vmul.f32 %v3304_v0, %v7208_v42  ;;  %v7437_v18 = vpop.f32.mrb[107].mxu1 }
 0x4d2   : > { %v3372_v35 = vmul.f32 %v3308_v9, %v7220_v58  ;;  %v3307_v45 = vmul.f32 0.5, %v3243_v21  ;;  %v7439_v12 = vpop.eup %5588  ;;  %v3018_v51 = vadd.f32 %v2954_v37, %v7400_v20  ;;  %v3367_v22 = vmul.f32 %v3303_v7, %v7202_v31  ;;  %v5482_v1 = vld [vmem:[#allocation14 + $0x1a0] ss:$8 sps:$4 sm:$0xff]   ;;  %v5487_v0 = vld [vmem:[#allocation14 + $0x1b4] ss:$8 sps:$4 sm:$0xff]  }
 0x4d3   : > { %v3081_v48 = vmul.f32 0.7978846, %v3017_v47  ;;  %v3021_v52 = vadd.f32 %v2957_v56, %v7403_v8  ;;  %3959 = vmatpush1.bf16.msra.mxu0 %v5479_v46  ;;  %v3022_v41 = vadd.f32 %v2958_v17, %v7408_v32  ;;  %v7448_v58 = vadd.f32 %v7377_v13, %v7126_v55  ;;  %v5485_v17 = vld [vmem:[#allocation14 + $0x1b0] ss:$8 sps:$4 sm:$0xff]  }
 0x4d4   : > { %v3416_v49 = vpack.c.bf16 %v3372_v35, %v3368_v34  ;;  %v3371_v42 = vmul.f32 %v3307_v45, %v7217_v23  ;;  %3960 = vmatprep.subr.bf16.mxu0 %v5484_v63  ;;  %v3082_v9 = vmul.f32 0.7978846, %v3018_v51  ;;  %v7452_v47 = vadd.f32 %v7381_v43, %v7157_v59 }
 0x4d5   : > { %5596 = vtanh.f32 %v3081_v48  ;;  %v3085_v21 = vmul.f32 0.7978846, %v3021_v52  ;;  %v3086_v46 = vmul.f32 0.7978846, %v3022_v41  ;;  %v2833_v23 = vmul.f32 %v7448_v58, %v7448_v58 }
 0x4d6   : > { %v7454_v31 = vpop.eup %5590  ;;  %3899 = vmatprep.mubr.bf16.mxu0 %v3416_v49  ;;  %v3415_v37 = vpack.c.bf16 %v3371_v42, %v3367_v22  ;;  %v7460_v13 = vadd.f32 %v7390_v30, %v7126_v55  ;;  %5598 = vtanh.f32 %v3082_v9  ;;  %v2834_v56 = vmul.f32 %v7452_v47, %v7452_v47  ;;  %v7471_v34 = vpop.f32.mrb[108].mxu1 }
 0x4d7   : > { %v7462_v63 = vpop.eup %5592  ;;  %v7468_v43 = vadd.f32 %v7394_v53, %v7157_v59  ;;  %v3248_v7 = vadd.f32 1.0, %v7349_v40  ;;  %3961 = vmatpush1.bf16.msra.mxu0 %v5482_v1  ;;  %5600 = vtanh.f32 %v3085_v21  ;;  %v2897_v30 = vmul.f32 %v2833_v23, %v7448_v58  ;;  %v5490_v53 = vld [vmem:[#allocation14 + $0x1c4] ss:$8 sps:$4 sm:$0xff]   ;;  %v7479_v51 = vpop.f32.mrb[109].mxu1  ;;  %v5488_v23 = vld [vmem:[#allocation14 + $0x1c0] ss:$8 sps:$4 sm:$0xff]  }
 0x4d8   : > { %v7473_v35 = vpop.eup %5594  ;;  %3900 = vmatmul.mubr.bf16.gmra.mrb[80].mxu0 %v3415_v37  ;;  %v2837_v45 = vmul.f32 %v7460_v13, %v7460_v13  ;;  %v3252_v48 = vadd.f32 1.0, %v7362_v2  ;;  %3962 = vmatprep.subr.bf16.mxu0 %v5487_v0  ;;  %5602 = vtanh.f32 %v3086_v46  ;;  %v2898_v40 = vmul.f32 %v2834_v56, %v7452_v47  ;;  %v7484_v1 = vpop.f32.mrb[110].mxu1 }
 0x4d9   : > { %v2838_v52 = vmul.f32 %v7468_v43, %v7468_v43  ;;  %v3312_v22 = vmul.f32 0.5, %v3248_v7  ;;  %v2961_v41 = vmul.f32 0.044715, %v2897_v30  ;;  %v3247_v9 = vadd.f32 1.0, %v7334_v10  ;;  %v7488_v2 = vpop.f32.mrb[111].mxu1 }
 0x4da   : > { %v2901_v49 = vmul.f32 %v2837_v45, %v7460_v13  ;;  %v3316_v42 = vmul.f32 0.5, %v3252_v48  ;;  %v2962_v0 = vmul.f32 0.044715, %v2898_v40  ;;  %v3251_v37 = vadd.f32 1.0, %v7355_v29  ;;  %v5493_v48 = vld [vmem:[#allocation14 + $0x1d4] ss:$8 sps:$4 sm:$0xff]  }
 0x4db   : > { %v2902_v21 = vmul.f32 %v2838_v52, %v7468_v43  ;;  %v3376_v46 = vmul.f32 %v3312_v22, %v7252_v4  ;;  %3963 = vmatpush1.bf16.msra.mxu0 %v5485_v17  ;;  %v3025_v56 = vadd.f32 %v2961_v41, %v7448_v58  ;;  %v3311_v45 = vmul.f32 0.5, %v3247_v9 }
 0x4dc   : > { %v2965_v7 = vmul.f32 0.044715, %v2901_v49  ;;  %v3380_v30 = vmul.f32 %v3316_v42, %v7259_v57  ;;  %3964 = vmatprep.subr.bf16.mxu0 %v5490_v53  ;;  %v3026_v10 = vadd.f32 %v2962_v0, %v7452_v47  ;;  %v3315_v40 = vmul.f32 0.5, %v3251_v37 }
 0x4dd   : > { %v2966_v24 = vmul.f32 0.044715, %v2902_v21  ;;  %v7498_v52 = vadd.f32 %v7426_v26, %v7126_v55  ;;  %v3089_v4 = vmul.f32 0.7978846, %v3025_v56  ;;  %v3375_v22 = vmul.f32 %v3311_v45, %v7242_v19  ;;  %v5491_v19 = vld [vmem:[#allocation14 + $0x1d0] ss:$8 sps:$4 sm:$0xff]  }
 0x4de   : > { %v3029_v29 = vadd.f32 %v2965_v7, %v7460_v13  ;;  %v3420_v17 = vpack.c.bf16 %v3380_v30, %v3376_v46  ;;  %v3090_v49 = vmul.f32 0.7978846, %v3026_v10  ;;  %v3379_v53 = vmul.f32 %v3315_v40, %v7256_v60  ;;  %v7506_v9 = vpop.f32.mrb[112].mxu1  ;;  %v5496_v56 = vld [vmem:[#allocation14 + $0x1e4] ss:$8 sps:$4 sm:$0xff]  }
 0x4df   : > { %v5597_v41 = vpop.eup %5596  ;;  %v3030_v57 = vadd.f32 %v2966_v24, %v7468_v43  ;;  %v2841_v42 = vmul.f32 %v7498_v52, %v7498_v52  ;;  %3965 = vmatpush1.bf16.msra.mxu0 %v5488_v23  ;;  %5604 = vtanh.f32 %v3089_v4  ;;  %v7510_v21 = vadd.f32 %v7430_v3, %v7157_v59  ;;  %v7512_v46 = vpop.f32.mrb[113].mxu1 }
 0x4e0   : > { %v3209_v26 = vadd.f32 1.0, %v5597_v41  ;;  %v3093_v0 = vmul.f32 0.7978846, %v3029_v29  ;;  %3909 = vmatprep.mubr.bf16.mxu0 %v3420_v17  ;;  %3966 = vmatprep.subr.bf16.mxu0 %v5493_v48  ;;  %v7514_v24 = vpop.eup %5598  ;;  %5606 = vtanh.f32 %v3090_v49  ;;  %v3419_v37 = vpack.c.bf16 %v3379_v53, %v3375_v22  ;;  %v7517_v7 = vpop.f32.mrb[114].mxu1 }
 0x4e1   : > { %v3094_v60 = vmul.f32 0.7978846, %v3030_v57  ;;  %v2905_v23 = vmul.f32 %v2841_v42, %v7498_v52  ;;  %v5601_v30 = vpop.eup %5600  ;;  %v2842_v3 = vmul.f32 %v7510_v21, %v7510_v21  ;;  %v7523_v48 = vadd.f32 %v7433_v50, %v7126_v55  ;;  %v7525_v10 = vpop.f32.mrb[115].mxu1  ;;  %v5494_v57 = vld [vmem:[#allocation14 + $0x1e0] ss:$8 sps:$4 sm:$0xff]  }
 0x4e2   : > { %v3273_v45 = vmul.f32 0.5, %v3209_v26  ;;  %5608 = vtanh.f32 %v3093_v0  ;;  %v7527_v40 = vpop.eup %5602  ;;  %v3213_v4 = vadd.f32 1.0, %v5601_v30  ;;  %3910 = vmatmul.mubr.bf16.gmra.mrb[84].mxu0 %v3419_v37  ;;  %v7531_v17 = vadd.f32 %v7437_v18, %v7157_v59 }
 0x4e3   : > { %5610 = vtanh.f32 %v3094_v60  ;;  %v2969_v29 = vmul.f32 0.044715, %v2905_v23  ;;  %v2906_v41 = vmul.f32 %v2842_v3, %v7510_v21  ;;  %v2845_v50 = vmul.f32 %v7523_v48, %v7523_v48  ;;  %3967 = vmatpush1.bf16.msra.mxu0 %v5491_v19 }
 0x4e4   : > { %v7534_v22 = vmul.f32 %v3273_v45, %v7388_v61  ;;  %v3256_v49 = vadd.f32 1.0, %v7405_v28  ;;  %v3277_v53 = vmul.f32 0.5, %v3213_v4  ;;  %v2846_v26 = vmul.f32 %v7531_v17, %v7531_v17  ;;  %3968 = vmatprep.subr.bf16.mxu0 %v5496_v56  ;;  %v5499_v61 = vld [vmem:[#allocation14 + $0x1f4] ss:$8 sps:$4 sm:$0xff]  }
 0x4e5   : > { %v3033_v42 = vadd.f32 %v2969_v29, %v7498_v52  ;;  %v3260_v18 = vadd.f32 1.0, %v7417_v15  ;;  %v2970_v0 = vmul.f32 0.044715, %v2906_v41  ;;  %v2909_v60 = vmul.f32 %v2845_v50, %v7523_v48  ;;  %v5497_v41 = vld [vmem:[#allocation14 + $0x1f0] ss:$8 sps:$4 sm:$0xff]  }
 0x4e6   : > { %v3320_v37 = vmul.f32 0.5, %v3256_v49  ;;  %v3255_v23 = vadd.f32 1.0, %v7383_v38  ;;  %v7547_v28 = vmul.f32 %v3277_v53, %v7403_v8  ;;  %v2910_v30 = vmul.f32 %v2846_v26, %v7531_v17  ;;  %v7550_v3 = vpop.f32.mrb[116].mxu1 }
 0x4e7   : > { %v3097_v19 = vmul.f32 0.7978846, %v3033_v42  ;;  %v3324_v45 = vmul.f32 0.5, %v3260_v18  ;;  %v3034_v4 = vadd.f32 %v2970_v0, %v7510_v21  ;;  %v2973_v15 = vmul.f32 0.044715, %v2909_v60  ;;  %3969 = vmatpush1.bf16.msra.mxu0 %v5494_v57  ;;  %v7555_v50 = vpop.f32.mrb[117].mxu1 }
 0x4e8   : > { %v3384_v56 = vmul.f32 %v3320_v37, %v7301_v5  ;;  %v3259_v29 = vadd.f32 1.0, %v7410_v44  ;;  %v2974_v8 = vmul.f32 0.044715, %v2910_v30  ;;  %3970 = vmatprep.subr.bf16.mxu0 %v5499_v61  ;;  %v7560_v53 = vpop.f32.mrb[118].mxu1  ;;  %v3319_v44 = vmul.f32 0.5, %v3255_v23 }
 0x4e9   : > { %5612 = vtanh.f32 %v3097_v19  ;;  %v3388_v49 = vmul.f32 %v3324_v45, %v7310_v27  ;;  %v7562_v42 = vpop.eup %5604  ;;  %v3098_v26 = vmul.f32 0.7978846, %v3034_v4  ;;  %v3037_v5 = vadd.f32 %v2973_v15, %v7523_v48  ;;  %v7565_v18 = vpop.f32.mrb[119].mxu1 }
 0x4ea   : > { %v3323_v57 = vmul.f32 0.5, %v3259_v29  ;;  %v7567_v0 = vpop.eup %5606  ;;  %v3038_v60 = vadd.f32 %v2974_v8, %v7531_v17  ;;  %v7572_v27 = vadd.f32 %v7471_v34, %v7126_v55  ;;  %v7576_v61 = vadd.f32 %v7479_v51, %v7157_v59 }
 0x4eb   : > { %v3424_v37 = vpack.c.bf16 %v3388_v49, %v3384_v56  ;;  %5614 = vtanh.f32 %v3098_v26  ;;  %v3101_v23 = vmul.f32 0.7978846, %v3037_v5  ;;  %v3383_v30 = vmul.f32 %v3319_v44, %v7283_v39  ;;  %3971 = vmatpush1.bf16.msra.mxu0 %v5497_v41 }
 0x4ec   : > { %v7578_v19 = vpop.eup %5608  ;;  %v3387_v45 = vmul.f32 %v3323_v57, %v7307_v6  ;;  %v3102_v15 = vmul.f32 0.7978846, %v3038_v60  ;;  %v2849_v34 = vmul.f32 %v7572_v27, %v7572_v27  ;;  %v2850_v51 = vmul.f32 %v7576_v61, %v7576_v61 }
 0x4ed   : > { %v7582_v4 = vpop.eup %5610  ;;  %3919 = vmatprep.mubr.bf16.mxu0 %v3424_v37  ;;  %v7590_v56 = vadd.f32 %v7484_v1, %v7126_v55  ;;  %5616 = vtanh.f32 %v3101_v23  ;;  %v7594_v39 = vadd.f32 %v7488_v2, %v7157_v59  ;;  %v3264_v6 = vadd.f32 1.0, %v7454_v31 }
 0x4ee   : > { %v3423_v29 = vpack.c.bf16 %v3387_v45, %v3383_v30  ;;  %5618 = vtanh.f32 %v3102_v15  ;;  %v2913_v41 = vmul.f32 %v2849_v34, %v7572_v27  ;;  %v2914_v8 = vmul.f32 %v2850_v51, %v7576_v61  ;;  %v7601_v26 = vpop.f32.mrb[120].mxu1 }
 0x4ef   : > { %v2853_v49 = vmul.f32 %v7590_v56, %v7590_v56  ;;  %v2854_v1 = vmul.f32 %v7594_v39, %v7594_v39  ;;  %v3268_v5 = vadd.f32 1.0, %v7473_v35  ;;  %v3328_v2 = vmul.f32 0.5, %v3264_v6  ;;  %v7607_v31 = vpop.f32.mrb[121].mxu1 }
 0x4f0   : > { %3920 = vmatmul.mubr.bf16.gmra.mrb[88].mxu0 %v3423_v29  ;;  %v3263_v44 = vadd.f32 1.0, %v7439_v12  ;;  %v2977_v57 = vmul.f32 0.044715, %v2913_v41  ;;  %v2978_v60 = vmul.f32 0.044715, %v2914_v8  ;;  %v3267_v23 = vadd.f32 1.0, %v7462_v63 }
 0x4f1   : > { %v2917_v37 = vmul.f32 %v2853_v49, %v7590_v56  ;;  %v7611_v30 = vpop.f32.mrb[122].mxu1  ;;  %v2918_v45 = vmul.f32 %v2854_v1, %v7594_v39  ;;  %v3332_v15 = vmul.f32 0.5, %v3268_v5  ;;  %v3392_v34 = vmul.f32 %v3328_v2, %v7345_v25 }
 0x4f2   : > { %v3327_v51 = vmul.f32 0.5, %v3263_v44  ;;  %v7615_v35 = vpop.f32.mrb[123].mxu1  ;;  %v3041_v12 = vadd.f32 %v2977_v57, %v7572_v27  ;;  %v3042_v6 = vadd.f32 %v2978_v60, %v7576_v61  ;;  %v3331_v8 = vmul.f32 0.5, %v3267_v23 }
 0x4f3   : > { %v7617_v29 = vpop.eup %5612  ;;  %v2981_v41 = vmul.f32 0.044715, %v2917_v37  ;;  %v2982_v49 = vmul.f32 0.044715, %v2918_v45  ;;  %v3396_v63 = vmul.f32 %v3332_v15, %v7360_v62  ;;  %v7625_v1 = vadd.f32 %v7506_v9, %v7126_v55 }
 0x4f4   : > { %v3391_v38 = vmul.f32 %v3327_v51, %v7332_v33  ;;  %v3105_v25 = vmul.f32 0.7978846, %v3041_v12  ;;  %v3106_v5 = vmul.f32 0.7978846, %v3042_v6  ;;  %v3395_v44 = vmul.f32 %v3331_v8, %v7353_v36 }
 0x4f5   : > { %v3045_v2 = vadd.f32 %v2981_v41, %v7590_v56  ;;  %v7629_v57 = vpop.eup %5614  ;;  %v3046_v60 = vadd.f32 %v2982_v49, %v7594_v39  ;;  %v3428_v37 = vpack.c.bf16 %v3396_v63, %v3392_v34  ;;  %v2857_v62 = vmul.f32 %v7625_v1, %v7625_v1 }
 0x4f6   : > { %v7636_v33 = vadd.f32 %v7512_v46, %v7157_v59  ;;  %5620 = vtanh.f32 %v3105_v25  ;;  %v3427_v23 = vpack.c.bf16 %v3395_v44, %v3391_v38  ;;  %v7640_v45 = vadd.f32 %v7517_v7, %v7126_v55  ;;  %v7642_v36 = vpop.f32.mrb[124].mxu1 }
 0x4f7   : > { %v3109_v9 = vmul.f32 0.7978846, %v3045_v2  ;;  %v7644_v15 = vpop.eup %5616  ;;  %5622 = vtanh.f32 %v3106_v5  ;;  %v3110_v34 = vmul.f32 0.7978846, %v3046_v60  ;;  %3929 = vmatprep.mubr.bf16.mxu0 %v3428_v37  ;;  %v2921_v51 = vmul.f32 %v2857_v62, %v7625_v1  ;;  %v7649_v12 = vpop.f32.mrb[125].mxu1 }
 0x4f8   : > { %v2858_v46 = vmul.f32 %v7636_v33, %v7636_v33  ;;  %v7651_v6 = vpop.eup %5618  ;;  %3930 = vmatmul.mubr.bf16.gmra.mrb[92].mxu0 %v3427_v23  ;;  %v2861_v7 = vmul.f32 %v7640_v45, %v7640_v45  ;;  %v7657_v38 = vadd.f32 %v7525_v10, %v7157_v59  ;;  %v3210_v41 = vadd.f32 1.0, %v7514_v24  ;;  %v7660_v8 = vpop.f32.mrb[126].mxu1 }
 0x4f9   : > { %5624 = vtanh.f32 %v3109_v9  ;;  %v2985_v49 = vmul.f32 0.044715, %v2921_v51  ;;  %v3214_v25 = vadd.f32 1.0, %v7527_v40  ;;  %v7664_v5 = vpop.f32.mrb[127].mxu1  ;;  %v7671_v10 = vadd.f32 %v7550_v3, %v7126_v55 }
 0x4fa   : > { %5626 = vtanh.f32 %v3110_v34  ;;  %v2922_v63 = vmul.f32 %v2858_v46, %v7636_v33  ;;  %v2925_v2 = vmul.f32 %v2861_v7, %v7640_v45  ;;  %v2862_v44 = vmul.f32 %v7657_v38, %v7657_v38 }
 0x4fb   : > { %v3274_v60 = vmul.f32 0.5, %v3210_v41  ;;  %v3049_v24 = vadd.f32 %v2985_v49, %v7625_v1  ;;  %v3278_v62 = vmul.f32 0.5, %v3214_v25  ;;  %v7676_v9 = vadd.f32 %v7555_v50, %v7157_v59 }
 0x4fc   : > { %v2986_v37 = vmul.f32 0.044715, %v2922_v63  ;;  %v2989_v40 = vmul.f32 0.044715, %v2925_v2  ;;  %v2926_v23 = vmul.f32 %v2862_v44, %v7657_v38  ;;  %v2865_v51 = vmul.f32 %v7671_v10, %v7671_v10 }
 0x4fd   : > { %v3338_v34 = vmul.f32 %v3274_v60, %v7400_v20  ;;  %v3113_v46 = vmul.f32 0.7978846, %v3049_v24  ;;  %v3342_v7 = vmul.f32 %v3278_v62, %v7408_v32  ;;  %v2866_v41 = vmul.f32 %v7676_v9, %v7676_v9 }
 0x4fe   : > { %v3050_v3 = vadd.f32 %v2986_v37, %v7636_v33  ;;  %v3053_v49 = vadd.f32 %v2989_v40, %v7640_v45  ;;  %v2990_v50 = vmul.f32 0.044715, %v2926_v23  ;;  %v2929_v63 = vmul.f32 %v2865_v51, %v7671_v10 }
 0x4ff   : > { %v7690_v25 = vadd.f32 %v7560_v53, %v7126_v55  ;;  %5628 = vtanh.f32 %v3113_v46  ;;  %v3402_v2 = vpack.c.bf16 %v3342_v7, %v3338_v34  ;;  %v2930_v44 = vmul.f32 %v2866_v41, %v7676_v9 }
 0x500   : > { %v3114_v20 = vmul.f32 0.7978846, %v3050_v3  ;;  %v7693_v60 = vpop.eup %5620  ;;  %v3117_v32 = vmul.f32 0.7978846, %v3053_v49  ;;  %v3054_v24 = vadd.f32 %v2990_v50, %v7657_v38  ;;  %v2993_v37 = vmul.f32 0.044715, %v2929_v63 }
 0x501   : > { %v2869_v62 = vmul.f32 %v7690_v25, %v7690_v25  ;;  %v7698_v40 = vpop.eup %5622  ;;  %3972 = vmatprep.mubr.bf16.mxu0 %v3402_v2  ;;  %v2994_v53 = vmul.f32 0.044715, %v2930_v44  ;;  %v7702_v23 = vadd.f32 %v7565_v18, %v7157_v59  ;;  %v3218_v34 = vadd.f32 1.0, %v7567_v0 }
 0x502   : > { %5630 = vtanh.f32 %v3114_v20  ;;  %v3118_v46 = vmul.f32 0.7978846, %v3054_v24  ;;  %v8499_v3 = vpack.c.bf16 %v7547_v28, %v7534_v22  ;;  %v3057_v7 = vadd.f32 %v2993_v37, %v7671_v10 }
 0x503   : > { %v7705_v51 = vpop.eup %5624  ;;  %5632 = vtanh.f32 %v3117_v32  ;;  %v2933_v41 = vmul.f32 %v2869_v62, %v7690_v25  ;;  %v3058_v50 = vadd.f32 %v2994_v53, %v7676_v9  ;;  %v2870_v18 = vmul.f32 %v7702_v23, %v7702_v23 }
 0x504   : > { %3973 = vmatmul.mubr.bf16.vlgmr.msra.gmra.mrb[64].mxu0 %v8499_v3  ;;  %v7712_v49 = vpop.eup %5626  ;;  %v3222_v0 = vadd.f32 1.0, %v7582_v4  ;;  %v3282_v63 = vmul.f32 0.5, %v3218_v34  ;;  %5634 = vtanh.f32 %v3118_v46  ;;  %v3121_v20 = vmul.f32 0.7978846, %v3057_v7 }
 0x505   : > { %v2997_v2 = vmul.f32 0.044715, %v2933_v41  ;;  %v3217_v22 = vadd.f32 1.0, %v7562_v42  ;;  %v3122_v28 = vmul.f32 0.7978846, %v3058_v50  ;;  %v2934_v44 = vmul.f32 %v2870_v18, %v7702_v23 }
 0x506   : > { %v3286_v32 = vmul.f32 0.5, %v3222_v0  ;;  %v3346_v24 = vmul.f32 %v3282_v63, %v7452_v47  ;;  %5636 = vtanh.f32 %v3121_v20  ;;  %v3221_v62 = vadd.f32 1.0, %v7578_v19 }
 0x507   : > { %v3061_v37 = vadd.f32 %v2997_v2, %v7690_v25  ;;  %v3281_v53 = vmul.f32 0.5, %v3217_v22  ;;  %5638 = vtanh.f32 %v3122_v28  ;;  %v2998_v4 = vmul.f32 0.044715, %v2934_v44 }
 0x508   : > { %v3350_v34 = vmul.f32 %v3286_v32, %v7468_v43  ;;  %v7726_v46 = vadd.f32 %v7601_v26, %v7126_v55  ;;  %v3285_v3 = vmul.f32 0.5, %v3221_v62  ;;  %v7731_v47 = vadd.f32 %v7607_v31, %v7157_v59 }
 0x509   : > { %v3125_v42 = vmul.f32 0.7978846, %v3061_v37  ;;  %v3345_v7 = vmul.f32 %v3281_v53, %v7448_v58  ;;  %v7733_v41 = vpop.eup %5628  ;;  %v3062_v19 = vadd.f32 %v2998_v4, %v7702_v23  ;;  %v7740_v26 = vadd.f32 %v7611_v30, %v7126_v55 }
 0x50a   : > { %v3406_v50 = vpack.c.bf16 %v3350_v34, %v3346_v24  ;;  %v2873_v43 = vmul.f32 %v7726_v46, %v7726_v46  ;;  %v3349_v18 = vmul.f32 %v3285_v3, %v7460_v13  ;;  %v2874_v58 = vmul.f32 %v7731_v47, %v7731_v47 }
 0x50b   : > { %5640 = vtanh.f32 %v3125_v42  ;;  %v7747_v31 = vadd.f32 %v7615_v35, %v7157_v59  ;;  %v3126_v63 = vmul.f32 0.7978846, %v3062_v19  ;;  %v2877_v30 = vmul.f32 %v7740_v26, %v7740_v26 }
 0x50c   : > { %v7749_v0 = vpop.eup %5630  ;;  %3982 = vmatprep.mubr.bf16.mxu0 %v3406_v50  ;;  %v2937_v20 = vmul.f32 %v2873_v43, %v7726_v46  ;;  %v3226_v2 = vadd.f32 1.0, %v7629_v57  ;;  %v3405_v13 = vpack.c.bf16 %v3349_v18, %v3345_v7  ;;  %v2938_v28 = vmul.f32 %v2874_v58, %v7731_v47 }
 0x50d   : > { %v7755_v22 = vpop.eup %5632  ;;  %v2878_v35 = vmul.f32 %v7747_v31, %v7747_v31  ;;  %v3230_v44 = vadd.f32 1.0, %v7651_v6  ;;  %5642 = vtanh.f32 %v3126_v63  ;;  %v2941_v24 = vmul.f32 %v2877_v30, %v7740_v26 }
 0x50e   : > { %v3001_v32 = vmul.f32 0.044715, %v2937_v20  ;;  %v3290_v37 = vmul.f32 0.5, %v3226_v2  ;;  %v7762_v62 = vpop.eup %5634  ;;  %3983 = vmatmul.mubr.bf16.gmra.mrb[68].mxu0 %v3405_v13  ;;  %v3002_v53 = vmul.f32 0.044715, %v2938_v28  ;;  %v3225_v34 = vadd.f32 1.0, %v7617_v29 }
 0x50f   : > { %v2942_v57 = vmul.f32 %v2878_v35, %v7747_v31  ;;  %v3294_v4 = vmul.f32 0.5, %v3230_v44  ;;  %v3005_v3 = vmul.f32 0.044715, %v2941_v24  ;;  %v3229_v6 = vadd.f32 1.0, %v7644_v15 }
 0x510   : > { %v3065_v42 = vadd.f32 %v3001_v32, %v7726_v46  ;;  %v3354_v7 = vmul.f32 %v3290_v37, %v7510_v21  ;;  %v7769_v19 = vpop.eup %5636  ;;  %v3066_v50 = vadd.f32 %v3002_v53, %v7731_v47  ;;  %v3289_v58 = vmul.f32 0.5, %v3225_v34 }
 0x511   : > { %v3006_v43 = vmul.f32 0.044715, %v2942_v57  ;;  %v3358_v18 = vmul.f32 %v3294_v4, %v7531_v17  ;;  %v7773_v63 = vpop.eup %5638  ;;  %v3069_v29 = vadd.f32 %v3005_v3, %v7740_v26  ;;  %v3293_v30 = vmul.f32 0.5, %v3229_v6 }
 0x512   : > { %v3129_v20 = vmul.f32 0.7978846, %v3065_v42  ;;  %v7778_v2 = vadd.f32 %v7642_v36, %v7126_v55  ;;  %v3130_v21 = vmul.f32 0.7978846, %v3066_v50  ;;  %v3353_v28 = vmul.f32 %v3289_v58, %v7498_v52 }
 0x513   : > { %v3070_v15 = vadd.f32 %v3006_v43, %v7747_v31  ;;  %v3410_v13 = vpack.c.bf16 %v3358_v18, %v3354_v7  ;;  %v3133_v35 = vmul.f32 0.7978846, %v3069_v29  ;;  %v3357_v17 = vmul.f32 %v3293_v30, %v7523_v48 }
 0x514   : > { %5644 = vtanh.f32 %v3129_v20  ;;  %v2881_v44 = vmul.f32 %v7778_v2, %v7778_v2  ;;  %v7789_v36 = vadd.f32 %v7649_v12, %v7157_v59  ;;  %v7793_v37 = vadd.f32 %v7660_v8, %v7126_v55 }
 0x515   : > { %v7785_v32 = vpop.eup %5640  ;;  %5646 = vtanh.f32 %v3130_v21  ;;  %v3134_v24 = vmul.f32 0.7978846, %v3070_v15  ;;  %3992 = vmatprep.mubr.bf16.mxu0 %v3410_v13  ;;  %v3409_v52 = vpack.c.bf16 %v3357_v17, %v3353_v28  ;;  %v7798_v53 = vadd.f32 %v7664_v5, %v7157_v59 }
 0x516   : > { %5648 = vtanh.f32 %v3133_v35  ;;  %v2945_v48 = vmul.f32 %v2881_v44, %v7778_v2  ;;  %v2882_v57 = vmul.f32 %v7789_v36, %v7789_v36  ;;  %v2885_v12 = vmul.f32 %v7793_v37, %v7793_v37 }
 0x517   : > { %5650 = vtanh.f32 %v3134_v24  ;;  %v3234_v4 = vadd.f32 1.0, %v7698_v40  ;;  %v5643_v34 = vpop.eup %5642  ;;  %3993 = vmatmul.mubr.bf16.gmra.mrb[72].mxu0 %v3409_v52  ;;  %v2886_v8 = vmul.f32 %v7798_v53, %v7798_v53  ;;  %v3238_v42 = vadd.f32 1.0, %v7712_v49 }
 0x518   : > { %v3009_v55 = vmul.f32 0.044715, %v2945_v48  ;;  %v3233_v59 = vadd.f32 1.0, %v7693_v60  ;;  %v2946_v5 = vmul.f32 %v2882_v57, %v7789_v36  ;;  %v2949_v3 = vmul.f32 %v2885_v12, %v7793_v37 }
 0x519   : > { %v3298_v7 = vmul.f32 0.5, %v3234_v4  ;;  %v3237_v6 = vadd.f32 1.0, %v7705_v51  ;;  %v2950_v40 = vmul.f32 %v2886_v8, %v7798_v53  ;;  %v3302_v43 = vmul.f32 0.5, %v3238_v42 }
 0x51a   : > { %v3073_v50 = vadd.f32 %v3009_v55, %v7778_v2  ;;  %v3297_v18 = vmul.f32 0.5, %v3233_v59  ;;  %v3010_v58 = vmul.f32 0.044715, %v2946_v5  ;;  %v3013_v20 = vmul.f32 0.044715, %v2949_v3 }
 0x51b   : > { %v3362_v29 = vmul.f32 %v3298_v7, %v7576_v61  ;;  %v3301_v49 = vmul.f32 0.5, %v3237_v6  ;;  %v3014_v60 = vmul.f32 0.044715, %v2950_v40  ;;  %v3366_v21 = vmul.f32 %v3302_v43, %v7594_v39 }
 0x51c   : > { %v3137_v30 = vmul.f32 0.7978846, %v3073_v50  ;;  %v3361_v15 = vmul.f32 %v3297_v18, %v7572_v27  ;;  %v3074_v13 = vadd.f32 %v3010_v58, %v7789_v36  ;;  %v3077_v51 = vadd.f32 %v3013_v20, %v7793_v37 }
 0x51d   : > { %v3365_v28 = vmul.f32 %v3301_v49, %v7590_v56  ;;  %v3242_v35 = vadd.f32 1.0, %v7749_v0  ;;  %v3078_v44 = vadd.f32 %v3014_v60, %v7798_v53  ;;  %v3414_v61 = vpack.c.bf16 %v3366_v21, %v3362_v29 }
 0x51e   : > { %v5645_v17 = vpop.eup %5644  ;;  %5652 = vtanh.f32 %v3137_v30  ;;  %v3246_v24 = vadd.f32 1.0, %v7762_v62  ;;  %v3138_v48 = vmul.f32 0.7978846, %v3074_v13  ;;  %v3141_v39 = vmul.f32 0.7978846, %v3077_v51 }
 0x51f   : > { %v5647_v52 = vpop.eup %5646  ;;  %v3413_v57 = vpack.c.bf16 %v3365_v28, %v3361_v15  ;;  %v3306_v27 = vmul.f32 0.5, %v3242_v35  ;;  %v3142_v4 = vmul.f32 0.7978846, %v3078_v44  ;;  %4002 = vmatprep.mubr.bf16.mxu0 %v3414_v61  ;;  %v3241_v56 = vadd.f32 1.0, %v7733_v41 }
 0x520   : > { %v5649_v12 = vpop.eup %5648  ;;  %v3310_v55 = vmul.f32 0.5, %v3246_v24  ;;  %v3245_v0 = vadd.f32 1.0, %v7755_v22  ;;  %5654 = vtanh.f32 %v3138_v48  ;;  %v3250_v62 = vadd.f32 1.0, %v7773_v63 }
 0x521   : > { %v5651_v8 = vpop.eup %5650  ;;  %4003 = vmatmul.mubr.bf16.gmra.mrb[76].mxu0 %v3413_v57  ;;  %v3370_v42 = vmul.f32 %v3306_v27, %v7636_v33  ;;  %v3254_v59 = vadd.f32 1.0, %v5643_v34  ;;  %5656 = vtanh.f32 %v3141_v39  ;;  %v3305_v3 = vmul.f32 0.5, %v3241_v56 }
 0x522   : > { %v3374_v5 = vmul.f32 %v3310_v55, %v7657_v38  ;;  %v3309_v7 = vmul.f32 0.5, %v3245_v0  ;;  %5658 = vtanh.f32 %v3142_v4  ;;  %v3314_v6 = vmul.f32 0.5, %v3250_v62  ;;  %v3495_v0 = vld [vmem:[%s8500_s10] sm:$0x3]  ;;  %s5926_s10 = scalar_lea.vmem %s5925_s13, 8192 }
 0x523   : > { %v3318_v50 = vmul.f32 0.5, %v3254_v59  ;;  %v3249_v41 = vadd.f32 1.0, %v7769_v19  ;;  %v3369_v22 = vmul.f32 %v3305_v3, %v7625_v1  ;;  %v3253_v33 = vadd.f32 1.0, %v7785_v32  ;;  %p5928_p1 = scmp.lt.s32.totalorder %s5926_s10, %s5920_s24 }
 0x524   : > { %v3418_v40 = vpack.c.bf16 %v3374_v5, %v3370_v42  ;;  %v3373_v43 = vmul.f32 %v3309_v7, %v7640_v45  ;;  %v3378_v63 = vmul.f32 %v3314_v6, %v7676_v9  ;;  %v3258_v38 = vadd.f32 1.0, %v5647_v52  ;;  %v8501_v7 = vld [vmem:[#allocation25_spill] sm:$0xff] }
 0x525   : > { %v3382_v34 = vmul.f32 %v3318_v50, %v7702_v23  ;;  %v3313_v18 = vmul.f32 0.5, %v3249_v41  ;;  %v3317_v20 = vmul.f32 0.5, %v3253_v33  ;;  %v3262_v29 = vadd.f32 1.0, %v5651_v8  ;;  %v8502_v41 = vld [vmem:[#allocation27_spill] sm:$0xff]  ;;  %p5929_p10 = por %p5928_p1, %p5927_p5 }
 0x526   : > { %4012 = vmatprep.mubr.bf16.mxu0 %v3418_v40  ;;  %v3417_v58 = vpack.c.bf16 %v3373_v43, %v3369_v22  ;;  %v3257_v49 = vadd.f32 1.0, %v5645_v17  ;;  %v3322_v19 = vmul.f32 0.5, %v3258_v38  ;;  %v3261_v60 = vadd.f32 1.0, %v5649_v12  ;;  %v8503_v22 = vld [vmem:[#allocation26_spill] sm:$0xff] }
 0x527   : > { %v3422_v30 = vpack.c.bf16 %v3382_v34, %v3378_v63  ;;  %v3377_v1 = vmul.f32 %v3313_v18, %v7671_v10  ;;  %v3381_v45 = vmul.f32 %v3317_v20, %v7690_v25  ;;  %v3326_v32 = vmul.f32 0.5, %v3262_v29  ;;  %p5930_p12 = pnand %p5929_p10, %p5923_p7 }
 0x528   : > { %v5653_v21 = vpop.eup %5652  ;;  %v3321_v15 = vmul.f32 0.5, %v3257_v49  ;;  %v3325_v9 = vmul.f32 0.5, %v3261_v60  ;;  %v3386_v51 = vmul.f32 %v3322_v19, %v7731_v47  ;;  %v7848_v8 = vrot.slane %v3495_v0, %v6714_v11 }
 0x529   : > { %4013 = vmatmul.mubr.bf16.gmra.mrb[80].mxu0 %v3417_v58  ;;  %v3265_v23 = vadd.f32 1.0, %v5653_v21  ;;  %v3421_v13 = vpack.c.bf16 %v3381_v45, %v3377_v1  ;;  %v3390_v28 = vmul.f32 %v3326_v32, %v7747_v31  ;;  %v8504_v32 = vld [vmem:[#allocation28_spill] sm:$0xff] }
 0x52a   : > { %4022 = vmatprep.mubr.bf16.mxu0 %v3422_v30  ;;  %v5655_v35 = vpop.eup %5654  ;;  %v3385_v17 = vmul.f32 %v3321_v15, %v7726_v46  ;;  %v3389_v44 = vmul.f32 %v3325_v9, %v7740_v26 }
 0x52b   : > { %v5657_v61 = vpop.eup %5656  ;;  %v3426_v10 = vpack.c.bf16 %v3390_v28, %v3386_v51  ;;  %v3266_v24 = vadd.f32 1.0, %v5655_v35  ;;  %v3329_v39 = vmul.f32 0.5, %v3265_v23  ;;  %v8505_v23 = vld [vmem:[#allocation30_spill] sm:$0xff]  ;;  %v8506_v51 = vld [vmem:[#allocation29_spill] sm:$0xff] }
 0x52c   : > { %v5659_v25 = vpop.eup %5658  ;;  %v3425_v52 = vpack.c.bf16 %v3389_v44, %v3385_v17  ;;  %v3269_v48 = vadd.f32 1.0, %v5657_v61 }
 0x52d   : > { %v3270_v57 = vadd.f32 1.0, %v5659_v25  ;;  %v3330_v27 = vmul.f32 0.5, %v3266_v24  ;;  %v3393_v47 = vmul.f32 %v3329_v39, %v7778_v2  ;;  %v7851_v2 = vrot.slane %v3495_v0, %v6717_v14 }
 0x52e   : > { %v3333_v12 = vmul.f32 0.5, %v3269_v48 }
 0x52f   : > { %v3334_v4 = vmul.f32 0.5, %v3270_v57  ;;  %v3394_v46 = vmul.f32 %v3330_v27, %v7789_v36  ;;  %v8507_v27 = vld [vmem:[#allocation33_spill] sm:$0xff] }
 0x530   : > { %v3397_v31 = vmul.f32 %v3333_v12, %v7793_v37 }
 0x531   : > { %4023 = vmatmul.mubr.bf16.gmra.mrb[84].mxu0 %v3421_v13  ;;  %v3398_v26 = vmul.f32 %v3334_v4, %v7798_v53 }
 0x532   : > { %4032 = vmatprep.mubr.bf16.mxu0 %v3426_v10  ;;  %v3429_v55 = vpack.c.bf16 %v3397_v31, %v3393_v47 }
 0x533   : > { %v3430_v56 = vpack.c.bf16 %v3398_v26, %v3394_v46  ;;  %v8508_v46 = vld [vmem:[#allocation31_spill] sm:$0xff] }
 0x539   : > { %4033 = vmatmul.mubr.bf16.gmra.mrb[88].mxu0 %v3425_v52 }
 0x53a   : > { %4042 = vmatprep.mubr.bf16.mxu0 %v3430_v56  ;;  %v8509_v56 = vld [vmem:[#allocation34_spill] sm:$0xff] }
 0x541   : > { %4043 = vmatmul.mubr.bf16.gmra.mrb[92].mxu0 %v3429_v55 }
 0x5d7   : > { %v3974_v37 = vpop.f32.mrb[64].mxu0 }
 0x5d8   : > { %v4971_v36 = vadd.f32 %v3974_v37, %v7848_v8  ;;  %v3976_v42 = vpop.f32.mrb[65].mxu0  ;;  %v8510_v37 = vld [vmem:[#allocation32_spill] sm:$0xff] }
 0x5d9   : > { %v4972_v53 = vadd.f32 %v3976_v42, %v7851_v2  ;;  %v3978_v62 = vpop.f32.mrb[66].mxu0 }
 0x5da   : > { %v7856_v59 = vadd.f32 %v4971_v36, %v6774_v54  ;;  %v4973_v5 = vadd.f32 %v3978_v62, %v7848_v8  ;;  %v3980_v3 = vpop.f32.mrb[67].mxu0 }
 0x5db   : > { %v7860_v6 = vadd.f32 %v4972_v53, %v8501_v7  ;;  %v4974_v50 = vadd.f32 %v3980_v3, %v7851_v2 }
 0x5dc   : > { %v7864_v40 = vadd.f32 %v4973_v5, %v8502_v41  ;;  %v4149_v54 = vmul.f32 %v7856_v59, %v7856_v59 }
 0x5dd   : > { %v7867_v43 = vadd.f32 %v4974_v50, %v8503_v22  ;;  %v4085_v33 = vadd.f32 %v7860_v6, %v7856_v59  ;;  %v4150_v63 = vmul.f32 %v7860_v6, %v7860_v6 }
 0x5de   : > { %v4151_v18 = vmul.f32 %v7864_v40, %v7864_v40 }
 0x5df   : > { %4086 = vadd.xlane.f32.xlu0 %v4085_v33  ;;  %v4088_v34 = vadd.f32 %v7867_v43, %v7864_v40  ;;  %v4152_v38 = vmul.f32 %v7867_v43, %v7867_v43  ;;  %v4181_v58 = vadd.f32 %v4150_v63, %v4149_v54 }
 0x5e1   : > { %4089 = vadd.xlane.f32.xlu1 %v4088_v34  ;;  %v3984_v20 = vpop.f32.mrb[68].mxu0  ;;  %v4184_v29 = vadd.f32 %v4152_v38, %v4151_v18  ;;  %v8511_v34 = vld [vmem:[#allocation37_spill] sm:$0xff] }
 0x5e2   : > { %v4975_v49 = vadd.f32 %v3984_v20, %v7848_v8  ;;  %v3986_v30 = vpop.f32.mrb[69].mxu0 }
 0x5e3   : > { %4182 = vadd.xlane.f32.xlu0 %v4181_v58  ;;  %v4976_v19 = vadd.f32 %v3986_v30, %v7851_v2  ;;  %v3988_v60 = vpop.f32.mrb[70].mxu0 }
 0x5e4   : > { %v7884_v21 = vadd.f32 %v4975_v49, %v6810_v16  ;;  %v4977_v1 = vadd.f32 %v3988_v60, %v7848_v8  ;;  %v3990_v45 = vpop.f32.mrb[71].mxu0 }
 0x5e5   : > { %4185 = vadd.xlane.f32.xlu1 %v4184_v29  ;;  %v7888_v15 = vadd.f32 %v4976_v19, %v8504_v32  ;;  %v4978_v9 = vadd.f32 %v3990_v45, %v7851_v2  ;;  %v8512_v29 = vld [vmem:[#allocation35_spill] sm:$0xff]  ;;  %v8513_v19 = vld [vmem:[#allocation38_spill] sm:$0xff] }
 0x5e6   : > { %v7892_v13 = vadd.f32 %v4977_v1, %v8505_v23  ;;  %v4153_v16 = vmul.f32 %v7884_v21, %v7884_v21  ;;  %v8514_v1 = vld [vmem:[#allocation36_spill] sm:$0xff] }
 0x5e7   : > { %v7895_v28 = vadd.f32 %v4978_v9, %v8506_v51  ;;  %v4091_v35 = vadd.f32 %v7888_v15, %v7884_v21  ;;  %v4154_v17 = vmul.f32 %v7888_v15, %v7888_v15 }
 0x5e8   : > { %v4155_v61 = vmul.f32 %v7892_v13, %v7892_v13 }
 0x5e9   : > { %4092 = vadd.xlane.f32.xlu0 %v4091_v35  ;;  %v4094_v44 = vadd.f32 %v7895_v28, %v7892_v13  ;;  %v4156_v10 = vmul.f32 %v7895_v28, %v7895_v28  ;;  %v4187_v48 = vadd.f32 %v4154_v17, %v4153_v16 }
 0x5ea   : > { %v3994_v24 = vpop.f32.mrb[72].mxu0 }
 0x5eb   : > { %v4979_v25 = vadd.f32 %v3994_v24, %v7848_v8  ;;  %v3996_v52 = vpop.f32.mrb[73].mxu0  ;;  %4095 = vadd.xlane.f32.xlu1 %v4094_v44  ;;  %v4190_v31 = vadd.f32 %v4156_v10, %v4155_v61 }
 0x5ec   : > { %v4980_v39 = vadd.f32 %v3996_v52, %v7851_v2  ;;  %v3998_v57 = vpop.f32.mrb[74].mxu0  ;;  %v8515_v52 = vld [vmem:[#allocation41_spill] sm:$0xff] }
 0x5ed   : > { %v7912_v12 = vadd.f32 %v4979_v25, %v8507_v27  ;;  %v4981_v4 = vadd.f32 %v3998_v57, %v7848_v8  ;;  %v4000_v47 = vpop.f32.mrb[75].mxu0  ;;  %4188 = vadd.xlane.f32.xlu0 %v4187_v48  ;;  %v8516_v27 = vld [vmem:[#allocation39_spill] sm:$0xff] }
 0x5ee   : > { %v7916_v26 = vadd.f32 %v4980_v39, %v8508_v46  ;;  %v4982_v55 = vadd.f32 %v4000_v47, %v7851_v2  ;;  %v8517_v46 = vld [vmem:[#allocation42_spill] sm:$0xff] }
 0x5ef   : > { %v7920_v0 = vadd.f32 %v4981_v4, %v8509_v56  ;;  %4191 = vadd.xlane.f32.xlu1 %v4190_v31  ;;  %v4157_v53 = vmul.f32 %v7912_v12, %v7912_v12  ;;  %v8518_v56 = vld [vmem:[#allocation40_spill] sm:$0xff] }
 0x5f0   : > { %v7923_v36 = vadd.f32 %v4982_v55, %v8510_v37  ;;  %v4097_v42 = vadd.f32 %v7916_v26, %v7912_v12  ;;  %v4158_v62 = vmul.f32 %v7916_v26, %v7916_v26 }
 0x5f1   : > { %v4159_v3 = vmul.f32 %v7920_v0, %v7920_v0 }
 0x5f2   : > { %4098 = vadd.xlane.f32.xlu0 %v4097_v42  ;;  %v4100_v5 = vadd.f32 %v7923_v36, %v7920_v0  ;;  %v4160_v7 = vmul.f32 %v7923_v36, %v7923_v36  ;;  %v4193_v33 = vadd.f32 %v4158_v62, %v4157_v53 }
 0x5f4   : > { %v4004_v50 = vpop.f32.mrb[76].mxu0  ;;  %4101 = vadd.xlane.f32.xlu1 %v4100_v5  ;;  %v4196_v20 = vadd.f32 %v4160_v7, %v4159_v3 }
 0x5f5   : > { %v4983_v41 = vadd.f32 %v4004_v50, %v7848_v8  ;;  %v4006_v22 = vpop.f32.mrb[77].mxu0 }
 0x5f6   : > { %v4984_v54 = vadd.f32 %v4006_v22, %v7851_v2  ;;  %v4008_v63 = vpop.f32.mrb[78].mxu0  ;;  %4194 = vadd.xlane.f32.xlu0 %v4193_v33 }
 0x5f7   : > { %v7940_v18 = vadd.f32 %v4983_v41, %v8511_v34  ;;  %v4985_v38 = vadd.f32 %v4008_v63, %v7848_v8  ;;  %v4010_v58 = vpop.f32.mrb[79].mxu0  ;;  %v8519_v34 = vld [vmem:[#allocation46_spill] sm:$0xff] }
 0x5f8   : > { %v7944_v49 = vadd.f32 %v4984_v54, %v8512_v29  ;;  %v4986_v30 = vadd.f32 %v4010_v58, %v7851_v2  ;;  %4197 = vadd.xlane.f32.xlu1 %v4196_v20  ;;  %v8520_v29 = vld [vmem:[#allocation43_spill] sm:$0xff] }
 0x5f9   : > { %v7948_v60 = vadd.f32 %v4985_v38, %v8513_v19  ;;  %v4161_v9 = vmul.f32 %v7940_v18, %v7940_v18 }
 0x5fa   : > { %v7951_v45 = vadd.f32 %v4986_v30, %v8514_v1  ;;  %v4103_v32 = vadd.f32 %v7944_v49, %v7940_v18  ;;  %v4162_v23 = vmul.f32 %v7944_v49, %v7944_v49 }
 0x5fb   : > { %v4163_v16 = vmul.f32 %v7948_v60, %v7948_v60 }
 0x5fc   : > { %v4014_v51 = vpop.f32.mrb[80].mxu0  ;;  %4104 = vadd.xlane.f32.xlu0 %v4103_v32  ;;  %v4106_v35 = vadd.f32 %v7951_v45, %v7948_v60  ;;  %v4164_v17 = vmul.f32 %v7951_v45, %v7951_v45  ;;  %v4199_v25 = vadd.f32 %v4162_v23, %v4161_v9  ;;  %v8521_v32 = vld [vmem:[#allocation45_spill] sm:$0xff]  ;;  %v8522_v23 = vld [vmem:[#allocation44_spill] sm:$0xff] }
 0x5fd   : > { %v4987_v44 = vadd.f32 %v4014_v51, %v7848_v8  ;;  %v4016_v61 = vpop.f32.mrb[81].mxu0 }
 0x5fe   : > { %v4988_v10 = vadd.f32 %v4016_v61, %v7851_v2  ;;  %v4018_v24 = vpop.f32.mrb[82].mxu0  ;;  %4107 = vadd.xlane.f32.xlu1 %v4106_v35  ;;  %v4202_v31 = vadd.f32 %v4164_v17, %v4163_v16 }
 0x5ff   : > { %v7968_v48 = vadd.f32 %v4987_v44, %v8515_v52  ;;  %v4989_v39 = vadd.f32 %v4018_v24, %v7848_v8  ;;  %v4020_v57 = vpop.f32.mrb[83].mxu0 }
 0x600   : > { %v7972_v4 = vadd.f32 %v4988_v10, %v8516_v27  ;;  %v4990_v47 = vadd.f32 %v4020_v57, %v7851_v2  ;;  %4200 = vadd.xlane.f32.xlu0 %v4199_v25 }
 0x601   : > { %v7976_v55 = vadd.f32 %v4989_v39, %v8517_v46  ;;  %v4165_v53 = vmul.f32 %v7968_v48, %v7968_v48 }
 0x602   : > { %v7979_v37 = vadd.f32 %v4990_v47, %v8518_v56  ;;  %4203 = vadd.xlane.f32.xlu1 %v4202_v31  ;;  %v4109_v42 = vadd.f32 %v7972_v4, %v7968_v48  ;;  %v4166_v62 = vmul.f32 %v7972_v4, %v7972_v4  ;;  %v8523_v47 = vld [vmem:[#allocation50_spill] sm:$0xff] }
 0x603   : > { %v4167_v7 = vmul.f32 %v7976_v55, %v7976_v55 }
 0x604   : > { %v4024_v5 = vpop.f32.mrb[84].mxu0  ;;  %4110 = vadd.xlane.f32.xlu0 %v4109_v42  ;;  %v4112_v3 = vadd.f32 %v7979_v37, %v7976_v55  ;;  %v4168_v50 = vmul.f32 %v7979_v37, %v7979_v37  ;;  %v4205_v63 = vadd.f32 %v4166_v62, %v4165_v53  ;;  %v8524_v42 = vld [vmem:[#allocation47_spill] sm:$0xff] }
 0x605   : > { %v4991_v41 = vadd.f32 %v4024_v5, %v7848_v8  ;;  %v4026_v22 = vpop.f32.mrb[85].mxu0 }
 0x606   : > { %v4992_v33 = vadd.f32 %v4026_v22, %v7851_v2  ;;  %v4028_v54 = vpop.f32.mrb[86].mxu0  ;;  %4113 = vadd.xlane.f32.xlu1 %v4112_v3  ;;  %v4208_v1 = vadd.f32 %v4168_v50, %v4167_v7  ;;  %v8525_v3 = vld [vmem:[#allocation49_spill] sm:$0xff]  ;;  %v8526_v50 = vld [vmem:[#allocation48_spill] sm:$0xff] }
 0x607   : > { %v7996_v38 = vadd.f32 %v4991_v41, %v8519_v34  ;;  %v4993_v58 = vadd.f32 %v4028_v54, %v7848_v8  ;;  %v4030_v20 = vpop.f32.mrb[87].mxu0 }
 0x608   : > { %v8000_v30 = vadd.f32 %v4992_v33, %v8520_v29  ;;  %v4994_v19 = vadd.f32 %v4030_v20, %v7851_v2  ;;  %4206 = vadd.xlane.f32.xlu0 %v4205_v63 }
 0x609   : > { %v8004_v9 = vadd.f32 %v4993_v58, %v8521_v32  ;;  %v4169_v16 = vmul.f32 %v7996_v38, %v7996_v38 }
 0x60a   : > { %v8007_v51 = vadd.f32 %v4994_v19, %v8522_v23  ;;  %4209 = vadd.xlane.f32.xlu1 %v4208_v1  ;;  %v4115_v35 = vadd.f32 %v8000_v30, %v7996_v38  ;;  %v4170_v17 = vmul.f32 %v8000_v30, %v8000_v30 }
 0x60b   : > { %v4171_v10 = vmul.f32 %v8004_v9, %v8004_v9 }
 0x60c   : > { %v4034_v44 = vpop.f32.mrb[88].mxu0  ;;  %4116 = vadd.xlane.f32.xlu0 %v4115_v35  ;;  %v4118_v61 = vadd.f32 %v8007_v51, %v8004_v9  ;;  %v4172_v24 = vmul.f32 %v8007_v51, %v8007_v51  ;;  %v4211_v27 = vadd.f32 %v4170_v17, %v4169_v16  ;;  %v8527_v35 = vld [vmem:[#allocation54_spill] sm:$0xff] }
 0x60d   : > { %v4995_v25 = vadd.f32 %v4034_v44, %v7848_v8  ;;  %v4036_v52 = vpop.f32.mrb[89].mxu0 }
 0x60e   : > { %v4996_v39 = vadd.f32 %v4036_v52, %v7851_v2  ;;  %v4038_v57 = vpop.f32.mrb[90].mxu0  ;;  %4119 = vadd.xlane.f32.xlu1 %v4118_v61  ;;  %v4214_v5 = vadd.f32 %v4172_v24, %v4171_v10  ;;  %v8528_v61 = vld [vmem:[#allocation51_spill] sm:$0xff]  ;;  %v8529_v52 = vld [vmem:[#allocation53_spill] sm:$0xff] }
 0x60f   : > { %v8024_v31 = vadd.f32 %v4995_v25, %v8523_v47  ;;  %v4997_v46 = vadd.f32 %v4038_v57, %v7848_v8  ;;  %v4040_v56 = vpop.f32.mrb[91].mxu0  ;;  %v8530_v57 = vld [vmem:[#allocation52_spill] sm:$0xff] }
 0x610   : > { %v8028_v53 = vadd.f32 %v4996_v39, %v8524_v42  ;;  %v4998_v62 = vadd.f32 %v4040_v56, %v7851_v2  ;;  %4212 = vadd.xlane.f32.xlu0 %v4211_v27 }
 0x611   : > { %v8032_v7 = vadd.f32 %v4997_v46, %v8525_v3  ;;  %v4173_v33 = vmul.f32 %v8024_v31, %v8024_v31 }
 0x612   : > { %v8035_v41 = vadd.f32 %v4998_v62, %v8526_v50  ;;  %4215 = vadd.xlane.f32.xlu1 %v4214_v5  ;;  %v4121_v22 = vadd.f32 %v8028_v53, %v8024_v31  ;;  %v4174_v54 = vmul.f32 %v8028_v53, %v8028_v53 }
 0x613   : > { %v4175_v58 = vmul.f32 %v8032_v7, %v8032_v7 }
 0x614   : > { %v4044_v63 = vpop.f32.mrb[92].mxu0  ;;  %4122 = vadd.xlane.f32.xlu0 %v4121_v22  ;;  %v4124_v34 = vadd.f32 %v8035_v41, %v8032_v7  ;;  %v4176_v20 = vmul.f32 %v8035_v41, %v8035_v41  ;;  %v4217_v23 = vadd.f32 %v4174_v54, %v4173_v33 }
 0x615   : > { %v4999_v29 = vadd.f32 %v4044_v63, %v7848_v8  ;;  %v4046_v19 = vpop.f32.mrb[93].mxu0 }
 0x616   : > { %v5000_v1 = vadd.f32 %v4046_v19, %v7851_v2  ;;  %v4048_v32 = vpop.f32.mrb[94].mxu0  ;;  %4125 = vadd.xlane.f32.xlu1 %v4124_v34  ;;  %v4220_v25 = vadd.f32 %v4176_v20, %v4175_v58 }
 0x617   : > { %v8052_v16 = vadd.f32 %v4999_v29, %v8527_v35  ;;  %v5001_v17 = vadd.f32 %v4048_v32, %v7848_v8  ;;  %v4050_v44 = vpop.f32.mrb[95].mxu0 }
 0x618   : > { %v8056_v10 = vadd.f32 %v5000_v1, %v8528_v61  ;;  %v5002_v24 = vadd.f32 %v4050_v44, %v7851_v2  ;;  %4218 = vadd.xlane.f32.xlu0 %v4217_v23 }
 0x619   : > { %v8060_v39 = vadd.f32 %v5001_v17, %v8529_v52  ;;  %v4177_v8 = vmul.f32 %v8052_v16, %v8052_v16 }
 0x61a   : > { %v8063_v27 = vadd.f32 %v5002_v24, %v8530_v57  ;;  %4221 = vadd.xlane.f32.xlu1 %v4220_v25  ;;  %v4127_v47 = vadd.f32 %v8056_v10, %v8052_v16  ;;  %v4178_v46 = vmul.f32 %v8056_v10, %v8056_v10  ;;  %v4373_v25 = vld [vmem:[%s8531_s5] sm:$0x3] }
 0x61b   : > { %v4179_v56 = vmul.f32 %v8060_v39, %v8060_v39 }
 0x61c   : > { %4128 = vadd.xlane.f32.xlu0 %v4127_v47  ;;  %v4130_v2 = vadd.f32 %v8063_v27, %v8060_v39  ;;  %v4180_v42 = vmul.f32 %v8063_v27, %v8063_v27  ;;  %v4223_v62 = vadd.f32 %v4178_v46, %v4177_v8  ;;  %v4417_v47 = vld [vmem:[%s8532_s20] sm:$0x3] }
 0x61e   : > { %4131 = vadd.xlane.f32.xlu1 %v4130_v2  ;;  %v4226_v5 = vadd.f32 %v4180_v42, %v4179_v56 }
 0x620   : > { %4224 = vadd.xlane.f32.xlu0 %v4223_v62 }
 0x622   : > { %4227 = vadd.xlane.f32.xlu1 %v4226_v5  ;;  %v8094_v5 = vrot.slane %v4373_v25, %v6714_v11 }
 0x66c   : > { %v4087_v3 = vpop.xlane.xlu0 %4086 }
 0x66d   : > { %v4133_v50 = vmul.f32 0.00390625, %v4087_v3  ;;  %v8097_v3 = vrot.slane %v4373_v25, %v6717_v14 }
 0x66e   : > { %v4090_v22 = vpop.xlane.xlu1 %4089 }
 0x66f   : > { %v4134_v33 = vmul.f32 0.00390625, %v4090_v22  ;;  %v4245_v63 = vmul.f32 %v4133_v50, %v4133_v50  ;;  %v4277_v42 = vsub.f32 %v7856_v59, %v4133_v50  ;;  %v4278_v62 = vsub.f32 %v7860_v6, %v4133_v50 }
 0x670   : > { %v4183_v54 = vpop.xlane.xlu0 %4182 }
 0x671   : > { %v4229_v34 = vmul.f32 0.00390625, %v4183_v54  ;;  %v4246_v29 = vmul.f32 %v4134_v33, %v4134_v33  ;;  %v8100_v54 = vrot.slane %v4417_v47, %v6714_v11  ;;  %v4279_v59 = vsub.f32 %v7864_v40, %v4134_v33 }
 0x672   : > { %v4186_v58 = vpop.xlane.xlu1 %4185  ;;  %v4280_v6 = vsub.f32 %v7867_v43, %v4134_v33 }
 0x673   : > { %v4261_v20 = vsub.f32 %v4229_v34, %v4245_v63  ;;  %v4230_v19 = vmul.f32 0.00390625, %v4186_v58  ;;  %v8103_v63 = vrot.slane %v4417_v47, %v6717_v14 }
 0x675   : > { %v4309_v1 = vadd.f32 1e-05, %v4261_v20  ;;  %v4262_v32 = vsub.f32 %v4230_v19, %v4246_v29 }
 0x676   : > { %v4093_v35 = vpop.xlane.xlu0 %4092 }
 0x677   : > { %5660 = vrsqrt.f32 %v4309_v1  ;;  %v4310_v23 = vadd.f32 1e-05, %v4262_v32  ;;  %v8077_v17 = vmul.f32 0.00390625, %v4093_v35 }
 0x678   : > { %v4096_v44 = vpop.xlane.xlu1 %4095 }
 0x679   : > { %5662 = vrsqrt.f32 %v4310_v23  ;;  %v8079_v61 = vmul.f32 0.00390625, %v4096_v44  ;;  %v4247_v52 = vmul.f32 %v8077_v17, %v8077_v17 }
 0x67a   : > { %v4189_v24 = vpop.xlane.xlu0 %4188 }
 0x67b   : > { %v4231_v57 = vmul.f32 0.00390625, %v4189_v24  ;;  %v4248_v2 = vmul.f32 %v8079_v61, %v8079_v61 }
 0x67c   : > { %v4192_v8 = vpop.xlane.xlu1 %4191 }
 0x67d   : > { %v4263_v46 = vsub.f32 %v4231_v57, %v4247_v52  ;;  %v4232_v56 = vmul.f32 0.00390625, %v4192_v8 }
 0x67f   : > { %v4311_v34 = vadd.f32 1e-05, %v4263_v46  ;;  %v4264_v58 = vsub.f32 %v4232_v56, %v4248_v2  ;;  %v4099_v20 = vpop.xlane.xlu0 %4098 }
 0x680   : > { %v8107_v32 = vmul.f32 0.00390625, %v4099_v20 }
 0x681   : > { %v5661_v22 = vpop.eup %5660  ;;  %5664 = vrsqrt.f32 %v4311_v34  ;;  %v4312_v1 = vadd.f32 1e-05, %v4264_v58  ;;  %v4102_v11 = vpop.xlane.xlu1 %4101 }
 0x682   : > { %v4341_v50 = vmul.f32 %v5661_v22, %v4277_v42  ;;  %v4342_v29 = vmul.f32 %v5661_v22, %v4278_v62  ;;  %v8111_v24 = vmul.f32 0.00390625, %v4102_v11  ;;  %v4249_v57 = vmul.f32 %v8107_v32, %v8107_v32 }
 0x683   : > { %v5663_v19 = vpop.eup %5662  ;;  %5666 = vrsqrt.f32 %v4312_v1  ;;  %v4195_v40 = vpop.xlane.xlu0 %4194  ;;  %v4283_v1 = vsub.f32 %v7892_v13, %v8079_v61 }
 0x684   : > { %v4385_v23 = vmul.f32 %v8094_v5, %v4341_v50  ;;  %v4386_v14 = vmul.f32 %v8097_v3, %v4342_v29  ;;  %v4343_v35 = vmul.f32 %v5663_v19, %v4279_v59  ;;  %v4344_v44 = vmul.f32 %v5663_v19, %v4280_v6 }
 0x685   : > { %v4233_v47 = vmul.f32 0.00390625, %v4195_v40  ;;  %v4198_v8 = vpop.xlane.xlu1 %4197  ;;  %v4250_v56 = vmul.f32 %v8111_v24, %v8111_v24  ;;  %v4281_v59 = vsub.f32 %v7884_v21, %v8077_v17  ;;  %v4282_v6 = vsub.f32 %v7888_v15, %v8077_v17 }
 0x686   : > { %v4429_v43 = vadd.f32 %v8100_v54, %v4385_v23  ;;  %v4430_v33 = vadd.f32 %v8103_v63, %v4386_v14  ;;  %v4387_v25 = vmul.f32 %v8094_v5, %v4343_v35  ;;  %v4388_v52 = vmul.f32 %v8097_v3, %v4344_v44 }
 0x687   : > { %v4234_v42 = vmul.f32 0.00390625, %v4198_v8  ;;  %v4265_v62 = vsub.f32 %v4233_v47, %v4249_v57  ;;  %v4284_v23 = vsub.f32 %v7895_v28, %v8079_v61 }
 0x688   : > { %4461 = vst [vmem:[%s8121_s2] sm:$0xff] %v4429_v43  ;;  %4462 = vst [vmem:[%s8121_s2 + $0x8] sm:$0xff] %v4430_v33  ;;  %v4431_v46 = vadd.f32 %v8100_v54, %v4387_v25  ;;  %v4432_v2 = vadd.f32 %v8103_v63, %v4388_v52 }
 0x689   : > { %v4266_v22 = vsub.f32 %v4234_v42, %v4250_v56  ;;  %v4105_v34 = vpop.xlane.xlu0 %4104  ;;  %v4313_v58 = vadd.f32 1e-05, %v4265_v62 }
 0x68a   : > { %4463 = vst [vmem:[%s8121_s2 + $0x10] sm:$0xff] %v4431_v46  ;;  %4464 = vst [vmem:[%s8121_s2 + $0x18] sm:$0xff] %v4432_v2  ;;  %v8131_v20 = vmul.f32 0.00390625, %v4105_v34 }
 0x68b   : > { %v4314_v50 = vadd.f32 1e-05, %v4266_v22  ;;  %v4108_v29 = vpop.xlane.xlu1 %4107  ;;  %v5665_v19 = vpop.eup %5664  ;;  %5668 = vrsqrt.f32 %v4313_v58 }
 0x68c   : > { %v8139_v11 = vmul.f32 0.00390625, %v4108_v29  ;;  %v4345_v14 = vmul.f32 %v5665_v19, %v4281_v59  ;;  %v4346_v35 = vmul.f32 %v5665_v19, %v4282_v6  ;;  %v4251_v15 = vmul.f32 %v8131_v20, %v8131_v20 }
 0x68d   : > { %5670 = vrsqrt.f32 %v4314_v50  ;;  %v4201_v44 = vpop.xlane.xlu0 %4200  ;;  %v5667_v21 = vpop.eup %5666  ;;  %v4285_v6 = vsub.f32 %v7912_v12, %v8107_v32  ;;  %v4286_v50 = vsub.f32 %v7916_v26, %v8107_v32  ;;  %v4287_v29 = vsub.f32 %v7920_v0, %v8111_v24 }
 0x68e   : > { %v4235_v17 = vmul.f32 0.00390625, %v4201_v44  ;;  %v4389_v40 = vmul.f32 %v8094_v5, %v4345_v14  ;;  %v4390_v13 = vmul.f32 %v8097_v3, %v4346_v35  ;;  %v4347_v43 = vmul.f32 %v5667_v21, %v4283_v1 }
 0x68f   : > { %v4348_v33 = vmul.f32 %v5667_v21, %v4284_v23  ;;  %v4204_v25 = vpop.xlane.xlu1 %4203  ;;  %v4252_v28 = vmul.f32 %v8139_v11, %v8139_v11  ;;  %v4288_v14 = vsub.f32 %v7923_v36, %v8111_v24 }
 0x690   : > { %v4267_v52 = vsub.f32 %v4235_v17, %v4251_v15  ;;  %v4236_v61 = vmul.f32 0.00390625, %v4204_v25  ;;  %v4433_v57 = vadd.f32 %v8100_v54, %v4389_v40  ;;  %v4434_v47 = vadd.f32 %v8103_v63, %v4390_v13 }
 0x691   : > { %v4391_v8 = vmul.f32 %v8094_v5, %v4347_v43  ;;  %v4392_v46 = vmul.f32 %v8097_v3, %v4348_v33  ;;  %v4111_v2 = vpop.xlane.xlu0 %4110 }
 0x692   : > { %v4315_v56 = vadd.f32 1e-05, %v4267_v52  ;;  %v4268_v42 = vsub.f32 %v4236_v61, %v4252_v28  ;;  %v8153_v62 = vmul.f32 0.00390625, %v4111_v2  ;;  %4465 = vst [vmem:[%s8121_s2 + $0x20] sm:$0xff] %v4433_v57  ;;  %4466 = vst [vmem:[%s8121_s2 + $0x28] sm:$0xff] %v4434_v47 }
 0x693   : > { %v4435_v22 = vadd.f32 %v8100_v54, %v4391_v8  ;;  %v4436_v34 = vadd.f32 %v8103_v63, %v4392_v46  ;;  %v4114_v58 = vpop.xlane.xlu1 %4113 }
 0x694   : > { %5672 = vrsqrt.f32 %v4315_v56  ;;  %v4316_v59 = vadd.f32 1e-05, %v4268_v42  ;;  %v8167_v19 = vmul.f32 0.00390625, %v4114_v58  ;;  %v4253_v35 = vmul.f32 %v8153_v62, %v8153_v62 }
 0x695   : > { %4467 = vst [vmem:[%s8121_s2 + $0x30] sm:$0xff] %v4435_v22  ;;  %4468 = vst [vmem:[%s8121_s2 + $0x38] sm:$0xff] %v4436_v34  ;;  %v4207_v1 = vpop.xlane.xlu0 %4206  ;;  %v5669_v23 = vpop.eup %5668  ;;  %v4289_v56 = vsub.f32 %v7940_v18, %v8131_v20  ;;  %v4290_v42 = vsub.f32 %v7944_v49, %v8131_v20  ;;  %v4292_v18 = vsub.f32 %v7951_v45, %v8139_v11 }
 0x696   : > { %5674 = vrsqrt.f32 %v4316_v59  ;;  %v4237_v44 = vmul.f32 0.00390625, %v4207_v1  ;;  %v4349_v12 = vmul.f32 %v5669_v23, %v4285_v6  ;;  %v4350_v15 = vmul.f32 %v5669_v23, %v4286_v50 }
 0x697   : > { %v5671_v21 = vpop.eup %5670  ;;  %v4210_v17 = vpop.xlane.xlu1 %4209  ;;  %v4254_v36 = vmul.f32 %v8167_v19, %v8167_v19  ;;  %v4291_v6 = vsub.f32 %v7948_v60, %v8139_v11 }
 0x698   : > { %v4351_v26 = vmul.f32 %v5671_v21, %v4287_v29  ;;  %v4352_v32 = vmul.f32 %v5671_v21, %v4288_v14  ;;  %v4269_v40 = vsub.f32 %v4237_v44, %v4253_v35  ;;  %v4393_v0 = vmul.f32 %v8094_v5, %v4349_v12 }
 0x699   : > { %v4394_v13 = vmul.f32 %v8097_v3, %v4350_v15  ;;  %v4238_v24 = vmul.f32 0.00390625, %v4210_v17  ;;  %v4117_v43 = vpop.xlane.xlu0 %4116 }
 0x69a   : > { %v4395_v33 = vmul.f32 %v8094_v5, %v4351_v26  ;;  %v4396_v25 = vmul.f32 %v8097_v3, %v4352_v32  ;;  %v4317_v52 = vadd.f32 1e-05, %v4269_v40  ;;  %v8179_v28 = vmul.f32 0.00390625, %v4117_v43 }
 0x69b   : > { %v4437_v61 = vadd.f32 %v8100_v54, %v4393_v0  ;;  %v4438_v57 = vadd.f32 %v8103_v63, %v4394_v13  ;;  %v4270_v47 = vsub.f32 %v4238_v24, %v4254_v36  ;;  %v4120_v8 = vpop.xlane.xlu1 %4119  ;;  %v4293_v24 = vsub.f32 %v7968_v48, %v8153_v62 }
 0x69c   : > { %v4439_v46 = vadd.f32 %v8100_v54, %v4395_v33  ;;  %v4440_v2 = vadd.f32 %v8103_v63, %v4396_v25  ;;  %5676 = vrsqrt.f32 %v4317_v52  ;;  %v8191_v34 = vmul.f32 0.00390625, %v4120_v8 }
 0x69d   : > { %4469 = vst [vmem:[%s8121_s2 + $0x40] sm:$0xff] %v4437_v61  ;;  %4470 = vst [vmem:[%s8121_s2 + $0x48] sm:$0xff] %v4438_v57  ;;  %v4318_v22 = vadd.f32 1e-05, %v4270_v47  ;;  %v4213_v58 = vpop.xlane.xlu0 %4212  ;;  %v4255_v50 = vmul.f32 %v8179_v28, %v8179_v28  ;;  %v4294_v52 = vsub.f32 %v7972_v4, %v8153_v62  ;;  %v4296_v4 = vsub.f32 %v7979_v37, %v8167_v19 }
 0x69e   : > { %v5673_v59 = vpop.eup %5672  ;;  %4471 = vst [vmem:[%s8121_s2 + $0x50] sm:$0xff] %v4439_v46  ;;  %4472 = vst [vmem:[%s8121_s2 + $0x58] sm:$0xff] %v4440_v2  ;;  %v4239_v29 = vmul.f32 0.00390625, %v4213_v58  ;;  %v4256_v35 = vmul.f32 %v8191_v34, %v8191_v34  ;;  %v4295_v46 = vsub.f32 %v7976_v55, %v8167_v19 }
 0x69f   : > { %v4353_v1 = vmul.f32 %v5673_v59, %v4289_v56  ;;  %v4354_v23 = vmul.f32 %v5673_v59, %v4290_v42  ;;  %5678 = vrsqrt.f32 %v4318_v22  ;;  %v4216_v49 = vpop.xlane.xlu1 %4215 }
 0x6a0   : > { %v5675_v20 = vpop.eup %5674  ;;  %v4271_v14 = vsub.f32 %v4239_v29, %v4255_v50  ;;  %v4240_v44 = vmul.f32 0.00390625, %v4216_v49 }
 0x6a1   : > { %v4397_v21 = vmul.f32 %v8094_v5, %v4353_v1  ;;  %v4398_v60 = vmul.f32 %v8097_v3, %v4354_v23  ;;  %v4355_v12 = vmul.f32 %v5675_v20, %v4291_v6  ;;  %v4356_v15 = vmul.f32 %v5675_v20, %v4292_v18  ;;  %v4123_v17 = vpop.xlane.xlu0 %4122 }
 0x6a2   : > { %v4319_v45 = vadd.f32 1e-05, %v4271_v14  ;;  %v4272_v11 = vsub.f32 %v4240_v44, %v4256_v35  ;;  %v8205_v26 = vmul.f32 0.00390625, %v4123_v17 }
 0x6a3   : > { %v4441_v32 = vadd.f32 %v8100_v54, %v4397_v21  ;;  %v4442_v40 = vadd.f32 %v8103_v63, %v4398_v60  ;;  %v4399_v0 = vmul.f32 %v8094_v5, %v4355_v12  ;;  %v4400_v13 = vmul.f32 %v8097_v3, %v4356_v15  ;;  %v4126_v36 = vpop.xlane.xlu1 %4125 }
 0x6a4   : > { %5680 = vrsqrt.f32 %v4319_v45  ;;  %v4320_v43 = vadd.f32 1e-05, %v4272_v11  ;;  %v8219_v61 = vmul.f32 0.00390625, %v4126_v36  ;;  %v4257_v8 = vmul.f32 %v8205_v26, %v8205_v26 }
 0x6a5   : > { %4473 = vst [vmem:[%s8121_s2 + $0x60] sm:$0xff] %v4441_v32  ;;  %4474 = vst [vmem:[%s8121_s2 + $0x68] sm:$0xff] %v4442_v40  ;;  %v4443_v33 = vadd.f32 %v8100_v54, %v4399_v0  ;;  %v4444_v25 = vadd.f32 %v8103_v63, %v4400_v13  ;;  %v4219_v57 = vpop.xlane.xlu0 %4218  ;;  %v4297_v21 = vsub.f32 %v7996_v38, %v8179_v28 }
 0x6a6   : > { %v5677_v47 = vpop.eup %5676  ;;  %5682 = vrsqrt.f32 %v4320_v43  ;;  %v4241_v48 = vmul.f32 0.00390625, %v4219_v57  ;;  %v4258_v22 = vmul.f32 %v8219_v61, %v8219_v61  ;;  %v4298_v60 = vsub.f32 %v8000_v30, %v8179_v28 }
 0x6a7   : > { %4475 = vst [vmem:[%s8121_s2 + $0x70] sm:$0xff] %v4443_v33  ;;  %4476 = vst [vmem:[%s8121_s2 + $0x78] sm:$0xff] %v4444_v25  ;;  %v4357_v2 = vmul.f32 %v5677_v47, %v4293_v24  ;;  %v4358_v56 = vmul.f32 %v5677_v47, %v4294_v52  ;;  %v4222_v42 = vpop.xlane.xlu1 %4221  ;;  %v4299_v38 = vsub.f32 %v8004_v9, %v8191_v34 }
 0x6a8   : > { %v4273_v62 = vsub.f32 %v4241_v48, %v4257_v8  ;;  %v4242_v58 = vmul.f32 0.00390625, %v4222_v42  ;;  %v4300_v30 = vsub.f32 %v8007_v51, %v8191_v34 }
 0x6a9   : > { %v5679_v59 = vpop.eup %5678  ;;  %v4401_v6 = vmul.f32 %v8094_v5, %v4357_v2  ;;  %v4402_v50 = vmul.f32 %v8097_v3, %v4358_v56  ;;  %v4129_v29 = vpop.xlane.xlu0 %4128 }
 0x6aa   : > { %v4359_v55 = vmul.f32 %v5679_v59, %v4295_v46  ;;  %v4360_v18 = vmul.f32 %v5679_v59, %v4296_v4  ;;  %v4321_v1 = vadd.f32 1e-05, %v4273_v62  ;;  %v4274_v23 = vsub.f32 %v4242_v58, %v4258_v22 }
 0x6ab   : > { %v4445_v49 = vadd.f32 %v8100_v54, %v4401_v6  ;;  %v4446_v37 = vadd.f32 %v8103_v63, %v4402_v50  ;;  %v8235_v19 = vmul.f32 0.00390625, %v4129_v29  ;;  %v4132_v20 = vpop.xlane.xlu1 %4131  ;;  %v4301_v4 = vsub.f32 %v8024_v31, %v8205_v26 }
 0x6ac   : > { %v4403_v14 = vmul.f32 %v8094_v5, %v4359_v55  ;;  %v4404_v35 = vmul.f32 %v8097_v3, %v4360_v18  ;;  %5684 = vrsqrt.f32 %v4321_v1  ;;  %v4322_v44 = vadd.f32 1e-05, %v4274_v23 }
 0x6ad   : > { %4477 = vst [vmem:[%s8121_s2 + $0x80] sm:$0xff] %v4445_v49  ;;  %4478 = vst [vmem:[%s8121_s2 + $0x88] sm:$0xff] %v4446_v37  ;;  %v8245_v12 = vmul.f32 0.00390625, %v4132_v20  ;;  %v4259_v15 = vmul.f32 %v8235_v19, %v8235_v19  ;;  %v4225_v17 = vpop.xlane.xlu0 %4224  ;;  %v4302_v62 = vsub.f32 %v8028_v53, %v8205_v26  ;;  %v4303_v58 = vsub.f32 %v8032_v7, %v8219_v61 }
 0x6ae   : > { %v5681_v45 = vpop.eup %5680  ;;  %v4447_v11 = vadd.f32 %v8100_v54, %v4403_v14  ;;  %v4448_v32 = vadd.f32 %v8103_v63, %v4404_v35  ;;  %5686 = vrsqrt.f32 %v4322_v44  ;;  %v4243_v40 = vmul.f32 0.00390625, %v4225_v17 }
 0x6af   : > { %v4361_v28 = vmul.f32 %v5681_v45, %v4297_v21  ;;  %v4362_v0 = vmul.f32 %v5681_v45, %v4298_v60  ;;  %v4228_v13 = vpop.xlane.xlu1 %4227  ;;  %v4260_v43 = vmul.f32 %v8245_v12, %v8245_v12  ;;  %v4304_v59 = vsub.f32 %v8035_v41, %v8219_v61 }
 0x6b0   : > { %v5683_v36 = vpop.eup %5682  ;;  %4479 = vst [vmem:[%s8121_s2 + $0x90] sm:$0xff] %v4447_v11  ;;  %4480 = vst [vmem:[%s8121_s2 + $0x98] sm:$0xff] %v4448_v32  ;;  %v4275_v24 = vsub.f32 %v4243_v40, %v4259_v15  ;;  %v4244_v33 = vmul.f32 0.00390625, %v4228_v13  ;;  %v4305_v49 = vsub.f32 %v8052_v16, %v8235_v19  ;;  %v4306_v37 = vsub.f32 %v8056_v10, %v8235_v19 }
 0x6b1   : > { %v4405_v25 = vmul.f32 %v8094_v5, %v4361_v28  ;;  %v4406_v9 = vmul.f32 %v8097_v3, %v4362_v0  ;;  %v4363_v52 = vmul.f32 %v5683_v36, %v4299_v38  ;;  %v4364_v57 = vmul.f32 %v5683_v36, %v4300_v30 }
 0x6b2   : > { %v4323_v51 = vadd.f32 1e-05, %v4275_v24  ;;  %v4276_v34 = vsub.f32 %v4244_v33, %v4260_v43  ;;  %v4307_v14 = vsub.f32 %v8060_v39, %v8245_v12  ;;  %v4308_v35 = vsub.f32 %v8063_v27, %v8245_v12 }
 0x6b3   : > { %v4449_v47 = vadd.f32 %v8100_v54, %v4405_v25  ;;  %v4450_v8 = vadd.f32 %v8103_v63, %v4406_v9  ;;  %v4407_v48 = vmul.f32 %v8094_v5, %v4363_v52  ;;  %v4408_v46 = vmul.f32 %v8097_v3, %v4364_v57 }
 0x6b4   : > { %5688 = vrsqrt.f32 %v4323_v51  ;;  %v4324_v2 = vadd.f32 1e-05, %v4276_v34 }
 0x6b5   : > { %4481 = vst [vmem:[%s8121_s2 + $0xa0] sm:$0xff] %v4449_v47  ;;  %4482 = vst [vmem:[%s8121_s2 + $0xa8] sm:$0xff] %v4450_v8  ;;  %v4451_v56 = vadd.f32 %v8100_v54, %v4407_v48  ;;  %v4452_v42 = vadd.f32 %v8103_v63, %v4408_v46 }
 0x6b6   : > { %v5685_v22 = vpop.eup %5684  ;;  %5690 = vrsqrt.f32 %v4324_v2 }
 0x6b7   : > { %4483 = vst [vmem:[%s8121_s2 + $0xb0] sm:$0xff] %v4451_v56  ;;  %4484 = vst [vmem:[%s8121_s2 + $0xb8] sm:$0xff] %v4452_v42  ;;  %v4365_v6 = vmul.f32 %v5685_v22, %v4301_v4  ;;  %v4366_v50 = vmul.f32 %v5685_v22, %v4302_v62 }
 0x6b8   : > { %v5687_v29 = vpop.eup %5686 }
 0x6b9   : > { %v4409_v31 = vmul.f32 %v8094_v5, %v4365_v6  ;;  %v4410_v53 = vmul.f32 %v8097_v3, %v4366_v50  ;;  %v4367_v26 = vmul.f32 %v5687_v29, %v4303_v58  ;;  %v4368_v55 = vmul.f32 %v5687_v29, %v4304_v59 }
 0x6bb   : > { %v4453_v18 = vadd.f32 %v8100_v54, %v4409_v31  ;;  %v4454_v1 = vadd.f32 %v8103_v63, %v4410_v53  ;;  %v4411_v7 = vmul.f32 %v8094_v5, %v4367_v26  ;;  %v4412_v23 = vmul.f32 %v8097_v3, %v4368_v55 }
 0x6bd   : > { %4485 = vst [vmem:[%s8121_s2 + $0xc0] sm:$0xff] %v4453_v18  ;;  %4486 = vst [vmem:[%s8121_s2 + $0xc8] sm:$0xff] %v4454_v1  ;;  %v4455_v41 = vadd.f32 %v8100_v54, %v4411_v7  ;;  %v4456_v61 = vadd.f32 %v8103_v63, %v4412_v23 }
 0x6be   : > { %v5689_v20 = vpop.eup %5688 }
 0x6bf   : > { %4487 = vst [vmem:[%s8121_s2 + $0xd0] sm:$0xff] %v4455_v41  ;;  %4488 = vst [vmem:[%s8121_s2 + $0xd8] sm:$0xff] %v4456_v61  ;;  %v4369_v44 = vmul.f32 %v5689_v20, %v4305_v49  ;;  %v4370_v21 = vmul.f32 %v5689_v20, %v4306_v37 }
 0x6c0   : > { %v5691_v60 = vpop.eup %5690 }
 0x6c1   : > { %v4413_v15 = vmul.f32 %v8094_v5, %v4369_v44  ;;  %v4414_v16 = vmul.f32 %v8097_v3, %v4370_v21  ;;  %v4371_v10 = vmul.f32 %v5691_v60, %v4307_v14  ;;  %v4372_v19 = vmul.f32 %v5691_v60, %v4308_v35 }
 0x6c3   : > { %v4457_v39 = vadd.f32 %v8100_v54, %v4413_v15  ;;  %v4458_v27 = vadd.f32 %v8103_v63, %v4414_v16  ;;  %v4415_v12 = vmul.f32 %v8094_v5, %v4371_v10  ;;  %v4416_v17 = vmul.f32 %v8097_v3, %v4372_v19 }
 0x6c5   : > { %4489 = vst [vmem:[%s8121_s2 + $0xe0] sm:$0xff] %v4457_v39  ;;  %4490 = vst [vmem:[%s8121_s2 + $0xe8] sm:$0xff] %v4458_v27  ;;  %v4459_v45 = vadd.f32 %v8100_v54, %v4415_v12  ;;  %v4460_v11 = vadd.f32 %v8103_v63, %v4416_v17 }
 0x6c7   : > { %4491 = vst [vmem:[%s8121_s2 + $0xf0] sm:$0xff] %v4459_v45  ;;  %4492 = vst [vmem:[%s8121_s2 + $0xf8] sm:$0xff] %v4460_v11 }
 0x6c8   : > { %5933 = shalt.err (!%p5930_p12)
}
 0x6c9   : > { %s5934_s4 = scalar_lea.hbm %s8310_s27, 4096  ;;  %s5938_s9 = scalar_lea.hbm %s8534_s21, 8192 }
 0x6ca   : > { %p5935_p8 = scmp.ne.s32.totalorder %s8310_s27, %s5934_s4  ;;  %p5939_p6 = scmp.lt.u32.totalorder %s8310_s27, %s8534_s21 }
 0x6cb   : > { %p5940_p2 = scmp.lt.u32.totalorder %s5938_s9, %s5934_s4  ;;  %p5942_p4 = scmp.lt.u32.totalorder %s5934_s4, %s8310_s27 }
 0x6cc   : > { %p5936_p3 = pnand %p5935_p8, %p8535_p9 }
 0x6cd   : > { %p5941_p13 = por %p5940_p2, %p5939_p6 }
 0x6ce   : > { %p5937_p11 = pneg %p5936_p3 }
 0x6cf   : > { %p5943_p0 = por %p5942_p4, %p5941_p13 }
 0x6d1   : > { %p5944_p7 = pnand %p5943_p0, %p5937_p11 }
 0x6d3   : > { %5947 = shalt.err (!%p5944_p7)
}
 0x6d4   : > { %s6040_s2 = smov 256   ;;  %s6041_s8 = smov 16  }
 0x6d5   : > { %5063 = dma.vmem_to_hbm [thread:$0]  (%p8535_p9), %s8312_s7, 4096, %s8310_s27, %s4494_s0, %s6040_s2, %s6040_s2, %s6041_s8  }
 0x6d6 PF: > { %s4525_s19 = sand.u32 1, %s6002_s29   ;;  %p8536_p5 = scmp.ne.s32.totalorder %s8451_s28, 0 }
 0x6d7   : > { %p8537_p1 = scmp.ge.s32.totalorder %s6022_s18, 2  ;;  %s4526_s14 = scalar_lea.sflag [#allocation4], %s4525_s19 }
 0x6d9   : > { %p5092_p10 = pnand %p8537_p1, %p8536_p5 }
 0x6db   : > { %5997 = dma.done.wait (!%p5092_p10), %s4526_s14, 4096  }
 0x6dc   : > { %5999 = vsyncadd (!%p5092_p10), %s4526_s14, 4294963200  ;;  %s36_s18 = sadd.s32 1, %s6022_s18   ;;  %s8538_s29 = smov %s6006_s30 }
 0x6dd   : > { %p33_p12 = scmp.ge.s32.totalorder %s36_s18, 4   ;;  %s8539_s30 = smov %s6010_s15 }
 0x6de   : > { %s8540_s15 = smov %s6341_s12  ;;  %s8541_s16 = smov %s6018_s17 }
 0x6df   : > { %s8542_s17 = smov %s8544_s23  ;;  %35 = sbr.rel (!%p33_p12) target bundleno = 25 (0x19), region = 160 }
 0x6e6   :  { %4531 = vsyncpa [#allocation3], 1 }
 0x6e7   :  { %4533 = vsyncpa [#allocation3 + $0x1], 1 }
 0x6e8   :  { %4534 = vsyncpa [#allocation6], 1 }
 0x6e9   :  { %4536 = vsyncpa [#allocation6 + $0x1], 1 }
 0x6ea   :  { %4537 = vsyncpa [#allocation9], 1 }
 0x6eb   :  { %4538 = vsyncpa [#allocation12], 1 }
 0x6ec   :  { %4539 = vsyncpa [#allocation15], 1 }
 0x6ed   :  { %4540 = vsyncpa [#allocation4], 1 }
 0x6ee   :  { %4542 = vsyncpa [#allocation4 + $0x1], 1 }

</bundles_post_ra>
